<compile_context>
chip_gen: v7x
topology: tpu7x:2x2x1
jax: 0.10.0
libtpu: 0.0.40
codegen_flags: <defaults>
</compile_context>

<pallas_src>
import functools

import jax
import jax.numpy as jnp
from jax.experimental import pallas as pl
from jax.experimental.pallas import tpu as pltpu

# OGB feature-dimension tables (get_atom_feature_dims / get_bond_feature_dims)
FULL_ATOM_FEATURE_DIMS = [119, 5, 12, 12, 10, 6, 6, 2, 2]
FULL_BOND_FEATURE_DIMS = [5, 6, 2]

# TODO(synk): BN eval scale assumes freshly-initialized running stats (mean=0,var=1) and
# identity affine; trained gamma/beta/running stats would need a per-channel scale/shift.
BN_EVAL_SCALE = (1.0 + 1e-5) ** -0.5
GEN_EPS = 1e-7                         # GENConv message eps


def _round_up(x, m):
    return (x + m - 1) // m * m


# ----------------------------- tiled matmul (MXU) -----------------------------

def _matmul_kernel(a_ref, b_ref, o_ref, acc_ref):
    @pl.when(pl.program_id(2) == 0)
    def _():
        acc_ref[...] = jnp.zeros_like(acc_ref)
    acc_ref[...] += jnp.dot(a_ref[...], b_ref[...],
                            preferred_element_type=jnp.float32)

    @pl.when(pl.program_id(2) == pl.num_programs(2) - 1)
    def _():
        o_ref[...] = acc_ref[...].astype(o_ref.dtype)


def pallas_matmul(a, b, out_dtype=jnp.float32):
    """C = A @ B. bf16 MXU operands, f32 accumulation, tiled & pipelined.

    Every dimension is padded to a (8,128)-aligned tile multiple (tiles capped at 256 for
    v7x's smaller VMEM) instead of falling back to a single full-dim block, so the
    double-buffered pipeline survives arbitrary shapes."""
    M, K = a.shape
    _, N = b.shape
    tm = min(256, _round_up(M, 128))
    tn = min(256, _round_up(N, 128))
    tk = min(256, _round_up(K, 128))
    Mp, Kp, Np = _round_up(M, tm), _round_up(K, tk), _round_up(N, tn)

    a_p = a.astype(jnp.bfloat16)
    b_p = b.astype(jnp.bfloat16)
    if (Mp, Kp) != (M, K):
        a_p = jnp.zeros((Mp, Kp), jnp.bfloat16).at[:M, :K].set(a_p)
    if (Kp, Np) != (K, N):
        b_p = jnp.zeros((Kp, Np), jnp.bfloat16).at[:K, :N].set(b_p)

    out = pl.pallas_call(
        _matmul_kernel,
        out_shape=jax.ShapeDtypeStruct((Mp, Np), out_dtype),
        grid=(Mp // tm, Np // tn, Kp // tk),
        in_specs=[pl.BlockSpec((tm, tk), lambda i, j, k: (i, k)),
                  pl.BlockSpec((tk, tn), lambda i, j, k: (k, j))],
        out_specs=pl.BlockSpec((tm, tn), lambda i, j, k: (i, j)),
        scratch_shapes=[pltpu.VMEM((tm, tn), jnp.float32)],
        compiler_params=pltpu.CompilerParams(
            dimension_semantics=("parallel", "parallel", "arbitrary")),
    )(a_p, b_p)
    if (Mp, Np) != (M, N):
        out = out[:M, :N]
    return out


# ----------------- fused MLP (Linear -> BN(eval) -> ReLU chain) ----------------

def _fused_mlp_kernel(*refs, n_layers, last_act):
    # refs = (x_ref, w1, b1, ..., wn, bn, o_ref); activation tile stays resident in VMEM.
    x_ref, o_ref = refs[0], refs[-1]
    h = x_ref[...]                                           # bf16 (TM, Din)
    for i in range(n_layers):
        w_ref = refs[1 + 2 * i]
        b_ref = refs[2 + 2 * i]
        y = jnp.dot(h, w_ref[...], preferred_element_type=jnp.float32) + b_ref[...]
        if i < n_layers - 1 or last_act:
            y = jnp.maximum(y * BN_EVAL_SCALE, 0.0)          # fused BN(eval)+ReLU epilogue
        h = y.astype(jnp.bfloat16) if i < n_layers - 1 else y
    o_ref[...] = h.astype(o_ref.dtype)


def pallas_fused_mlp(mlp_params, x, last_act):
    """Apply a whole Linear/BN/ReLU stack in one pallas_call (one HBM round-trip)."""
    M = x.shape[0]
    din = mlp_params[0][0].shape[0]
    dout = mlp_params[-1][0].shape[1]
    tm = min(256, _round_up(M, 16))                          # bf16 activations: 16-aligned rows
    Mp = _round_up(M, tm)
    n_layers = len(mlp_params)

    x_p = x.astype(jnp.bfloat16)
    if Mp != M:
        x_p = jnp.zeros((Mp, din), jnp.bfloat16).at[:M].set(x_p)

    in_specs = [pl.BlockSpec((tm, din), lambda i: (i, 0))]
    args = [x_p]
    for (w, b) in mlp_params:
        kin, kout = w.shape
        # TODO(synk): on v7x (64 MiB VMEM) mark these constant-index weight blocks
        # single-buffered to halve resident weight VMEM for large emb_dim.
        in_specs.append(pl.BlockSpec((kin, kout), lambda i: (0, 0)))   # weights stay resident
        in_specs.append(pl.BlockSpec((1, kout), lambda i: (0, 0)))
        args.append(w.astype(jnp.bfloat16))
        args.append(b.astype(jnp.float32))

    out = pl.pallas_call(
        functools.partial(_fused_mlp_kernel, n_layers=n_layers, last_act=last_act),
        out_shape=jax.ShapeDtypeStruct((Mp, dout), jnp.float32),
        grid=(Mp // tm,),
        in_specs=in_specs,
        out_specs=pl.BlockSpec((tm, dout), lambda i: (i, 0)),
        compiler_params=pltpu.CompilerParams(dimension_semantics=("parallel",)),
    )(*args)
    return out[:M] if Mp != M else out


# ------------------- fused DAGNN: K hops + retain-score readout -----------------

def _dagnn_fused_kernel(adj_ref, h_ref, w_ref, b_ref, o_ref, *, k_hops):
    # adjacency stays resident in VMEM across all hops; hop activations never touch HBM.
    w = w_ref[...]                                       # (1, D) f32
    b = b_ref[...]                                       # (1, 1) f32
    adj = adj_ref[...]                                   # (Np, Np) bf16
    x = h_ref[...]                                       # (Np, D) f32
    score = jax.nn.sigmoid(jnp.sum(x * w, axis=-1, keepdims=True) + b)   # VPU+XLU retain score
    acc = score * x
    for _ in range(k_hops):
        x = jnp.dot(adj, x.astype(jnp.bfloat16), preferred_element_type=jnp.float32)
        score = jax.nn.sigmoid(jnp.sum(x * w, axis=-1, keepdims=True) + b)
        acc = acc + score * x
    o_ref[...] = acc


def _dagnn_readout_kernel(*refs, k1):
    # fallback readout: out = sum_k sigmoid(<pred_k, w> + b) * pred_k, tiled over nodes.
    o_ref = refs[-1]
    w = refs[k1][...]                                    # (1, D) f32
    b = refs[k1 + 1][...]                                # (1, 1) f32
    acc = jnp.zeros(o_ref.shape, jnp.float32)
    for k in range(k1):
        chunk = refs[k][...].astype(jnp.float32)         # (tm, D), preds may be bf16
        s = jax.nn.sigmoid(jnp.sum(chunk * w, axis=-1, keepdims=True) + b)   # VPU, not 1-col MXU
        acc = acc + s * chunk
    o_ref[...] = acc


def pallas_dagnn_readout(preds, w_row, b11):
    Np, D = preds[0].shape                               # Np is already a multiple of 128
    tm = 128
    k1 = len(preds)
    in_specs = [pl.BlockSpec((tm, D), lambda i: (i, 0)) for _ in range(k1)]
    in_specs += [pl.BlockSpec((1, D), lambda i: (0, 0)),
                 pl.BlockSpec((1, 1), lambda i: (0, 0))]
    return pl.pallas_call(
        functools.partial(_dagnn_readout_kernel, k1=k1),
        out_shape=jax.ShapeDtypeStruct((Np, D), jnp.float32),
        grid=(Np // tm,),
        in_specs=in_specs,
        out_specs=pl.BlockSpec((tm, D), lambda i: (i, 0)),
        compiler_params=pltpu.CompilerParams(dimension_semantics=("parallel",)),
    )(*preds, w_row, b11)


# -------------------------- tiled DistMax + mask kernel -------------------------

def _row_score_kernel(x_ref, w_ref, o_ref):
    # s_i = <x_i, w>  (hoisted out of the 2D distmax grid; computed exactly once per row)
    o_ref[...] = jnp.sum(x_ref[...] * w_ref[...], axis=-1, keepdims=True)


def _distmax_kernel(xi_ref, xj_ref, si_ref, sj_ref, w_ref, b_ref, bi_ref, bj_ref,
                    d_ref, m_ref):
    ti, tj = d_ref.shape
    xi = xi_ref[...]                       # (ti, D) f32
    w = w_ref[...]                         # (1, D)  f32
    si = si_ref[...]                       # (ti, 1)
    sj = sj_ref[...]                       # (1, tj)

    # 0.5 * sum_d w_d |x_id - x_jd|, built one output column per step on full (ti, D)
    # vregs (no per-feature lane extraction / broadcast; lane reduce runs on the XLU).
    lane_ids = jax.lax.broadcasted_iota(jnp.int32, (1, tj), 1)

    def body(j, acc):
        xj_row = xj_ref[pl.ds(j, 1), :]                                   # (1, D)
        col = jnp.sum(w * jnp.abs(xi - xj_row), axis=-1, keepdims=True)   # (ti, 1)
        return jnp.where(lane_ids == j, col, acc)

    absd = jax.lax.fori_loop(0, tj, body, jnp.zeros((ti, tj), jnp.float32))

    # w·max(x_i,x_j) + b = 0.5((Xw)_i + (Xw)_j) + 0.5·sum_d w_d |x_id - x_jd| + b
    d_pred = 0.5 * (si + sj) + 0.5 * absd + b_ref[...]

    # mask generated in-kernel: same graph, off-diagonal, and not a padded row/col
    bi = bi_ref[...]                       # (ti, 1) int32 (padded rows carry -1)
    bj = bj_ref[...]                       # (1, tj) int32
    row = jax.lax.broadcasted_iota(jnp.int32, (ti, tj), 0) + pl.program_id(0) * ti
    col = jax.lax.broadcasted_iota(jnp.int32, (ti, tj), 1) + pl.program_id(1) * tj
    mask = ((bi == bj) & (bi >= 0) & (row != col)).astype(jnp.float32)

    m_ref[...] = mask
    d_ref[...] = jnp.maximum(d_pred * mask, 0.0)          # train=False path


def pallas_distmax(xs, w, b, batch):
    """relu(fc(max(xs_i, xs_j)) * mask) plus mask, tiled on a 2D (N,N) grid."""
    N, D = xs.shape
    TI = TJ = 128                                         # >=128 lanes -> unmasked full-tile stores
    Np = _round_up(N, TI)

    xs_p = xs.astype(jnp.float32)
    batch_p = batch.astype(jnp.int32)
    if Np != N:
        xs_p = jnp.zeros((Np, D), jnp.float32).at[:N].set(xs_p)
        batch_p = jnp.full((Np,), -1, jnp.int32).at[:N].set(batch_p)

    w_row = w.reshape(1, D).astype(jnp.float32)
    b11 = b.reshape(1, 1).astype(jnp.float32)

    # Hoisted projection s = Xw, reused by every tile of the 2D grid.
    s = pl.pallas_call(
        _row_score_kernel,
        out_shape=jax.ShapeDtypeStruct((Np, 1), jnp.float32),
        grid=(Np // TI,),
        in_specs=[pl.BlockSpec((TI, D), lambda i: (i, 0)),
                  pl.BlockSpec((1, D), lambda i: (0, 0))],
        out_specs=pl.BlockSpec((TI, 1), lambda i: (i, 0)),
        compiler_params=pltpu.CompilerParams(dimension_semantics=("parallel",)),
    )(xs_p, w_row)

    d_p, m_p = pl.pallas_call(
        _distmax_kernel,
        out_shape=(jax.ShapeDtypeStruct((Np, Np), jnp.float32),
                   jax.ShapeDtypeStruct((Np, Np), jnp.float32)),
        grid=(Np // TI, Np // TJ),
        in_specs=[pl.BlockSpec((TI, D), lambda i, j: (i, 0)),     # x_i rows
                  pl.BlockSpec((TJ, D), lambda i, j: (j, 0)),     # x_j rows (natural layout)
                  pl.BlockSpec((TI, 1), lambda i, j: (i, 0)),     # s_i
                  pl.BlockSpec((1, TJ), lambda i, j: (0, j)),     # s_j
                  pl.BlockSpec((1, D), lambda i, j: (0, 0)),      # w
                  pl.BlockSpec((1, 1), lambda i, j: (0, 0)),      # bias
                  pl.BlockSpec((TI, 1), lambda i, j: (i, 0)),     # batch ids (rows)
                  pl.BlockSpec((1, TJ), lambda i, j: (0, j))],    # batch ids (cols)
        out_specs=(pl.BlockSpec((TI, TJ), lambda i, j: (i, j)),
                   pl.BlockSpec((TI, TJ), lambda i, j: (i, j))),
        compiler_params=pltpu.CompilerParams(
            dimension_semantics=("parallel", "parallel")),
    )(xs_p, xs_p, s, s.reshape(1, Np), w_row, b11,
      batch_p.reshape(Np, 1), batch_p.reshape(1, Np))

    if Np != N:
        return d_p[:N, :N], m_p[:N, :N]
    return d_p, m_p


# ----------------------------- parameter init --------------------------------

def xavier_uniform(key, shape):
    bound = (6.0 / (shape[0] + shape[1])) ** 0.5
    return jax.random.uniform(key, shape, jnp.float32, -bound, bound)


def init_linear(key, din, dout):
    kw, kb = jax.random.split(key)
    bound = 1.0 / (din ** 0.5)
    w = jax.random.uniform(kw, (din, dout), jnp.float32, -bound, bound)
    b = jax.random.uniform(kb, (1, dout), jnp.float32, -bound, bound)
    return w, b


def init_params(key, emb_dim, num_layers):
    keys = iter(jax.random.split(key, 256))
    p = {}
    p['atom_emb'] = [xavier_uniform(next(keys), (d, emb_dim)) for d in FULL_ATOM_FEATURE_DIMS]
    p['bond_emb'] = [xavier_uniform(next(keys), (d, emb_dim)) for d in FULL_BOND_FEATURE_DIMS]
    p['vn_emb'] = jnp.zeros((1, emb_dim), jnp.float32)        # torch.nn.init.constant_(0)
    # GENConv MLP channels: [D, 2D, 2D, 2D, 2D, D] (num_layers=5), learnable t=1.0
    channels = [emb_dim] + [2 * emb_dim] * 4 + [emb_dim]
    p['layers'] = []
    for _ in range(num_layers):
        mlp = [init_linear(next(keys), channels[i], channels[i + 1])
               for i in range(len(channels) - 1)]
        p['layers'].append({'t': jnp.asarray(1.0, jnp.float32), 'mlp': mlp})
    p['vn_mlps'] = [[init_linear(next(keys), emb_dim, emb_dim),
                     init_linear(next(keys), emb_dim, emb_dim)]
                    for _ in range(num_layers - 1)]
    p['dagnn_proj'] = init_linear(next(keys), emb_dim, 1)
    p['dist_fc'] = init_linear(next(keys), emb_dim, 1)
    return p


# ----------------------------- model forward ---------------------------------

def atom_encoder(p, x):
    # TODO(synk): embedding gather is data-dependent; kept in plain JAX (no clean Pallas equivalent).
    return sum(jnp.take(p['atom_emb'][i], x[:, i], axis=0) for i in range(x.shape[1]))


def bond_encoder(p, ea):
    return sum(jnp.take(p['bond_emb'][i], ea[:, i], axis=0) for i in range(ea.shape[1]))


def gen_conv(conv_p, h, edge_index, edge_attr, num_nodes):
    """GENConv (aggr='softmax', learnable t): msg=relu(x_j+e)+eps -> per-dst softmax sum -> +x -> MLP."""
    src, dst = edge_index[0], edge_index[1]
    msg = jax.nn.relu(h[src] + edge_attr) + GEN_EPS               # (E, D)
    alpha = msg * conv_p['t']
    # TODO(synk): per-destination segment softmax/scatter is data-dependent; kept in plain JAX.
    seg_max = jax.ops.segment_max(alpha, dst, num_segments=num_nodes)
    ex = jnp.exp(alpha - seg_max[dst])
    denom = jax.ops.segment_sum(ex, dst, num_segments=num_nodes)
    soft = ex / denom[dst]
    out = jax.ops.segment_sum(msg * soft, dst, num_segments=num_nodes)
    out = out + h
    # fused 5-layer MLP: Linear -> BN(eval) -> ReLU between layers, plain last layer
    return pallas_fused_mlp(conv_p['mlp'], out, last_act=False)


def deep_gcn_layer(conv_p, h, edge_index, edge_attr, num_nodes):
    # DeepGCNLayer block='res+':  x + conv(act(norm(x)))   (dropout=0)
    hh = jax.nn.relu(h * BN_EVAL_SCALE)
    hh = gen_conv(conv_p, hh, edge_index, edge_attr, num_nodes)
    return h + hh


def dagnn(p, h, edge_index, num_nodes, K=5):
    # gcn_norm with self loops (improved=False)
    src, dst = edge_index[0], edge_index[1]
    loop = jnp.arange(num_nodes, dtype=src.dtype)
    src = jnp.concatenate([src, loop])
    dst = jnp.concatenate([dst, loop])
    ew = jnp.ones(src.shape[0], jnp.float32)
    deg = jax.ops.segment_sum(ew, dst, num_segments=num_nodes)
    dis = jnp.where(deg > 0, 1.0 / jnp.sqrt(deg), 0.0)
    norm = dis[src] * ew * dis[dst]
    # TODO(synk): dense adjacency scatter-build is data-dependent; kept in plain JAX.
    adj = jnp.zeros((num_nodes, num_nodes), jnp.float32).at[dst, src].add(norm)

    D = h.shape[1]
    Np = _round_up(num_nodes, 128)
    adj_p, h_p = adj, h
    if Np != num_nodes:
        adj_p = jnp.zeros((Np, Np), jnp.float32).at[:num_nodes, :num_nodes].set(adj)
        h_p = jnp.zeros((Np, D), jnp.float32).at[:num_nodes].set(h)
    adj_bf16 = adj_p.astype(jnp.bfloat16)                    # cast once; MXU-native operand

    w, b = p['dagnn_proj']                                   # (D,1), (1,1)
    w_row = w.reshape(1, D).astype(jnp.float32)
    b11 = b.reshape(1, 1).astype(jnp.float32)

    # Fully fused K-hop propagation + readout with the adjacency resident in VMEM whenever
    # the padded problem fits a conservative budget (safe under the default scoped VMEM
    # limit on v5e/v6e/v7x); otherwise fall back to tiled, pipelined per-hop matmuls with
    # bf16 intermediate hop outputs and a VPU retain-score readout.
    vmem_need = 2 * (Np * Np * 2) + 12 * (Np * D * 4)
    if vmem_need <= 14 * 1024 * 1024:
        out_p = pl.pallas_call(
            functools.partial(_dagnn_fused_kernel, k_hops=K),
            out_shape=jax.ShapeDtypeStruct((Np, D), jnp.float32),
            grid=(1,),
            in_specs=[pl.BlockSpec((Np, Np), lambda i: (0, 0)),
                      pl.BlockSpec((Np, D), lambda i: (0, 0)),
                      pl.BlockSpec((1, D), lambda i: (0, 0)),
                      pl.BlockSpec((1, 1), lambda i: (0, 0))],
            out_specs=pl.BlockSpec((Np, D), lambda i: (0, 0)),
            compiler_params=pltpu.CompilerParams(dimension_semantics=("arbitrary",)),
        )(adj_bf16, h_p, w_row, b11)
    else:
        preds = [h_p]
        x = h_p
        for _ in range(K):
            # bf16 hop outputs halve the N*D HBM write+read per hop (f32 accumulation inside)
            x = pallas_matmul(adj_bf16, x, out_dtype=jnp.bfloat16)
            preds.append(x)
        out_p = pallas_dagnn_readout(preds, w_row, b11)

    return out_p[:num_nodes] if Np != num_nodes else out_p


def deepergcn_forward(p, x, edge_index, edge_attr, batch, num_graphs):
    num_nodes = x.shape[0]
    e = bond_encoder(p, edge_attr)
    h = atom_encoder(p, x)
    vn = jnp.tile(p['vn_emb'], (num_graphs, 1))              # virtualnode embedding (zeros)
    h = h + vn[batch]
    h = gen_conv(p['layers'][0], h, edge_index, e, num_nodes)
    for i, lp in enumerate(p['layers'][1:]):
        h = deep_gcn_layer(lp, h, edge_index, e, num_nodes)
        vn_tmp = jax.ops.segment_sum(h, batch, num_segments=num_graphs) + vn
        vn = pallas_fused_mlp(p['vn_mlps'][i], vn_tmp, last_act=True)   # dropout: identity (eval)
        h = h + vn[batch]
    h = jax.nn.relu(h * BN_EVAL_SCALE)                       # layers[0].act(layers[0].norm(h))
    h = h + vn[batch]
    h = dagnn(p, h, edge_index, num_nodes)
    return h                                                 # JK='last'


def deepergcn_dagnn_dist_forward(p, x, edge_index, edge_attr, batch, num_graphs):
    num_nodes = x.shape[0]
    xs = deepergcn_forward(p, x, edge_index, edge_attr, batch, num_graphs)
    w, b = p['dist_fc']                                      # (D,1), (1,1)
    mask_d_pred, mask = pallas_distmax(xs, w, b, batch)      # relu(d_pred*mask), in-kernel mask
    # count = sum(mask) = sum_g n_g^2 - N  (closed form, no extra N^2 HBM read)
    n_per_graph = jax.ops.segment_sum(jnp.ones((num_nodes,), jnp.float32),
                                      batch, num_segments=num_graphs)
    count = jnp.sum(n_per_graph * n_per_graph) - jnp.float32(num_nodes)
    return mask_d_pred, mask, count


forward_jit = jax.jit(deepergcn_dagnn_dist_forward, static_argnums=(5,))


# ----------------------------- demo / smoke test ------------------------------

if __name__ == "__main__":
    key = jax.random.PRNGKey(0)
    emb_dim, num_layers = 32, 3
    nodes_per_graph, num_graphs = 8, 2
    N = nodes_per_graph * num_graphs
    E_per_graph = 20
    E = E_per_graph * num_graphs

    kp, kx, ke, ks = jax.random.split(key, 4)
    params = init_params(kp, emb_dim, num_layers)

    xkeys = jax.random.split(kx, len(FULL_ATOM_FEATURE_DIMS))
    x = jnp.stack([jax.random.randint(k, (N,), 0, d)
                   for k, d in zip(xkeys, FULL_ATOM_FEATURE_DIMS)], axis=1).astype(jnp.int32)

    ekeys = jax.random.split(ke, len(FULL_BOND_FEATURE_DIMS))
    edge_attr = jnp.stack([jax.random.randint(k, (E,), 0, d)
                           for k, d in zip(ekeys, FULL_BOND_FEATURE_DIMS)], axis=1).astype(jnp.int32)

    sk, dk = jax.random.split(ks)
    srcs, dsts = [], []
    for g in range(num_graphs):
        lo = g * nodes_per_graph
        srcs.append(jax.random.randint(jax.random.fold_in(sk, g), (E_per_graph,),
                                       lo, lo + nodes_per_graph))
        dsts.append(jax.random.randint(jax.random.fold_in(dk, g), (E_per_graph,),
                                       lo, lo + nodes_per_graph))
    edge_index = jnp.stack([jnp.concatenate(srcs), jnp.concatenate(dsts)]).astype(jnp.int32)

    batch = jnp.repeat(jnp.arange(num_graphs, dtype=jnp.int32), nodes_per_graph)

    mask_d_pred, mask, count = forward_jit(
        params, x, edge_index, edge_attr, batch, num_graphs)
    jax.block_until_ready((mask_d_pred, mask, count))

    assert mask_d_pred.shape == (N, N) and mask.shape == (N, N) and count.shape == ()
    assert bool(jnp.all(jnp.isfinite(mask_d_pred)))
    assert bool(jnp.all((mask == 0.0) | (mask == 1.0)))
    print("KERNEL_OK")
</pallas_src>

<mosaic_0001>
module attributes {stable_mosaic.version = 11 : i64} {
  func.func private @main(%arg0: i32) attributes {dimension_semantics = [#tpu.dimension_semantics<core_parallel>], iteration_bounds = array<i64: 2>, tpu.core_type = #tpu.core_type<sc_scalar_subcore>, window_params = []} {
    return
  }
}

module attributes {stable_mosaic.version = 11 : i64} {
  func.func private @main(%arg0: i32) attributes {dimension_semantics = [#tpu.dimension_semantics<core_parallel>], iteration_bounds = array<i64: 2>, tpu.core_type = #tpu.core_type<sc_scalar_subcore>, window_params = []} {
    return
  }
}

module attributes {stable_mosaic.version = 11 : i64} {
  func.func @_fused_mlp_kernel(%arg0: i32, %arg1: memref<16x32xbf16, #tpu.memory_space<vmem>>, %arg2: memref<32x64xbf16, #tpu.memory_space<vmem>>, %arg3: memref<1x64xf32, #tpu.memory_space<vmem>>, %arg4: memref<64x64xbf16, #tpu.memory_space<vmem>>, %arg5: memref<1x64xf32, #tpu.memory_space<vmem>>, %arg6: memref<64x64xbf16, #tpu.memory_space<vmem>>, %arg7: memref<1x64xf32, #tpu.memory_space<vmem>>, %arg8: memref<64x64xbf16, #tpu.memory_space<vmem>>, %arg9: memref<1x64xf32, #tpu.memory_space<vmem>>, %arg10: memref<64x32xbf16, #tpu.memory_space<vmem>>, %arg11: memref<1x32xf32, #tpu.memory_space<vmem>>, %arg12: memref<16x32xf32, #tpu.memory_space<vmem>>) attributes {dimension_semantics = [#tpu.dimension_semantics<parallel>], iteration_bounds = array<i64: 1>, scalar_prefetch = 0 : i64, scratch_operands = 0 : i64, tpu.core_type = #tpu.core_type<tc>, window_params = [{transform_indices = @transform_0, window_bounds = array<i64: 16, 32>}, {pipeline_mode = #tpu.pipeline_mode<synchronous>, transform_indices = @transform_1, window_bounds = array<i64: 32, 64>}, {pipeline_mode = #tpu.pipeline_mode<synchronous>, transform_indices = @transform_2, window_bounds = array<i64: 1, 64>}, {pipeline_mode = #tpu.pipeline_mode<synchronous>, transform_indices = @transform_3, window_bounds = array<i64: 64, 64>}, {pipeline_mode = #tpu.pipeline_mode<synchronous>, transform_indices = @transform_4, window_bounds = array<i64: 1, 64>}, {pipeline_mode = #tpu.pipeline_mode<synchronous>, transform_indices = @transform_5, window_bounds = array<i64: 64, 64>}, {pipeline_mode = #tpu.pipeline_mode<synchronous>, transform_indices = @transform_6, window_bounds = array<i64: 1, 64>}, {pipeline_mode = #tpu.pipeline_mode<synchronous>, transform_indices = @transform_7, window_bounds = array<i64: 64, 64>}, {pipeline_mode = #tpu.pipeline_mode<synchronous>, transform_indices = @transform_8, window_bounds = array<i64: 1, 64>}, {pipeline_mode = #tpu.pipeline_mode<synchronous>, transform_indices = @transform_9, window_bounds = array<i64: 64, 32>}, {pipeline_mode = #tpu.pipeline_mode<synchronous>, transform_indices = @transform_10, window_bounds = array<i64: 1, 32>}, {transform_indices = @transform_11, window_bounds = array<i64: 16, 32>}]} {
    %c0 = arith.constant 0 : index
    %c0_0 = arith.constant 0 : index
    %0 = vector.load %arg1[%c0, %c0_0] : memref<16x32xbf16, #tpu.memory_space<vmem>>, vector<16x32xbf16>
    %c0_1 = arith.constant 0 : index
    %c0_2 = arith.constant 0 : index
    %1 = vector.load %arg2[%c0_1, %c0_2] : memref<32x64xbf16, #tpu.memory_space<vmem>>, vector<32x64xbf16>
    %cst = arith.constant dense<0.000000e+00> : vector<16x64xf32>
    %2 = tpu.matmul %0, %1, %cst {dimension_numbers = #tpu.dot_dimension_numbers<[1], [0], [0], [1], [0, 0, 1, 1], [], []>} : vector<16x32xbf16>, vector<32x64xbf16>, vector<16x64xf32> -> vector<16x64xf32>
    %c0_3 = arith.constant 0 : index
    %c0_4 = arith.constant 0 : index
    %3 = vector.load %arg3[%c0_3, %c0_4] : memref<1x64xf32, #tpu.memory_space<vmem>>, vector<1x64xf32>
    %4 = vector.broadcast %3 : vector<1x64xf32> to vector<16x64xf32>
    %5 = arith.addf %2, %4 : vector<16x64xf32>
    %cst_5 = arith.constant 0.999994993 : f32
    %6 = vector.broadcast %cst_5 : f32 to vector<16x64xf32>
    %7 = arith.mulf %5, %6 : vector<16x64xf32>
    %cst_6 = arith.constant 0.000000e+00 : f32
    %8 = vector.broadcast %cst_6 : f32 to vector<16x64xf32>
    %9 = arith.maximumf %7, %8 : vector<16x64xf32>
    %10 = arith.truncf %9 : vector<16x64xf32> to vector<16x64xbf16>
    %c0_7 = arith.constant 0 : index
    %c0_8 = arith.constant 0 : index
    %11 = vector.load %arg4[%c0_7, %c0_8] : memref<64x64xbf16, #tpu.memory_space<vmem>>, vector<64x64xbf16>
    %cst_9 = arith.constant dense<0.000000e+00> : vector<16x64xf32>
    %12 = tpu.matmul %10, %11, %cst_9 {dimension_numbers = #tpu.dot_dimension_numbers<[1], [0], [0], [1], [0, 0, 1, 1], [], []>} : vector<16x64xbf16>, vector<64x64xbf16>, vector<16x64xf32> -> vector<16x64xf32>
    %c0_10 = arith.constant 0 : index
    %c0_11 = arith.constant 0 : index
    %13 = vector.load %arg5[%c0_10, %c0_11] : memref<1x64xf32, #tpu.memory_space<vmem>>, vector<1x64xf32>
    %14 = vector.broadcast %13 : vector<1x64xf32> to vector<16x64xf32>
    %15 = arith.addf %12, %14 : vector<16x64xf32>
    %cst_12 = arith.constant 0.999994993 : f32
    %16 = vector.broadcast %cst_12 : f32 to vector<16x64xf32>
    %17 = arith.mulf %15, %16 : vector<16x64xf32>
    %cst_13 = arith.constant 0.000000e+00 : f32
    %18 = vector.broadcast %cst_13 : f32 to vector<16x64xf32>
    %19 = arith.maximumf %17, %18 : vector<16x64xf32>
    %20 = arith.truncf %19 : vector<16x64xf32> to vector<16x64xbf16>
    %c0_14 = arith.constant 0 : index
    %c0_15 = arith.constant 0 : index
    %21 = vector.load %arg6[%c0_14, %c0_15] : memref<64x64xbf16, #tpu.memory_space<vmem>>, vector<64x64xbf16>
    %cst_16 = arith.constant dense<0.000000e+00> : vector<16x64xf32>
    %22 = tpu.matmul %20, %21, %cst_16 {dimension_numbers = #tpu.dot_dimension_numbers<[1], [0], [0], [1], [0, 0, 1, 1], [], []>} : vector<16x64xbf16>, vector<64x64xbf16>, vector<16x64xf32> -> vector<16x64xf32>
    %c0_17 = arith.constant 0 : index
    %c0_18 = arith.constant 0 : index
    %23 = vector.load %arg7[%c0_17, %c0_18] : memref<1x64xf32, #tpu.memory_space<vmem>>, vector<1x64xf32>
    %24 = vector.broadcast %23 : vector<1x64xf32> to vector<16x64xf32>
    %25 = arith.addf %22, %24 : vector<16x64xf32>
    %cst_19 = arith.constant 0.999994993 : f32
    %26 = vector.broadcast %cst_19 : f32 to vector<16x64xf32>
    %27 = arith.mulf %25, %26 : vector<16x64xf32>
    %cst_20 = arith.constant 0.000000e+00 : f32
    %28 = vector.broadcast %cst_20 : f32 to vector<16x64xf32>
    %29 = arith.maximumf %27, %28 : vector<16x64xf32>
    %30 = arith.truncf %29 : vector<16x64xf32> to vector<16x64xbf16>
    %c0_21 = arith.constant 0 : index
    %c0_22 = arith.constant 0 : index
    %31 = vector.load %arg8[%c0_21, %c0_22] : memref<64x64xbf16, #tpu.memory_space<vmem>>, vector<64x64xbf16>
    %cst_23 = arith.constant dense<0.000000e+00> : vector<16x64xf32>
    %32 = tpu.matmul %30, %31, %cst_23 {dimension_numbers = #tpu.dot_dimension_numbers<[1], [0], [0], [1], [0, 0, 1, 1], [], []>} : vector<16x64xbf16>, vector<64x64xbf16>, vector<16x64xf32> -> vector<16x64xf32>
    %c0_24 = arith.constant 0 : index
    %c0_25 = arith.constant 0 : index
    %33 = vector.load %arg9[%c0_24, %c0_25] : memref<1x64xf32, #tpu.memory_space<vmem>>, vector<1x64xf32>
    %34 = vector.broadcast %33 : vector<1x64xf32> to vector<16x64xf32>
    %35 = arith.addf %32, %34 : vector<16x64xf32>
    %cst_26 = arith.constant 0.999994993 : f32
    %36 = vector.broadcast %cst_26 : f32 to vector<16x64xf32>
    %37 = arith.mulf %35, %36 : vector<16x64xf32>
    %cst_27 = arith.constant 0.000000e+00 : f32
    %38 = vector.broadcast %cst_27 : f32 to vector<16x64xf32>
    %39 = arith.maximumf %37, %38 : vector<16x64xf32>
    %40 = arith.truncf %39 : vector<16x64xf32> to vector<16x64xbf16>
    %c0_28 = arith.constant 0 : index
    %c0_29 = arith.constant 0 : index
    %41 = vector.load %arg10[%c0_28, %c0_29] : memref<64x32xbf16, #tpu.memory_space<vmem>>, vector<64x32xbf16>
    %cst_30 = arith.constant dense<0.000000e+00> : vector<16x32xf32>
    %42 = tpu.matmul %40, %41, %cst_30 {dimension_numbers = #tpu.dot_dimension_numbers<[1], [0], [0], [1], [0, 0, 1, 1], [], []>} : vector<16x64xbf16>, vector<64x32xbf16>, vector<16x32xf32> -> vector<16x32xf32>
    %c0_31 = arith.constant 0 : index
    %c0_32 = arith.constant 0 : index
    %43 = vector.load %arg11[%c0_31, %c0_32] : memref<1x32xf32, #tpu.memory_space<vmem>>, vector<1x32xf32>
    %44 = vector.broadcast %43 : vector<1x32xf32> to vector<16x32xf32>
    %45 = arith.addf %42, %44 : vector<16x32xf32>
    %c0_33 = arith.constant 0 : index
    %c0_34 = arith.constant 0 : index
    %46 = vector.load %arg12[%c0_33, %c0_34] : memref<16x32xf32, #tpu.memory_space<vmem>>, vector<16x32xf32>
    tpu.vector_store %arg12[%c0_33, %c0_34], %45 {strides = array<i32>} : memref<16x32xf32, #tpu.memory_space<vmem>>, vector<16x32xf32>,
    return
  }
  func.func @transform_0(%arg0: i32) -> (i32, i32) {
    %c0_i32 = arith.constant 0 : i32
    %c0_i32_0 = arith.constant 0 : i32
    return %arg0, %c0_i32 : i32, i32
  }
  func.func @transform_1(%arg0: i32) -> (i32, i32) {
    %c0_i32 = arith.constant 0 : i32
    %c0_i32_0 = arith.constant 0 : i32
    %c0_i32_1 = arith.constant 0 : i32
    return %c0_i32, %c0_i32_0 : i32, i32
  }
  func.func @transform_2(%arg0: i32) -> (i32, i32) {
    %c0_i32 = arith.constant 0 : i32
    %c0_i32_0 = arith.constant 0 : i32
    %c0_i32_1 = arith.constant 0 : i32
    return %c0_i32, %c0_i32_0 : i32, i32
  }
  func.func @transform_3(%arg0: i32) -> (i32, i32) {
    %c0_i32 = arith.constant 0 : i32
    %c0_i32_0 = arith.constant 0 : i32
    %c0_i32_1 = arith.constant 0 : i32
    return %c0_i32, %c0_i32_0 : i32, i32
  }
  func.func @transform_4(%arg0: i32) -> (i32, i32) {
    %c0_i32 = arith.constant 0 : i32
    %c0_i32_0 = arith.constant 0 : i32
    %c0_i32_1 = arith.constant 0 : i32
    return %c0_i32, %c0_i32_0 : i32, i32
  }
  func.func @transform_5(%arg0: i32) -> (i32, i32) {
    %c0_i32 = arith.constant 0 : i32
    %c0_i32_0 = arith.constant 0 : i32
    %c0_i32_1 = arith.constant 0 : i32
    return %c0_i32, %c0_i32_0 : i32, i32
  }
  func.func @transform_6(%arg0: i32) -> (i32, i32) {
    %c0_i32 = arith.constant 0 : i32
    %c0_i32_0 = arith.constant 0 : i32
    %c0_i32_1 = arith.constant 0 : i32
    return %c0_i32, %c0_i32_0 : i32, i32
  }
  func.func @transform_7(%arg0: i32) -> (i32, i32) {
    %c0_i32 = arith.constant 0 : i32
    %c0_i32_0 = arith.constant 0 : i32
    %c0_i32_1 = arith.constant 0 : i32
    return %c0_i32, %c0_i32_0 : i32, i32
  }
  func.func @transform_8(%arg0: i32) -> (i32, i32) {
    %c0_i32 = arith.constant 0 : i32
    %c0_i32_0 = arith.constant 0 : i32
    %c0_i32_1 = arith.constant 0 : i32
    return %c0_i32, %c0_i32_0 : i32, i32
  }
  func.func @transform_9(%arg0: i32) -> (i32, i32) {
    %c0_i32 = arith.constant 0 : i32
    %c0_i32_0 = arith.constant 0 : i32
    %c0_i32_1 = arith.constant 0 : i32
    return %c0_i32, %c0_i32_0 : i32, i32
  }
  func.func @transform_10(%arg0: i32) -> (i32, i32) {
    %c0_i32 = arith.constant 0 : i32
    %c0_i32_0 = arith.constant 0 : i32
    %c0_i32_1 = arith.constant 0 : i32
    return %c0_i32, %c0_i32_0 : i32, i32
  }
  func.func @transform_11(%arg0: i32) -> (i32, i32) {
    %c0_i32 = arith.constant 0 : i32
    %c0_i32_0 = arith.constant 0 : i32
    return %arg0, %c0_i32 : i32, i32
  }
}

module attributes {stable_mosaic.version = 11 : i64} {
  func.func @_fused_mlp_kernel(%arg0: i32, %arg1: memref<16x32xbf16, #tpu.memory_space<vmem>>, %arg2: memref<32x32xbf16, #tpu.memory_space<vmem>>, %arg3: memref<1x32xf32, #tpu.memory_space<vmem>>, %arg4: memref<32x32xbf16, #tpu.memory_space<vmem>>, %arg5: memref<1x32xf32, #tpu.memory_space<vmem>>, %arg6: memref<16x32xf32, #tpu.memory_space<vmem>>) attributes {dimension_semantics = [#tpu.dimension_semantics<parallel>], iteration_bounds = array<i64: 1>, scalar_prefetch = 0 : i64, scratch_operands = 0 : i64, tpu.core_type = #tpu.core_type<tc>, window_params = [{transform_indices = @transform_0, window_bounds = array<i64: 16, 32>}, {pipeline_mode = #tpu.pipeline_mode<synchronous>, transform_indices = @transform_1, window_bounds = array<i64: 32, 32>}, {pipeline_mode = #tpu.pipeline_mode<synchronous>, transform_indices = @transform_2, window_bounds = array<i64: 1, 32>}, {pipeline_mode = #tpu.pipeline_mode<synchronous>, transform_indices = @transform_3, window_bounds = array<i64: 32, 32>}, {pipeline_mode = #tpu.pipeline_mode<synchronous>, transform_indices = @transform_4, window_bounds = array<i64: 1, 32>}, {transform_indices = @transform_5, window_bounds = array<i64: 16, 32>}]} {
    %c0 = arith.constant 0 : index
    %c0_0 = arith.constant 0 : index
    %0 = vector.load %arg1[%c0, %c0_0] : memref<16x32xbf16, #tpu.memory_space<vmem>>, vector<16x32xbf16>
    %c0_1 = arith.constant 0 : index
    %c0_2 = arith.constant 0 : index
    %1 = vector.load %arg2[%c0_1, %c0_2] : memref<32x32xbf16, #tpu.memory_space<vmem>>, vector<32x32xbf16>
    %cst = arith.constant dense<0.000000e+00> : vector<16x32xf32>
    %2 = tpu.matmul %0, %1, %cst {dimension_numbers = #tpu.dot_dimension_numbers<[1], [0], [0], [1], [0, 0, 1, 1], [], []>} : vector<16x32xbf16>, vector<32x32xbf16>, vector<16x32xf32> -> vector<16x32xf32>
    %c0_3 = arith.constant 0 : index
    %c0_4 = arith.constant 0 : index
    %3 = vector.load %arg3[%c0_3, %c0_4] : memref<1x32xf32, #tpu.memory_space<vmem>>, vector<1x32xf32>
    %4 = vector.broadcast %3 : vector<1x32xf32> to vector<16x32xf32>
    %5 = arith.addf %2, %4 : vector<16x32xf32>
    %cst_5 = arith.constant 0.999994993 : f32
    %6 = vector.broadcast %cst_5 : f32 to vector<16x32xf32>
    %7 = arith.mulf %5, %6 : vector<16x32xf32>
    %cst_6 = arith.constant 0.000000e+00 : f32
    %8 = vector.broadcast %cst_6 : f32 to vector<16x32xf32>
    %9 = arith.maximumf %7, %8 : vector<16x32xf32>
    %10 = arith.truncf %9 : vector<16x32xf32> to vector<16x32xbf16>
    %c0_7 = arith.constant 0 : index
    %c0_8 = arith.constant 0 : index
    %11 = vector.load %arg4[%c0_7, %c0_8] : memref<32x32xbf16, #tpu.memory_space<vmem>>, vector<32x32xbf16>
    %cst_9 = arith.constant dense<0.000000e+00> : vector<16x32xf32>
    %12 = tpu.matmul %10, %11, %cst_9 {dimension_numbers = #tpu.dot_dimension_numbers<[1], [0], [0], [1], [0, 0, 1, 1], [], []>} : vector<16x32xbf16>, vector<32x32xbf16>, vector<16x32xf32> -> vector<16x32xf32>
    %c0_10 = arith.constant 0 : index
    %c0_11 = arith.constant 0 : index
    %13 = vector.load %arg5[%c0_10, %c0_11] : memref<1x32xf32, #tpu.memory_space<vmem>>, vector<1x32xf32>
    %14 = vector.broadcast %13 : vector<1x32xf32> to vector<16x32xf32>
    %15 = arith.addf %12, %14 : vector<16x32xf32>
    %cst_12 = arith.constant 0.999994993 : f32
    %16 = vector.broadcast %cst_12 : f32 to vector<16x32xf32>
    %17 = arith.mulf %15, %16 : vector<16x32xf32>
    %cst_13 = arith.constant 0.000000e+00 : f32
    %18 = vector.broadcast %cst_13 : f32 to vector<16x32xf32>
    %19 = arith.maximumf %17, %18 : vector<16x32xf32>
    %c0_14 = arith.constant 0 : index
    %c0_15 = arith.constant 0 : index
    %20 = vector.load %arg6[%c0_14, %c0_15] : memref<16x32xf32, #tpu.memory_space<vmem>>, vector<16x32xf32>
    tpu.vector_store %arg6[%c0_14, %c0_15], %19 {strides = array<i32>} : memref<16x32xf32, #tpu.memory_space<vmem>>, vector<16x32xf32>,
    return
  }
  func.func @transform_0(%arg0: i32) -> (i32, i32) {
    %c0_i32 = arith.constant 0 : i32
    %c0_i32_0 = arith.constant 0 : i32
    return %arg0, %c0_i32 : i32, i32
  }
  func.func @transform_1(%arg0: i32) -> (i32, i32) {
    %c0_i32 = arith.constant 0 : i32
    %c0_i32_0 = arith.constant 0 : i32
    %c0_i32_1 = arith.constant 0 : i32
    return %c0_i32, %c0_i32_0 : i32, i32
  }
  func.func @transform_2(%arg0: i32) -> (i32, i32) {
    %c0_i32 = arith.constant 0 : i32
    %c0_i32_0 = arith.constant 0 : i32
    %c0_i32_1 = arith.constant 0 : i32
    return %c0_i32, %c0_i32_0 : i32, i32
  }
  func.func @transform_3(%arg0: i32) -> (i32, i32) {
    %c0_i32 = arith.constant 0 : i32
    %c0_i32_0 = arith.constant 0 : i32
    %c0_i32_1 = arith.constant 0 : i32
    return %c0_i32, %c0_i32_0 : i32, i32
  }
  func.func @transform_4(%arg0: i32) -> (i32, i32) {
    %c0_i32 = arith.constant 0 : i32
    %c0_i32_0 = arith.constant 0 : i32
    %c0_i32_1 = arith.constant 0 : i32
    return %c0_i32, %c0_i32_0 : i32, i32
  }
  func.func @transform_5(%arg0: i32) -> (i32, i32) {
    %c0_i32 = arith.constant 0 : i32
    %c0_i32_0 = arith.constant 0 : i32
    return %arg0, %c0_i32 : i32, i32
  }
}

module attributes {stable_mosaic.version = 11 : i64} {
  func.func @_dagnn_fused_kernel(%arg0: i32, %arg1: memref<128x128xbf16, #tpu.memory_space<vmem>>, %arg2: memref<128x32xf32, #tpu.memory_space<vmem>>, %arg3: memref<1x32xf32, #tpu.memory_space<vmem>>, %arg4: memref<1x1xf32, #tpu.memory_space<vmem>>, %arg5: memref<128x32xf32, #tpu.memory_space<vmem>>) attributes {dimension_semantics = [#tpu.dimension_semantics<arbitrary>], iteration_bounds = array<i64: 1>, scalar_prefetch = 0 : i64, scratch_operands = 0 : i64, tpu.core_type = #tpu.core_type<tc>, window_params = [{pipeline_mode = #tpu.pipeline_mode<synchronous>, transform_indices = @transform_0, window_bounds = array<i64: 128, 128>}, {pipeline_mode = #tpu.pipeline_mode<synchronous>, transform_indices = @transform_1, window_bounds = array<i64: 128, 32>}, {pipeline_mode = #tpu.pipeline_mode<synchronous>, transform_indices = @transform_2, window_bounds = array<i64: 1, 32>}, {pipeline_mode = #tpu.pipeline_mode<synchronous>, transform_indices = @transform_3, window_bounds = array<i64: 1, 1>}, {pipeline_mode = #tpu.pipeline_mode<synchronous>, transform_indices = @transform_4, window_bounds = array<i64: 128, 32>}]} {
    %c0 = arith.constant 0 : index
    %c0_0 = arith.constant 0 : index
    %0 = vector.load %arg3[%c0, %c0_0] : memref<1x32xf32, #tpu.memory_space<vmem>>, vector<1x32xf32>
    %c0_1 = arith.constant 0 : index
    %c0_2 = arith.constant 0 : index
    %1 = vector.load %arg4[%c0_1, %c0_2] : memref<1x1xf32, #tpu.memory_space<vmem>>, vector<1x1xf32>
    %c0_3 = arith.constant 0 : index
    %c0_4 = arith.constant 0 : index
    %2 = vector.load %arg1[%c0_3, %c0_4] : memref<128x128xbf16, #tpu.memory_space<vmem>>, vector<128x128xbf16>
    %c0_5 = arith.constant 0 : index
    %c0_6 = arith.constant 0 : index
    %3 = vector.load %arg2[%c0_5, %c0_6] : memref<128x32xf32, #tpu.memory_space<vmem>>, vector<128x32xf32>
    %4 = vector.broadcast %0 : vector<1x32xf32> to vector<128x32xf32>
    %5 = arith.mulf %3, %4 : vector<128x32xf32>
    %cst = arith.constant dense<0.000000e+00> : vector<128xf32>
    %6 = vector.multi_reduction <add>, %5, %cst [1] : vector<128x32xf32> to vector<128xf32>
    %7 = vector.shape_cast %6 : vector<128xf32> to vector<128x1xf32>
    %8 = vector.broadcast %1 : vector<1x1xf32> to vector<128x1xf32>
    %9 = arith.addf %7, %8 : vector<128x1xf32>
    %10 = arith.negf %9 : vector<128x1xf32>
    %11 = math.exp %10 : vector<128x1xf32>
    %cst_7 = arith.constant 1.000000e+00 : f32
    %12 = vector.broadcast %cst_7 : f32 to vector<128x1xf32>
    %13 = arith.addf %12, %11 : vector<128x1xf32>
    %14 = arith.divf %12, %13 : vector<128x1xf32>
    %15 = vector.broadcast %14 : vector<128x1xf32> to vector<128x32xf32>
    %16 = arith.mulf %15, %3 : vector<128x32xf32>
    %17 = arith.truncf %3 : vector<128x32xf32> to vector<128x32xbf16>
    %cst_8 = arith.constant dense<0.000000e+00> : vector<128x32xf32>
    %18 = tpu.matmul %2, %17, %cst_8 {dimension_numbers = #tpu.dot_dimension_numbers<[1], [0], [0], [1], [0, 0, 1, 1], [], []>} : vector<128x128xbf16>, vector<128x32xbf16>, vector<128x32xf32> -> vector<128x32xf32>
    %19 = vector.broadcast %0 : vector<1x32xf32> to vector<128x32xf32>
    %20 = arith.mulf %18, %19 : vector<128x32xf32>
    %cst_9 = arith.constant dense<0.000000e+00> : vector<128xf32>
    %21 = vector.multi_reduction <add>, %20, %cst_9 [1] : vector<128x32xf32> to vector<128xf32>
    %22 = vector.shape_cast %21 : vector<128xf32> to vector<128x1xf32>
    %23 = vector.broadcast %1 : vector<1x1xf32> to vector<128x1xf32>
    %24 = arith.addf %22, %23 : vector<128x1xf32>
    %25 = arith.negf %24 : vector<128x1xf32>
    %26 = math.exp %25 : vector<128x1xf32>
    %cst_10 = arith.constant 1.000000e+00 : f32
    %27 = vector.broadcast %cst_10 : f32 to vector<128x1xf32>
    %28 = arith.addf %27, %26 : vector<128x1xf32>
    %29 = arith.divf %27, %28 : vector<128x1xf32>
    %30 = vector.broadcast %29 : vector<128x1xf32> to vector<128x32xf32>
    %31 = arith.mulf %30, %18 : vector<128x32xf32>
    %32 = arith.addf %16, %31 : vector<128x32xf32>
    %33 = arith.truncf %18 : vector<128x32xf32> to vector<128x32xbf16>
    %cst_11 = arith.constant dense<0.000000e+00> : vector<128x32xf32>
    %34 = tpu.matmul %2, %33, %cst_11 {dimension_numbers = #tpu.dot_dimension_numbers<[1], [0], [0], [1], [0, 0, 1, 1], [], []>} : vector<128x128xbf16>, vector<128x32xbf16>, vector<128x32xf32> -> vector<128x32xf32>
    %35 = vector.broadcast %0 : vector<1x32xf32> to vector<128x32xf32>
    %36 = arith.mulf %34, %35 : vector<128x32xf32>
    %cst_12 = arith.constant dense<0.000000e+00> : vector<128xf32>
    %37 = vector.multi_reduction <add>, %36, %cst_12 [1] : vector<128x32xf32> to vector<128xf32>
    %38 = vector.shape_cast %37 : vector<128xf32> to vector<128x1xf32>
    %39 = vector.broadcast %1 : vector<1x1xf32> to vector<128x1xf32>
    %40 = arith.addf %38, %39 : vector<128x1xf32>
    %41 = arith.negf %40 : vector<128x1xf32>
    %42 = math.exp %41 : vector<128x1xf32>
    %cst_13 = arith.constant 1.000000e+00 : f32
    %43 = vector.broadcast %cst_13 : f32 to vector<128x1xf32>
    %44 = arith.addf %43, %42 : vector<128x1xf32>
    %45 = arith.divf %43, %44 : vector<128x1xf32>
    %46 = vector.broadcast %45 : vector<128x1xf32> to vector<128x32xf32>
    %47 = arith.mulf %46, %34 : vector<128x32xf32>
    %48 = arith.addf %32, %47 : vector<128x32xf32>
    %49 = arith.truncf %34 : vector<128x32xf32> to vector<128x32xbf16>
    %cst_14 = arith.constant dense<0.000000e+00> : vector<128x32xf32>
    %50 = tpu.matmul %2, %49, %cst_14 {dimension_numbers = #tpu.dot_dimension_numbers<[1], [0], [0], [1], [0, 0, 1, 1], [], []>} : vector<128x128xbf16>, vector<128x32xbf16>, vector<128x32xf32> -> vector<128x32xf32>
    %51 = vector.broadcast %0 : vector<1x32xf32> to vector<128x32xf32>
    %52 = arith.mulf %50, %51 : vector<128x32xf32>
    %cst_15 = arith.constant dense<0.000000e+00> : vector<128xf32>
    %53 = vector.multi_reduction <add>, %52, %cst_15 [1] : vector<128x32xf32> to vector<128xf32>
    %54 = vector.shape_cast %53 : vector<128xf32> to vector<128x1xf32>
    %55 = vector.broadcast %1 : vector<1x1xf32> to vector<128x1xf32>
    %56 = arith.addf %54, %55 : vector<128x1xf32>
    %57 = arith.negf %56 : vector<128x1xf32>
    %58 = math.exp %57 : vector<128x1xf32>
    %cst_16 = arith.constant 1.000000e+00 : f32
    %59 = vector.broadcast %cst_16 : f32 to vector<128x1xf32>
    %60 = arith.addf %59, %58 : vector<128x1xf32>
    %61 = arith.divf %59, %60 : vector<128x1xf32>
    %62 = vector.broadcast %61 : vector<128x1xf32> to vector<128x32xf32>
    %63 = arith.mulf %62, %50 : vector<128x32xf32>
    %64 = arith.addf %48, %63 : vector<128x32xf32>
    %65 = arith.truncf %50 : vector<128x32xf32> to vector<128x32xbf16>
    %cst_17 = arith.constant dense<0.000000e+00> : vector<128x32xf32>
    %66 = tpu.matmul %2, %65, %cst_17 {dimension_numbers = #tpu.dot_dimension_numbers<[1], [0], [0], [1], [0, 0, 1, 1], [], []>} : vector<128x128xbf16>, vector<128x32xbf16>, vector<128x32xf32> -> vector<128x32xf32>
    %67 = vector.broadcast %0 : vector<1x32xf32> to vector<128x32xf32>
    %68 = arith.mulf %66, %67 : vector<128x32xf32>
    %cst_18 = arith.constant dense<0.000000e+00> : vector<128xf32>
    %69 = vector.multi_reduction <add>, %68, %cst_18 [1] : vector<128x32xf32> to vector<128xf32>
    %70 = vector.shape_cast %69 : vector<128xf32> to vector<128x1xf32>
    %71 = vector.broadcast %1 : vector<1x1xf32> to vector<128x1xf32>
    %72 = arith.addf %70, %71 : vector<128x1xf32>
    %73 = arith.negf %72 : vector<128x1xf32>
    %74 = math.exp %73 : vector<128x1xf32>
    %cst_19 = arith.constant 1.000000e+00 : f32
    %75 = vector.broadcast %cst_19 : f32 to vector<128x1xf32>
    %76 = arith.addf %75, %74 : vector<128x1xf32>
    %77 = arith.divf %75, %76 : vector<128x1xf32>
    %78 = vector.broadcast %77 : vector<128x1xf32> to vector<128x32xf32>
    %79 = arith.mulf %78, %66 : vector<128x32xf32>
    %80 = arith.addf %64, %79 : vector<128x32xf32>
    %81 = arith.truncf %66 : vector<128x32xf32> to vector<128x32xbf16>
    %cst_20 = arith.constant dense<0.000000e+00> : vector<128x32xf32>
    %82 = tpu.matmul %2, %81, %cst_20 {dimension_numbers = #tpu.dot_dimension_numbers<[1], [0], [0], [1], [0, 0, 1, 1], [], []>} : vector<128x128xbf16>, vector<128x32xbf16>, vector<128x32xf32> -> vector<128x32xf32>
    %83 = vector.broadcast %0 : vector<1x32xf32> to vector<128x32xf32>
    %84 = arith.mulf %82, %83 : vector<128x32xf32>
    %cst_21 = arith.constant dense<0.000000e+00> : vector<128xf32>
    %85 = vector.multi_reduction <add>, %84, %cst_21 [1] : vector<128x32xf32> to vector<128xf32>
    %86 = vector.shape_cast %85 : vector<128xf32> to vector<128x1xf32>
    %87 = vector.broadcast %1 : vector<1x1xf32> to vector<128x1xf32>
    %88 = arith.addf %86, %87 : vector<128x1xf32>
    %89 = arith.negf %88 : vector<128x1xf32>
    %90 = math.exp %89 : vector<128x1xf32>
    %cst_22 = arith.constant 1.000000e+00 : f32
    %91 = vector.broadcast %cst_22 : f32 to vector<128x1xf32>
    %92 = arith.addf %91, %90 : vector<128x1xf32>
    %93 = arith.divf %91, %92 : vector<128x1xf32>
    %94 = vector.broadcast %93 : vector<128x1xf32> to vector<128x32xf32>
    %95 = arith.mulf %94, %82 : vector<128x32xf32>
    %96 = arith.addf %80, %95 : vector<128x32xf32>
    %c0_23 = arith.constant 0 : index
    %c0_24 = arith.constant 0 : index
    %97 = vector.load %arg5[%c0_23, %c0_24] : memref<128x32xf32, #tpu.memory_space<vmem>>, vector<128x32xf32>
    tpu.vector_store %arg5[%c0_23, %c0_24], %96 {strides = array<i32>} : memref<128x32xf32, #tpu.memory_space<vmem>>, vector<128x32xf32>,
    return
  }
  func.func @transform_0(%arg0: i32) -> (i32, i32) {
    %c0_i32 = arith.constant 0 : i32
    %c0_i32_0 = arith.constant 0 : i32
    %c0_i32_1 = arith.constant 0 : i32
    return %c0_i32, %c0_i32_0 : i32, i32
  }
  func.func @transform_1(%arg0: i32) -> (i32, i32) {
    %c0_i32 = arith.constant 0 : i32
    %c0_i32_0 = arith.constant 0 : i32
    %c0_i32_1 = arith.constant 0 : i32
    return %c0_i32, %c0_i32_0 : i32, i32
  }
  func.func @transform_2(%arg0: i32) -> (i32, i32) {
    %c0_i32 = arith.constant 0 : i32
    %c0_i32_0 = arith.constant 0 : i32
    %c0_i32_1 = arith.constant 0 : i32
    return %c0_i32, %c0_i32_0 : i32, i32
  }
  func.func @transform_3(%arg0: i32) -> (i32, i32) {
    %c0_i32 = arith.constant 0 : i32
    %c0_i32_0 = arith.constant 0 : i32
    %c0_i32_1 = arith.constant 0 : i32
    return %c0_i32, %c0_i32_0 : i32, i32
  }
  func.func @transform_4(%arg0: i32) -> (i32, i32) {
    %c0_i32 = arith.constant 0 : i32
    %c0_i32_0 = arith.constant 0 : i32
    %c0_i32_1 = arith.constant 0 : i32
    return %c0_i32, %c0_i32_0 : i32, i32
  }
}

module attributes {stable_mosaic.version = 11 : i64} {
  func.func @_row_score_kernel(%arg0: i32, %arg1: memref<128x32xf32, #tpu.memory_space<vmem>>, %arg2: memref<1x32xf32, #tpu.memory_space<vmem>>, %arg3: memref<128x1xf32, #tpu.memory_space<vmem>>) attributes {dimension_semantics = [#tpu.dimension_semantics<parallel>], iteration_bounds = array<i64: 1>, scalar_prefetch = 0 : i64, scratch_operands = 0 : i64, tpu.core_type = #tpu.core_type<tc>, window_params = [{transform_indices = @transform_0, window_bounds = array<i64: 128, 32>}, {pipeline_mode = #tpu.pipeline_mode<synchronous>, transform_indices = @transform_1, window_bounds = array<i64: 1, 32>}, {transform_indices = @transform_2, window_bounds = array<i64: 128, 1>}]} {
    %c0 = arith.constant 0 : index
    %c0_0 = arith.constant 0 : index
    %0 = vector.load %arg1[%c0, %c0_0] : memref<128x32xf32, #tpu.memory_space<vmem>>, vector<128x32xf32>
    %c0_1 = arith.constant 0 : index
    %c0_2 = arith.constant 0 : index
    %1 = vector.load %arg2[%c0_1, %c0_2] : memref<1x32xf32, #tpu.memory_space<vmem>>, vector<1x32xf32>
    %2 = vector.broadcast %1 : vector<1x32xf32> to vector<128x32xf32>
    %3 = arith.mulf %0, %2 : vector<128x32xf32>
    %cst = arith.constant dense<0.000000e+00> : vector<128xf32>
    %4 = vector.multi_reduction <add>, %3, %cst [1] : vector<128x32xf32> to vector<128xf32>
    %5 = vector.shape_cast %4 : vector<128xf32> to vector<128x1xf32>
    %c0_3 = arith.constant 0 : index
    %c0_4 = arith.constant 0 : index
    %6 = vector.load %arg3[%c0_3, %c0_4] : memref<128x1xf32, #tpu.memory_space<vmem>>, vector<128x1xf32>
    tpu.vector_store %arg3[%c0_3, %c0_4], %5 {strides = array<i32>} : memref<128x1xf32, #tpu.memory_space<vmem>>, vector<128x1xf32>,
    return
  }
  func.func @transform_0(%arg0: i32) -> (i32, i32) {
    %c0_i32 = arith.constant 0 : i32
    %c0_i32_0 = arith.constant 0 : i32
    return %arg0, %c0_i32 : i32, i32
  }
  func.func @transform_1(%arg0: i32) -> (i32, i32) {
    %c0_i32 = arith.constant 0 : i32
    %c0_i32_0 = arith.constant 0 : i32
    %c0_i32_1 = arith.constant 0 : i32
    return %c0_i32, %c0_i32_0 : i32, i32
  }
  func.func @transform_2(%arg0: i32) -> (i32, i32) {
    %c0_i32 = arith.constant 0 : i32
    %c0_i32_0 = arith.constant 0 : i32
    return %arg0, %c0_i32 : i32, i32
  }
}

module attributes {stable_mosaic.version = 11 : i64} {
  func.func @_distmax_kernel(%arg0: i32, %arg1: i32, %arg2: memref<128x32xf32, #tpu.memory_space<vmem>>, %arg3: memref<128x32xf32, #tpu.memory_space<vmem>>, %arg4: memref<128x1xf32, #tpu.memory_space<vmem>>, %arg5: memref<1x128xf32, #tpu.memory_space<vmem>>, %arg6: memref<1x32xf32, #tpu.memory_space<vmem>>, %arg7: memref<1x1xf32, #tpu.memory_space<vmem>>, %arg8: memref<128x1xi32, #tpu.memory_space<vmem>>, %arg9: memref<1x128xi32, #tpu.memory_space<vmem>>, %arg10: memref<128x128xf32, #tpu.memory_space<vmem>>, %arg11: memref<128x128xf32, #tpu.memory_space<vmem>>) attributes {dimension_semantics = [#tpu.dimension_semantics<parallel>, #tpu.dimension_semantics<parallel>], iteration_bounds = array<i64: 1, 1>, scalar_prefetch = 0 : i64, scratch_operands = 0 : i64, tpu.core_type = #tpu.core_type<tc>, window_params = [{transform_indices = @transform_0, window_bounds = array<i64: 128, 32>}, {transform_indices = @transform_1, window_bounds = array<i64: 128, 32>}, {transform_indices = @transform_2, window_bounds = array<i64: 128, 1>}, {transform_indices = @transform_3, window_bounds = array<i64: 1, 128>}, {pipeline_mode = #tpu.pipeline_mode<synchronous>, transform_indices = @transform_4, window_bounds = array<i64: 1, 32>}, {pipeline_mode = #tpu.pipeline_mode<synchronous>, transform_indices = @transform_5, window_bounds = array<i64: 1, 1>}, {transform_indices = @transform_6, window_bounds = array<i64: 128, 1>}, {transform_indices = @transform_7, window_bounds = array<i64: 1, 128>}, {transform_indices = @transform_8, window_bounds = array<i64: 128, 128>}, {transform_indices = @transform_9, window_bounds = array<i64: 128, 128>}]} {
    %c0 = arith.constant 0 : index
    %c0_0 = arith.constant 0 : index
    %0 = vector.load %arg2[%c0, %c0_0] : memref<128x32xf32, #tpu.memory_space<vmem>>, vector<128x32xf32>
    %c0_1 = arith.constant 0 : index
    %c0_2 = arith.constant 0 : index
    %1 = vector.load %arg6[%c0_1, %c0_2] : memref<1x32xf32, #tpu.memory_space<vmem>>, vector<1x32xf32>
    %c0_3 = arith.constant 0 : index
    %c0_4 = arith.constant 0 : index
    %2 = vector.load %arg4[%c0_3, %c0_4] : memref<128x1xf32, #tpu.memory_space<vmem>>, vector<128x1xf32>
    %c0_5 = arith.constant 0 : index
    %c0_6 = arith.constant 0 : index
    %3 = vector.load %arg5[%c0_5, %c0_6] : memref<1x128xf32, #tpu.memory_space<vmem>>, vector<1x128xf32>
    %4 = tpu.iota {dimensions = array<i32: 1>} : vector<1x128xi32>
    %cst = arith.constant 0.000000e+00 : f32
    %5 = vector.broadcast %cst : f32 to vector<128x128xf32>
    %c0_i32 = arith.constant 0 : i32
    %c128_i32 = arith.constant 128 : i32
    %6 = arith.addi %c0_i32, %c128_i32 : i32
    %c1_i32 = arith.constant 1 : i32
    %7 = scf.for %arg12 = %c0_i32 to %6 step %c1_i32 iter_args(%arg13 = %5) -> (vector<128x128xf32>)  : i32 {
      %45 = arith.index_cast %arg12 : i32 to index
      %c0_24 = arith.constant 0 : index
      %46 = vector.load %arg3[%45, %c0_24] : memref<128x32xf32, #tpu.memory_space<vmem>>, vector<1x32xf32>
      %47 = vector.broadcast %46 : vector<1x32xf32> to vector<128x32xf32>
      %48 = arith.subf %0, %47 : vector<128x32xf32>
      %49 = math.absf %48 : vector<128x32xf32>
      %50 = vector.broadcast %1 : vector<1x32xf32> to vector<128x32xf32>
      %51 = arith.mulf %50, %49 : vector<128x32xf32>
      %cst_25 = arith.constant dense<0.000000e+00> : vector<128xf32>
      %52 = vector.multi_reduction <add>, %51, %cst_25 [1] : vector<128x32xf32> to vector<128xf32>
      %53 = vector.shape_cast %52 : vector<128xf32> to vector<128x1xf32>
      %54 = vector.broadcast %arg12 : i32 to vector<1x128xi32>
      %55 = arith.cmpi eq, %4, %54 : vector<1x128xi32>
      %56 = vector.shape_cast %55 : vector<1x128xi1> to vector<1x128xi1>
      %57 = vector.broadcast %56 : vector<1x128xi1> to vector<128x128xi1>
      %58 = vector.shape_cast %53 : vector<128x1xf32> to vector<128x1xf32>
      %59 = vector.broadcast %58 : vector<128x1xf32> to vector<128x128xf32>
      %60 = arith.select %57, %59, %arg13 : vector<128x128xi1>, vector<128x128xf32>
      scf.yield %60 : vector<128x128xf32>
    }
    %c128_i32_7 = arith.constant 128 : i32
    %8 = vector.broadcast %2 : vector<128x1xf32> to vector<128x128xf32>
    %9 = vector.broadcast %3 : vector<1x128xf32> to vector<128x128xf32>
    %10 = arith.addf %8, %9 : vector<128x128xf32>
    %cst_8 = arith.constant 5.000000e-01 : f32
    %11 = vector.broadcast %cst_8 : f32 to vector<128x128xf32>
    %12 = arith.mulf %11, %10 : vector<128x128xf32>
    %cst_9 = arith.constant 5.000000e-01 : f32
    %13 = vector.broadcast %cst_9 : f32 to vector<128x128xf32>
    %14 = arith.mulf %13, %7 : vector<128x128xf32>
    %15 = arith.addf %12, %14 : vector<128x128xf32>
    %c0_10 = arith.constant 0 : index
    %c0_11 = arith.constant 0 : index
    %16 = vector.load %arg7[%c0_10, %c0_11] : memref<1x1xf32, #tpu.memory_space<vmem>>, vector<1x1xf32>
    %17 = vector.broadcast %16 : vector<1x1xf32> to vector<128x128xf32>
    %18 = arith.addf %15, %17 : vector<128x128xf32>
    %c0_12 = arith.constant 0 : index
    %c0_13 = arith.constant 0 : index
    %19 = vector.load %arg8[%c0_12, %c0_13] : memref<128x1xi32, #tpu.memory_space<vmem>>, vector<128x1xi32>
    %c0_14 = arith.constant 0 : index
    %c0_15 = arith.constant 0 : index
    %20 = vector.load %arg9[%c0_14, %c0_15] : memref<1x128xi32, #tpu.memory_space<vmem>>, vector<1x128xi32>
    %21 = tpu.iota {dimensions = array<i32: 0>} : vector<128x128xi32>
    %c128_i32_16 = arith.constant 128 : i32
    %22 = arith.muli %arg0, %c128_i32_16 : i32
    %23 = vector.broadcast %22 : i32 to vector<128x128xi32>
    %24 = arith.addi %21, %23 : vector<128x128xi32>
    %25 = tpu.iota {dimensions = array<i32: 1>} : vector<128x128xi32>
    %c128_i32_17 = arith.constant 128 : i32
    %26 = arith.muli %arg1, %c128_i32_17 : i32
    %27 = vector.broadcast %26 : i32 to vector<128x128xi32>
    %28 = arith.addi %25, %27 : vector<128x128xi32>
    %29 = vector.broadcast %19 : vector<128x1xi32> to vector<128x128xi32>
    %30 = vector.broadcast %20 : vector<1x128xi32> to vector<128x128xi32>
    %31 = arith.cmpi eq, %29, %30 : vector<128x128xi32>
    %c0_i32_18 = arith.constant 0 : i32
    %32 = vector.broadcast %c0_i32_18 : i32 to vector<128x1xi32>
    %33 = arith.cmpi sge, %19, %32 : vector<128x1xi32>
    %34 = vector.broadcast %33 : vector<128x1xi1> to vector<128x128xi1>
    %35 = arith.andi %31, %34 : vector<128x128xi1>
    %36 = arith.cmpi ne, %24, %28 : vector<128x128xi32>
    %37 = arith.andi %35, %36 : vector<128x128xi1>
    %38 = arith.extui %37 : vector<128x128xi1> to vector<128x128xi32>
    %39 = arith.sitofp %38 : vector<128x128xi32> to vector<128x128xf32>
    %c0_19 = arith.constant 0 : index
    %c0_20 = arith.constant 0 : index
    %40 = vector.load %arg11[%c0_19, %c0_20] : memref<128x128xf32, #tpu.memory_space<vmem>>, vector<128x128xf32>
    tpu.vector_store %arg11[%c0_19, %c0_20], %39 {strides = array<i32>} : memref<128x128xf32, #tpu.memory_space<vmem>>, vector<128x128xf32>,
    %41 = arith.mulf %18, %39 : vector<128x128xf32>
    %cst_21 = arith.constant 0.000000e+00 : f32
    %42 = vector.broadcast %cst_21 : f32 to vector<128x128xf32>
    %43 = arith.maximumf %41, %42 : vector<128x128xf32>
    %c0_22 = arith.constant 0 : index
    %c0_23 = arith.constant 0 : index
    %44 = vector.load %arg10[%c0_22, %c0_23] : memref<128x128xf32, #tpu.memory_space<vmem>>, vector<128x128xf32>
    tpu.vector_store %arg10[%c0_22, %c0_23], %43 {strides = array<i32>} : memref<128x128xf32, #tpu.memory_space<vmem>>, vector<128x128xf32>,
    return
  }
  func.func @transform_0(%arg0: i32, %arg1: i32) -> (i32, i32) {
    %c0_i32 = arith.constant 0 : i32
    %c0_i32_0 = arith.constant 0 : i32
    return %arg0, %c0_i32 : i32, i32
  }
  func.func @transform_1(%arg0: i32, %arg1: i32) -> (i32, i32) {
    %c0_i32 = arith.constant 0 : i32
    %c0_i32_0 = arith.constant 0 : i32
    return %arg1, %c0_i32 : i32, i32
  }
  func.func @transform_2(%arg0: i32, %arg1: i32) -> (i32, i32) {
    %c0_i32 = arith.constant 0 : i32
    %c0_i32_0 = arith.constant 0 : i32
    return %arg0, %c0_i32 : i32, i32
  }
  func.func @transform_3(%arg0: i32, %arg1: i32) -> (i32, i32) {
    %c0_i32 = arith.constant 0 : i32
    %c0_i32_0 = arith.constant 0 : i32
    return %c0_i32, %arg1 : i32, i32
  }
  func.func @transform_4(%arg0: i32, %arg1: i32) -> (i32, i32) {
    %c0_i32 = arith.constant 0 : i32
    %c0_i32_0 = arith.constant 0 : i32
    %c0_i32_1 = arith.constant 0 : i32
    return %c0_i32, %c0_i32_0 : i32, i32
  }
  func.func @transform_5(%arg0: i32, %arg1: i32) -> (i32, i32) {
    %c0_i32 = arith.constant 0 : i32
    %c0_i32_0 = arith.constant 0 : i32
    %c0_i32_1 = arith.constant 0 : i32
    return %c0_i32, %c0_i32_0 : i32, i32
  }
  func.func @transform_6(%arg0: i32, %arg1: i32) -> (i32, i32) {
    %c0_i32 = arith.constant 0 : i32
    %c0_i32_0 = arith.constant 0 : i32
    return %arg0, %c0_i32 : i32, i32
  }
  func.func @transform_7(%arg0: i32, %arg1: i32) -> (i32, i32) {
    %c0_i32 = arith.constant 0 : i32
    %c0_i32_0 = arith.constant 0 : i32
    return %c0_i32, %arg1 : i32, i32
  }
  func.func @transform_8(%arg0: i32, %arg1: i32) -> (i32, i32) {
    %c0_i32 = arith.constant 0 : i32
    return %arg0, %arg1 : i32, i32
  }
  func.func @transform_9(%arg0: i32, %arg1: i32) -> (i32, i32) {
    %c0_i32 = arith.constant 0 : i32
    return %arg0, %arg1 : i32, i32
  }
}

</mosaic_0001>

<bundles_post_ra>
// kernel: deepergcn_dagnn_dist_forward.10
= control target key start
LH: loop header
LB: loop body
LE: loop exit
PB: predicated region body
PF: predicated region fallthrough
CT: control target
= control target key end

     0   :  { %v216_v0 = vmov 0.0   ;;  %vm217_vm0 = vmmov 0   ;;  %vm51_vm1 = vcmask 261120   ;;  %s279_s1 = inlined_call_operand.vmem [shape: bf16[32,32], index: 1, kind: input, shape index: {}]   ;;  %s280_s0 = inlined_call_operand.vmem [shape: bf16[16,32], index: 0, kind: input, shape index: {}]   ;;  %s281_s3 = inlined_call_operand.vmem [shape: bf16[32,32], index: 3, kind: input, shape index: {}]   ;;  %s282_s2 = inlined_call_operand.vmem [shape: f32[1,32], index: 2, kind: input, shape index: {}]   ;;  %s283_s4 = inlined_call_operand.vmem [shape: f32[1,32], index: 4, kind: input, shape index: {}]   ;;  %s284_s5 = inlined_call_operand.vmem [shape: f32[16,32], index: 5, kind: output, shape index: {}]  }
   0x1   :  { %193 = vmatprep.subr.bf16.mxu0 %v216_v0  ;;  %v211_v1 = vld [vmem:[%s279_s1] sm:$0xff]   ;;  %197 = vmatprep.mubr.msk.bf16.mxu0 %vm217_vm0, %v216_v0  ;;  %v212_v2 = vld [vmem:[%s279_s1 + $0x8] sm:$0xff]  }
   0x2   :  { %201 = vmatprep.subr.bf16.mxu1 %v216_v0  ;;  %205 = vmatprep.mubr.msk.bf16.mxu1 %vm217_vm0, %v216_v0  ;;  %v213_v3 = vld [vmem:[%s280_s0] sm:$0xff]   ;;  %v215_v5 = vld [vmem:[%s281_s3 + $0x8] sm:$0xff]  }
   0x3   :  { %194 = vmatpush3.bf16.msra.mxu0 %v211_v1  ;;  %v214_v4 = vld [vmem:[%s281_s3] sm:$0xff]  }
   0x4   :  { %195 = vmatprep.subr.bf16.mxu0 %v216_v0  ;;  %202 = vmatpush3.bf16.msra.mxu1 %v214_v4  ;;  %v178_v6 = vld [vmem:[%s282_s2] ss:$0 sm:$0xff] }
   0x5   :  { %203 = vmatprep.subr.bf16.mxu1 %v216_v0  ;;  %v183_v18 = vld [vmem:[%s283_s4] ss:$0 sm:$0xff] }
   0x7   :  { %196 = vmatpush3.bf16.msra.mxu0 %v212_v2 }
   0x8   :  { %204 = vmatpush3.bf16.msra.mxu1 %v215_v5 }
   0xa   :  { %198 = vmatmul.mubr.msk.bf16.vlgmr.msra.gmra.mrb[0].mxu0 %vm51_vm1, %v213_v3 }
  0xdd   :  { %v89_v7 = vpop.f32.mrb[0].mxu0 }
  0xde   :  { %v90_v8 = vadd.f32 %v178_v6, %v89_v7  ;;  %v199_v9 = vpop.f32.mrb[1].mxu0 }
  0xdf   :  { %v92_v10 = vpop.f32.mrb[2].mxu0 }
  0xe0   :  { %v96_v11 = vmul.f32 0.999995, %v90_v8  ;;  %v93_v12 = vadd.f32 %v178_v6, %v92_v10  ;;  %v200_v13 = vpop.f32.mrb[3].mxu0 }
  0xe2   :  { %v97_v14 = vmul.f32 0.999995, %v93_v12  ;;  %v98_v15 = vmax.f32 %v96_v11, 0.0 }
  0xe4   :  { %v99_v16 = vmax.f32 %v97_v14, 0.0 }
  0xe6   :  { %v100_v17 = vpack.c.bf16 %v99_v16, %v98_v15 }
  0xe8   :  { %206 = vmatmul.mubr.msk.bf16.vlgmr.msra.gmra.mrb[0].mxu1 %vm51_vm1, %v100_v17 }
 0x1bb   :  { %v161_v19 = vpop.f32.mrb[0].mxu1 }
 0x1bc   :  { %v162_v20 = vadd.f32 %v183_v18, %v161_v19  ;;  %v207_v21 = vpop.f32.mrb[1].mxu1 }
 0x1bd   :  { %v164_v22 = vpop.f32.mrb[2].mxu1 }
 0x1be   :  { %v168_v23 = vmul.f32 0.999995, %v162_v20  ;;  %v165_v24 = vadd.f32 %v183_v18, %v164_v22  ;;  %v208_v25 = vpop.f32.mrb[3].mxu1 }
 0x1c0   :  { %v170_v26 = vmax.f32 %v168_v23, 0.0  ;;  %v169_v27 = vmul.f32 0.999995, %v165_v24 }
 0x1c2   :  { %172 = vst.msk [vmem:[%s284_s5] sm:$0xff] %vm51_vm1, %v170_v26  ;;  %v171_v28 = vmax.f32 %v169_v27, 0.0 }
 0x1c4   :  { %173 = vst.msk [vmem:[%s284_s5 + $0x8] sm:$0xff] %vm51_vm1, %v171_v28 }

// kernel: deepergcn_dagnn_dist_forward.8
= control target key start
LH: loop header
LB: loop body
LE: loop exit
PB: predicated region body
PF: predicated region fallthrough
CT: control target
= control target key end

     0   :  { %v602_v0 = vmov 0.0   ;;  %vm603_vm0 = vmmov 0   ;;  %vm69_vm1 = vcmask 261120   ;;  %vm158_vm2 = vcmask 523264   ;;  %s777_s1 = inlined_call_operand.vmem [shape: bf16[32,64], index: 1, kind: input, shape index: {}]   ;;  %s778_s3 = inlined_call_operand.vmem [shape: bf16[64,64], index: 3, kind: input, shape index: {}]   ;;  %s779_s0 = inlined_call_operand.vmem [shape: bf16[16,32], index: 0, kind: input, shape index: {}]   ;;  %s780_s5 = inlined_call_operand.vmem [shape: bf16[64,64], index: 5, kind: input, shape index: {}]   ;;  %s781_s2 = inlined_call_operand.vmem [shape: f32[1,64], index: 2, kind: input, shape index: {}]   ;;  %s782_s7 = inlined_call_operand.vmem [shape: bf16[64,64], index: 7, kind: input, shape index: {}]   ;;  %s783_s4 = inlined_call_operand.vmem [shape: f32[1,64], index: 4, kind: input, shape index: {}]   ;;  %s784_s9 = inlined_call_operand.vmem [shape: bf16[64,32], index: 9, kind: input, shape index: {}]   ;;  %s785_s6 = inlined_call_operand.vmem [shape: f32[1,64], index: 6, kind: input, shape index: {}]   ;;  %s786_s8 = inlined_call_operand.vmem [shape: f32[1,64], index: 8, kind: input, shape index: {}]   ;;  %s787_s10 = inlined_call_operand.vmem [shape: f32[1,32], index: 10, kind: input, shape index: {}]   ;;  %s788_s11 = inlined_call_operand.vmem [shape: f32[16,32], index: 11, kind: output, shape index: {}]  }
   0x1   :  { %525 = vmatprep.subr.bf16.mxu0 %v602_v0  ;;  %v583_v1 = vld [vmem:[%s777_s1] sm:$0xff]   ;;  %529 = vmatprep.mubr.msk.bf16.mxu0 %vm603_vm0, %v602_v0  ;;  %v584_v2 = vld [vmem:[%s777_s1 + $0x8] sm:$0xff]   ;;  %v588_v6 = vld [vmem:[%s778_s3 + $0x10] sm:$0xff]  }
   0x2   :  { %533 = vmatprep.subr.bf16.mxu1 %v602_v0  ;;  %541 = vmatprep.mubr.msk.bf16.mxu1 %vm603_vm0, %v602_v0  ;;  %v586_v3 = vld [vmem:[%s778_s3] sm:$0xff]   ;;  %v587_v5 = vld [vmem:[%s778_s3 + $0x8] sm:$0xff]   ;;  %v589_v7 = vld [vmem:[%s778_s3 + $0x18] sm:$0xff]  }
   0x3   :  { %526 = vmatpush3.bf16.msra.mxu0 %v583_v1  ;;  %v585_v4 = vld [vmem:[%s779_s0] sm:$0xff]   ;;  %534 = vmatpush3.bf16.msra.mxu1 %v586_v3  ;;  %v591_v21 = vld [vmem:[%s780_s5 + $0x8] sm:$0xff]   ;;  %v592_v22 = vld [vmem:[%s780_s5 + $0x10] sm:$0xff]  }
   0x4   :  { %527 = vmatprep.subr.bf16.mxu0 %v602_v0  ;;  %535 = vmatprep.subr.bf16.mxu1 %v602_v0  ;;  %v590_v8 = vld [vmem:[%s780_s5] sm:$0xff]   ;;  %v593_v23 = vld [vmem:[%s780_s5 + $0x18] sm:$0xff]   ;;  %v595_v37 = vld [vmem:[%s782_s7 + $0x8] sm:$0xff]  }
   0x5   :  { %v473_v9 = vld [vmem:[%s781_s2] ss:$0 sm:$0xff]  ;;  %v596_v38 = vld [vmem:[%s782_s7 + $0x10] sm:$0xff]   ;;  %v597_v39 = vld [vmem:[%s782_s7 + $0x18] sm:$0xff]  }
   0x6   :  { %v594_v24 = vld [vmem:[%s782_s7] sm:$0xff]   ;;  %v599_v53 = vld [vmem:[%s784_s9 + $0x8] sm:$0xff]   ;;  %v600_v54 = vld [vmem:[%s784_s9 + $0x10] sm:$0xff]  }
   0x7   :  { %528 = vmatpush3.bf16.msra.mxu0 %v584_v2  ;;  %536 = vmatpush3.bf16.msra.mxu1 %v587_v5  ;;  %v478_v25 = vld [vmem:[%s783_s4] ss:$0 sm:$0xff]  ;;  %v601_v55 = vld [vmem:[%s784_s9 + $0x18] sm:$0xff]  }
   0x8   :  { %545 = vmatprep.subr.bf16.mxu0 %v602_v0  ;;  %537 = vmatprep.subr.bf16.mxu1 %v602_v0  ;;  %v598_v40 = vld [vmem:[%s784_s9] sm:$0xff]  }
   0x9   :  { %v484_v41 = vld [vmem:[%s785_s6] ss:$0 sm:$0xff] }
   0xa   :  { %530 = vmatmul.mubr.msk.bf16.vlgmr.msra.gmra.mrb[0].mxu0 %vm69_vm1, %v585_v4  ;;  %v490_v56 = vld [vmem:[%s786_s8] ss:$0 sm:$0xff] }
   0xb   :  { %553 = vmatprep.mubr.msk.bf16.mxu0 %vm603_vm0, %v602_v0  ;;  %538 = vmatpush3.bf16.msra.mxu1 %v588_v6  ;;  %v496_v4 = vld [vmem:[%s787_s10] ss:$0 sm:$0xff] }
   0xc   :  { %539 = vmatprep.subr.bf16.mxu1 %v602_v0  ;;  %546 = vmatpush3.bf16.msra.mxu0 %v590_v8 }
   0xd   :  { %547 = vmatprep.subr.bf16.mxu0 %v602_v0 }
   0xf   :  { %540 = vmatpush3.bf16.msra.mxu1 %v589_v7 }
  0x10   :  { %557 = vmatprep.subr.bf16.mxu1 %v602_v0  ;;  %548 = vmatpush3.bf16.msra.mxu0 %v591_v21 }
  0x11   :  { %549 = vmatprep.subr.bf16.mxu0 %v602_v0 }
  0x14   :  { %550 = vmatpush3.bf16.msra.mxu0 %v592_v22 }
  0x15   :  { %551 = vmatprep.subr.bf16.mxu0 %v602_v0 }
  0x18   :  { %552 = vmatpush3.bf16.msra.mxu0 %v593_v23 }
  0x19   :  { %569 = vmatprep.subr.bf16.mxu0 %v602_v0 }
  0xdd   :  { %v107_v10 = vpop.f32.mrb[0].mxu0 }
  0xde   :  { %v108_v11 = vadd.f32 %v473_v9, %v107_v10  ;;  %v531_v12 = vpop.f32.mrb[1].mxu0 }
  0xdf   :  { %v110_v13 = vpop.f32.mrb[2].mxu0 }
  0xe0   :  { %v114_v14 = vmul.f32 0.999995, %v108_v11  ;;  %v111_v15 = vadd.f32 %v473_v9, %v110_v13  ;;  %v532_v16 = vpop.f32.mrb[3].mxu0 }
  0xe2   :  { %v115_v17 = vmul.f32 0.999995, %v111_v15  ;;  %v116_v18 = vmax.f32 %v114_v14, 0.0 }
  0xe4   :  { %v117_v19 = vmax.f32 %v115_v17, 0.0 }
  0xe6   :  { %v118_v20 = vpack.c.bf16 %v117_v19, %v116_v18 }
  0xe8   :  { %542 = vmatmul.mubr.msk.bf16.vlgmr.msra.gmra.mrb[0].mxu1 %vm158_vm2, %v118_v20 }
  0xe9   :  { %565 = vmatprep.mubr.msk.bf16.mxu1 %vm603_vm0, %v602_v0  ;;  %558 = vmatpush3.bf16.msra.mxu1 %v594_v24 }
  0xea   :  { %559 = vmatprep.subr.bf16.mxu1 %v602_v0 }
  0xed   :  { %560 = vmatpush3.bf16.msra.mxu1 %v595_v37 }
  0xee   :  { %561 = vmatprep.subr.bf16.mxu1 %v602_v0 }
  0xf1   :  { %562 = vmatpush3.bf16.msra.mxu1 %v596_v38 }
  0xf2   :  { %563 = vmatprep.subr.bf16.mxu1 %v602_v0 }
  0xf5   :  { %564 = vmatpush3.bf16.msra.mxu1 %v597_v39 }
 0x1bb   :  { %v196_v26 = vpop.f32.mrb[0].mxu1 }
 0x1bc   :  { %v197_v27 = vadd.f32 %v478_v25, %v196_v26  ;;  %v543_v28 = vpop.f32.mrb[1].mxu1 }
 0x1bd   :  { %v199_v29 = vpop.f32.mrb[2].mxu1 }
 0x1be   :  { %v203_v30 = vmul.f32 0.999995, %v197_v27  ;;  %v200_v31 = vadd.f32 %v478_v25, %v199_v29  ;;  %v544_v32 = vpop.f32.mrb[3].mxu1 }
 0x1c0   :  { %v204_v33 = vmul.f32 0.999995, %v200_v31  ;;  %v205_v34 = vmax.f32 %v203_v30, 0.0 }
 0x1c2   :  { %v206_v35 = vmax.f32 %v204_v33, 0.0 }
 0x1c4   :  { %v207_v36 = vpack.c.bf16 %v206_v35, %v205_v34 }
 0x1c6   :  { %554 = vmatmul.mubr.msk.bf16.vlgmr.msra.gmra.mrb[4].mxu0 %vm158_vm2, %v207_v36 }
 0x1c7   :  { %577 = vmatprep.mubr.msk.bf16.mxu0 %vm603_vm0, %v602_v0  ;;  %570 = vmatpush3.bf16.msra.mxu0 %v598_v40 }
 0x1c8   :  { %571 = vmatprep.subr.bf16.mxu0 %v602_v0 }
 0x1cb   :  { %572 = vmatpush3.bf16.msra.mxu0 %v599_v53 }
 0x1cc   :  { %573 = vmatprep.subr.bf16.mxu0 %v602_v0 }
 0x1cf   :  { %574 = vmatpush3.bf16.msra.mxu0 %v600_v54 }
 0x1d0   :  { %575 = vmatprep.subr.bf16.mxu0 %v602_v0 }
 0x1d3   :  { %576 = vmatpush3.bf16.msra.mxu0 %v601_v55 }
 0x299   :  { %v284_v42 = vpop.f32.mrb[4].mxu0 }
 0x29a   :  { %v285_v43 = vadd.f32 %v484_v41, %v284_v42  ;;  %v555_v44 = vpop.f32.mrb[5].mxu0 }
 0x29b   :  { %v287_v45 = vpop.f32.mrb[6].mxu0 }
 0x29c   :  { %v291_v46 = vmul.f32 0.999995, %v285_v43  ;;  %v288_v47 = vadd.f32 %v484_v41, %v287_v45  ;;  %v556_v48 = vpop.f32.mrb[7].mxu0 }
 0x29e   :  { %v292_v49 = vmul.f32 0.999995, %v288_v47  ;;  %v293_v50 = vmax.f32 %v291_v46, 0.0 }
 0x2a0   :  { %v294_v51 = vmax.f32 %v292_v49, 0.0 }
 0x2a2   :  { %v295_v52 = vpack.c.bf16 %v294_v51, %v293_v50 }
 0x2a4   :  { %566 = vmatmul.mubr.msk.bf16.vlgmr.msra.gmra.mrb[4].mxu1 %vm158_vm2, %v295_v52 }
 0x377   :  { %v372_v57 = vpop.f32.mrb[4].mxu1 }
 0x378   :  { %v373_v58 = vadd.f32 %v490_v56, %v372_v57  ;;  %v567_v59 = vpop.f32.mrb[5].mxu1 }
 0x379   :  { %v375_v60 = vpop.f32.mrb[6].mxu1 }
 0x37a   :  { %v379_v61 = vmul.f32 0.999995, %v373_v58  ;;  %v376_v62 = vadd.f32 %v490_v56, %v375_v60  ;;  %v568_v63 = vpop.f32.mrb[7].mxu1 }
 0x37c   :  { %v380_v1 = vmul.f32 0.999995, %v376_v62  ;;  %v381_v2 = vmax.f32 %v379_v61, 0.0 }
 0x37e   :  { %v382_v3 = vmax.f32 %v380_v1, 0.0 }
 0x380   :  { %v383_v0 = vpack.c.bf16 %v382_v3, %v381_v2 }
 0x382   :  { %578 = vmatmul.mubr.msk.bf16.vlgmr.msra.gmra.mrb[8].mxu0 %vm158_vm2, %v383_v0 }
 0x455   :  { %v460_v5 = vpop.f32.mrb[8].mxu0 }
 0x456   :  { %v461_v6 = vadd.f32 %v496_v4, %v460_v5  ;;  %v579_v7 = vpop.f32.mrb[9].mxu0 }
 0x457   :  { %v463_v8 = vpop.f32.mrb[10].mxu0 }
 0x458   :  { %467 = vst.msk [vmem:[%s788_s11] sm:$0xff] %vm69_vm1, %v461_v6  ;;  %v464_v9 = vadd.f32 %v496_v4, %v463_v8  ;;  %v580_v10 = vpop.f32.mrb[11].mxu0 }
 0x45a   :  { %468 = vst.msk [vmem:[%s788_s11 + $0x8] sm:$0xff] %vm69_vm1, %v464_v9 }

// kernel: mul.26
= control target key start
LH: loop header
LB: loop body
LE: loop exit
PB: predicated region body
PF: predicated region fallthrough
CT: control target
= control target key end

     0   :  { %s34_s0 = inlined_call_operand.vmem [shape: f32[56], index: 0, kind: input, shape index: {}]   ;;  %s35_s1 = inlined_call_operand.vmem [shape: f32[56], index: 1, kind: input, shape index: {}]   ;;  %s36_s2 = inlined_call_operand.vmem [shape: f32[56], index: 2, kind: output, shape index: {}]  }
   0x1   :  { %v3_v0 = vld [vmem:[%s34_s0] sm:$0x1] }
   0x2   :  { %v4_v1 = vld [vmem:[%s35_s1] sm:$0x1] }
   0x3   :  { %v7_v2 = vmul.f32 %v4_v1, %v3_v0 }
   0x5   :  { %9 = vst [vmem:[%s36_s2] sm:$0x1] %v7_v2 }

// kernel: deepergcn_dagnn_dist_forward.14
= control target key start
LH: loop header
LB: loop body
LE: loop exit
PB: predicated region body
PF: predicated region fallthrough
CT: control target
= control target key end

     0   :  { %vm50_vm0 = vcmask 261120   ;;  %vm99_vm1 = vcmask 7168   ;;  %s267_s0 = inlined_call_operand.vmem [shape: f32[128,32], index: 0, kind: input, shape index: {}]   ;;  %s268_s1 = inlined_call_operand.vmem [shape: f32[1,32], index: 1, kind: input, shape index: {}]   ;;  %s269_s2 = inlined_call_operand.vmem [shape: f32[128,1], index: 2, kind: output, shape index: {}]  }
   0x1   :  { %v13_v0 = vld [vmem:[%s267_s0 + $0x10] sm:$0xff]  ;;  %v120_v1 = vld [vmem:[%s268_s1] ss:$0 sm:$0xff]  ;;  %v14_v5 = vld [vmem:[%s267_s0 + $0x18] sm:$0xff] }
   0x2   :  { %v11_v2 = vld [vmem:[%s267_s0] sm:$0xff]  ;;  %v36_v3 = vmul.f32 %v120_v1, %v13_v0  ;;  %v12_v6 = vld [vmem:[%s267_s0 + $0x8] sm:$0xff]  ;;  %v37_v7 = vmul.f32 %v120_v1, %v14_v5  ;;  %v18_v17 = vld [vmem:[%s267_s0 + $0x38] sm:$0xff] }
   0x3   :  { %v34_v4 = vmul.f32 %v120_v1, %v11_v2  ;;  %v35_v8 = vmul.f32 %v120_v1, %v12_v6  ;;  %v16_v9 = vld [vmem:[%s267_s0 + $0x28] sm:$0xff]  ;;  %v15_v10 = vld [vmem:[%s267_s0 + $0x20] sm:$0xff]  ;;  %v17_v18 = vld [vmem:[%s267_s0 + $0x30] sm:$0xff]  ;;  %v41_v21 = vmul.f32 %v120_v1, %v18_v17 }
   0x4   :  { %v57_v11 = vsel %vm50_vm0, %v36_v3, 0.0  ;;  %v60_v13 = vsel %vm50_vm0, %v37_v7, 0.0  ;;  %v39_v15 = vmul.f32 %v120_v1, %v16_v9  ;;  %v38_v16 = vmul.f32 %v120_v1, %v15_v10  ;;  %v20_v23 = vld [vmem:[%s267_s0 + $0x48] sm:$0xff]  ;;  %v19_v24 = vld [vmem:[%s267_s0 + $0x40] sm:$0xff]  ;;  %v22_v29 = vld [vmem:[%s267_s0 + $0x58] sm:$0xff] }
   0x5   :  { %v51_v12 = vsel %vm50_vm0, %v34_v4, 0.0  ;;  %58 = vadd.xlane.f32.xlu1 %v57_v11  ;;  %v54_v14 = vsel %vm50_vm0, %v35_v8, 0.0  ;;  %v40_v22 = vmul.f32 %v120_v1, %v17_v18  ;;  %v72_v25 = vsel %vm50_vm0, %v41_v21, 0.0  ;;  %v21_v30 = vld [vmem:[%s267_s0 + $0x50] sm:$0xff]  ;;  %v24_v35 = vld [vmem:[%s267_s0 + $0x68] sm:$0xff]  ;;  %v23_v36 = vld [vmem:[%s267_s0 + $0x60] sm:$0xff] }
   0x6   :  { %52 = vadd.xlane.f32.xlu0 %v51_v12  ;;  %v66_v19 = vsel %vm50_vm0, %v39_v15, 0.0  ;;  %v63_v20 = vsel %vm50_vm0, %v38_v16, 0.0  ;;  %v43_v27 = vmul.f32 %v120_v1, %v20_v23  ;;  %v42_v28 = vmul.f32 %v120_v1, %v19_v24  ;;  %v26_v41 = vld [vmem:[%s267_s0 + $0x78] sm:$0xff]  ;;  %v25_v42 = vld [vmem:[%s267_s0 + $0x70] sm:$0xff] }
   0x7   :  { %v69_v26 = vsel %vm50_vm0, %v40_v22, 0.0  ;;  %v45_v33 = vmul.f32 %v120_v1, %v22_v29  ;;  %v44_v34 = vmul.f32 %v120_v1, %v21_v30  ;;  %v47_v39 = vmul.f32 %v120_v1, %v24_v35 }
   0x8   :  { %v78_v31 = vsel %vm50_vm0, %v43_v27, 0.0  ;;  %v75_v32 = vsel %vm50_vm0, %v42_v28, 0.0  ;;  %v46_v40 = vmul.f32 %v120_v1, %v23_v36  ;;  %v49_v45 = vmul.f32 %v120_v1, %v26_v41 }
   0x9   :  { %61 = vadd.xlane.f32.xlu1 %v60_v13  ;;  %v84_v37 = vsel %vm50_vm0, %v45_v33, 0.0  ;;  %v81_v38 = vsel %vm50_vm0, %v44_v34, 0.0  ;;  %v90_v43 = vsel %vm50_vm0, %v47_v39, 0.0  ;;  %v48_v46 = vmul.f32 %v120_v1, %v25_v42 }
   0xa   :  { %55 = vadd.xlane.f32.xlu0 %v54_v14  ;;  %v87_v44 = vsel %vm50_vm0, %v46_v40, 0.0  ;;  %v96_v47 = vsel %vm50_vm0, %v49_v45, 0.0 }
   0xb   :  { %v93_v48 = vsel %vm50_vm0, %v48_v46, 0.0 }
   0xd   :  { %67 = vadd.xlane.f32.xlu1 %v66_v19 }
   0xe   :  { %64 = vadd.xlane.f32.xlu0 %v63_v20 }
  0x11   :  { %73 = vadd.xlane.f32.xlu1 %v72_v25 }
  0x12   :  { %70 = vadd.xlane.f32.xlu0 %v69_v26 }
  0x15   :  { %79 = vadd.xlane.f32.xlu1 %v78_v31 }
  0x16   :  { %76 = vadd.xlane.f32.xlu0 %v75_v32 }
  0x19   :  { %85 = vadd.xlane.f32.xlu1 %v84_v37 }
  0x1a   :  { %82 = vadd.xlane.f32.xlu0 %v81_v38 }
  0x1d   :  { %91 = vadd.xlane.f32.xlu1 %v90_v43 }
  0x1e   :  { %88 = vadd.xlane.f32.xlu0 %v87_v44 }
  0x21   :  { %97 = vadd.xlane.f32.xlu1 %v96_v47 }
  0x22   :  { %94 = vadd.xlane.f32.xlu0 %v93_v48 }
  0x92   :  { %v59_v49 = vpop.xlane.xlu1 %58 }
  0x93   :  { %v53_v50 = vpop.xlane.xlu0 %52  ;;  %102 = vst.msk [vmem:[%s269_s2 + $0x10] sm:$0xff] %vm99_vm1, %v59_v49 }
  0x94   :  { %100 = vst.msk [vmem:[%s269_s2] sm:$0xff] %vm99_vm1, %v53_v50 }
  0x96   :  { %v62_v51 = vpop.xlane.xlu1 %61 }
  0x97   :  { %v56_v52 = vpop.xlane.xlu0 %55  ;;  %103 = vst.msk [vmem:[%s269_s2 + $0x18] sm:$0xff] %vm99_vm1, %v62_v51 }
  0x98   :  { %101 = vst.msk [vmem:[%s269_s2 + $0x8] sm:$0xff] %vm99_vm1, %v56_v52 }
  0x9a   :  { %v68_v53 = vpop.xlane.xlu1 %67 }
  0x9b   :  { %v65_v54 = vpop.xlane.xlu0 %64  ;;  %105 = vst.msk [vmem:[%s269_s2 + $0x28] sm:$0xff] %vm99_vm1, %v68_v53 }
  0x9c   :  { %104 = vst.msk [vmem:[%s269_s2 + $0x20] sm:$0xff] %vm99_vm1, %v65_v54 }
  0x9e   :  { %v74_v55 = vpop.xlane.xlu1 %73 }
  0x9f   :  { %v71_v56 = vpop.xlane.xlu0 %70  ;;  %107 = vst.msk [vmem:[%s269_s2 + $0x38] sm:$0xff] %vm99_vm1, %v74_v55 }
  0xa0   :  { %106 = vst.msk [vmem:[%s269_s2 + $0x30] sm:$0xff] %vm99_vm1, %v71_v56 }
  0xa2   :  { %v80_v57 = vpop.xlane.xlu1 %79 }
  0xa3   :  { %v77_v58 = vpop.xlane.xlu0 %76  ;;  %109 = vst.msk [vmem:[%s269_s2 + $0x48] sm:$0xff] %vm99_vm1, %v80_v57 }
  0xa4   :  { %108 = vst.msk [vmem:[%s269_s2 + $0x40] sm:$0xff] %vm99_vm1, %v77_v58 }
  0xa6   :  { %v86_v59 = vpop.xlane.xlu1 %85 }
  0xa7   :  { %v83_v60 = vpop.xlane.xlu0 %82  ;;  %111 = vst.msk [vmem:[%s269_s2 + $0x58] sm:$0xff] %vm99_vm1, %v86_v59 }
  0xa8   :  { %110 = vst.msk [vmem:[%s269_s2 + $0x50] sm:$0xff] %vm99_vm1, %v83_v60 }
  0xaa   :  { %v92_v61 = vpop.xlane.xlu1 %91 }
  0xab   :  { %v89_v62 = vpop.xlane.xlu0 %88  ;;  %113 = vst.msk [vmem:[%s269_s2 + $0x68] sm:$0xff] %vm99_vm1, %v92_v61 }
  0xac   :  { %112 = vst.msk [vmem:[%s269_s2 + $0x60] sm:$0xff] %vm99_vm1, %v89_v62 }
  0xae   :  { %v98_v63 = vpop.xlane.xlu1 %97 }
  0xaf   :  { %v95_v0 = vpop.xlane.xlu0 %94  ;;  %115 = vst.msk [vmem:[%s269_s2 + $0x78] sm:$0xff] %vm99_vm1, %v98_v63 }
  0xb0   :  { %114 = vst.msk [vmem:[%s269_s2 + $0x70] sm:$0xff] %vm99_vm1, %v95_v0 }

// kernel: deepergcn_dagnn_dist_forward.13
= control target key start
LH: loop header
LB: loop body
LE: loop exit
PB: predicated region body
PF: predicated region fallthrough
CT: control target
= control target key end

     0   :  { %vm76_vm0 = vcmask 261120   ;;  %s4386_s1 = inlined_call_operand.vmem [shape: f32[128,32], index: 1, kind: input, shape index: {}]   ;;  %s4387_s2 = inlined_call_operand.vmem [shape: f32[1,32], index: 2, kind: input, shape index: {}]   ;;  %s4388_s3 = inlined_call_operand.<no memory space> [shape: f32[1,1], index: 3, kind: input, shape index: {}]   ;;  %s4389_s0 = inlined_call_operand.vmem [shape: bf16[128,128], index: 0, kind: input, shape index: {}]   ;;  %s4390_s4 = inlined_call_operand.vmem [shape: f32[128,32], index: 4, kind: output, shape index: {}]  }
   0x1   :  { %v38_v0 = vld [vmem:[%s4386_s1] sm:$0xff]  ;;  %v39_v1 = vld [vmem:[%s4386_s1 + $0x8] sm:$0xff]  ;;  %v9_v3 = vstv %s4388_s3  ;;  %v40_v6 = vld [vmem:[%s4386_s1 + $0x10] sm:$0xff] }
   0x2   :  { %v3192_v2 = vld [vmem:[%s4387_s2] ss:$0 sm:$0xff]  ;;  %v339_v4 = vpack.c.bf16 %v39_v1, %v38_v0  ;;  %v41_v7 = vld [vmem:[%s4386_s1 + $0x18] sm:$0xff]  ;;  %10 = vst [vmem:[#allocation2] sm:$0x1] %v9_v3  ;;  %v43_v11 = vld [vmem:[%s4386_s1 + $0x28] sm:$0xff] }
   0x3   :  { %v60_v5 = vmul.f32 %v3192_v2, %v38_v0  ;;  %v61_v8 = vmul.f32 %v3192_v2, %v39_v1  ;;  %v340_v9 = vpack.c.bf16 %v41_v7, %v40_v6  ;;  %v42_v10 = vld [vmem:[%s4386_s1 + $0x20] sm:$0xff]  ;;  %v62_v12 = vmul.f32 %v3192_v2, %v40_v6  ;;  %v44_v18 = vld [vmem:[%s4386_s1 + $0x30] sm:$0xff]  ;;  %v45_v19 = vld [vmem:[%s4386_s1 + $0x38] sm:$0xff] }
   0x4   :  { %v63_v13 = vmul.f32 %v3192_v2, %v41_v7  ;;  %2558 = vmatprep.subr.bf16.mxu0 %v339_v4  ;;  %v341_v17 = vpack.c.bf16 %v43_v11, %v42_v10  ;;  %v64_v20 = vmul.f32 %v3192_v2, %v42_v10  ;;  %v65_v22 = vmul.f32 %v3192_v2, %v43_v11  ;;  %v3228_v23 = vld [vmem:[%s4389_s0] sm:$0xff]   ;;  %v47_v28 = vld [vmem:[%s4386_s1 + $0x48] sm:$0xff]  ;;  %v48_v34 = vld [vmem:[%s4386_s1 + $0x50] sm:$0xff] }
   0x5   :  { %v77_v14 = vsel %vm76_vm0, %v60_v5, 0.0  ;;  %2559 = vmatpush3.bf16.msra.mxu0 %v339_v4  ;;  %v83_v15 = vsel %vm76_vm0, %v62_v12, 0.0  ;;  %v80_v16 = vsel %vm76_vm0, %v61_v8, 0.0  ;;  %v342_v24 = vpack.c.bf16 %v45_v19, %v44_v18  ;;  %v46_v25 = vld [vmem:[%s4386_s1 + $0x40] sm:$0xff]  ;;  %2574 = vmatprep.mubr.bf16.mxu0 %v3228_v23  ;;  %v49_v35 = vld [vmem:[%s4386_s1 + $0x58] sm:$0xff]  ;;  %v51_v42 = vld [vmem:[%s4386_s1 + $0x68] sm:$0xff] }
   0x6   :  { %78 = vadd.xlane.f32.xlu0 %v77_v14  ;;  %2560 = vmatprep.subr.bf16.mxu0 %v340_v9  ;;  %v86_v21 = vsel %vm76_vm0, %v63_v13, 0.0  ;;  %v89_v26 = vsel %vm76_vm0, %v64_v20, 0.0  ;;  %v66_v27 = vmul.f32 %v3192_v2, %v44_v18  ;;  %v92_v29 = vsel %vm76_vm0, %v65_v22, 0.0  ;;  %v50_v41 = vld [vmem:[%s4386_s1 + $0x60] sm:$0xff]  ;;  %v52_v48 = vld [vmem:[%s4386_s1 + $0x70] sm:$0xff]  ;;  %v53_v49 = vld [vmem:[%s4386_s1 + $0x78] sm:$0xff] }
   0x7   :  { %84 = vadd.xlane.f32.xlu1 %v83_v15  ;;  %v67_v30 = vmul.f32 %v3192_v2, %v45_v19  ;;  %2606 = vmatprep.mubr.bf16.mxu1 %v3228_v23  ;;  %v343_v31 = vpack.c.bf16 %v47_v28, %v46_v25  ;;  %v68_v33 = vmul.f32 %v3192_v2, %v46_v25  ;;  %v3281_v59 = vld [vmem:[%s4389_s0 + $0x8] sm:$0xff]   ;;  %v3286_v60 = vld [vmem:[%s4389_s0 + $0x10] sm:$0xff]   ;;  %v3293_v61 = vld [vmem:[%s4389_s0 + $0x18] sm:$0xff]   ;;  %v3157_v1 = vmov 0  }
   0x8   :  { %v95_v32 = vsel %vm76_vm0, %v66_v27, 0.0  ;;  %v69_v37 = vmul.f32 %v3192_v2, %v47_v28  ;;  %v344_v38 = vpack.c.bf16 %v49_v35, %v48_v34  ;;  %v70_v40 = vmul.f32 %v3192_v2, %v48_v34  ;;  %v3298_v62 = vld [vmem:[%s4389_s0 + $0x20] sm:$0xff]   ;;  %v3305_v63 = vld [vmem:[%s4389_s0 + $0x28] sm:$0xff]   ;;  %v3310_v0 = vld [vmem:[%s4389_s0 + $0x30] sm:$0xff]   ;;  %2736 = vset.pattern.permute.xlu1 %v3157_v1  ;;  %2735 = vset.pattern.permute.xlu0 %v3157_v1 }
   0x9   :  { %2561 = vmatpush3.bf16.msra.mxu0 %v340_v9  ;;  %v98_v36 = vsel %vm76_vm0, %v67_v30, 0.0  ;;  %v101_v39 = vsel %vm76_vm0, %v68_v33, 0.0  ;;  %v71_v44 = vmul.f32 %v3192_v2, %v49_v35  ;;  %v345_v45 = vpack.c.bf16 %v51_v42, %v50_v41  ;;  %v3317_v3 = vld [vmem:[%s4389_s0 + $0x38] sm:$0xff]   ;;  %v3321_v4 = vld [vmem:[#allocation2] ss:$0 sm:$0xff] }
   0xa   :  { %81 = vadd.xlane.f32.xlu0 %v80_v16  ;;  %2562 = vmatprep.subr.bf16.mxu0 %v341_v17  ;;  %v104_v43 = vsel %vm76_vm0, %v69_v37, 0.0  ;;  %v107_v46 = vsel %vm76_vm0, %v70_v40, 0.0  ;;  %v72_v47 = vmul.f32 %v3192_v2, %v50_v41  ;;  %v73_v51 = vmul.f32 %v3192_v2, %v51_v42 }
   0xb   :  { %87 = vadd.xlane.f32.xlu1 %v86_v21  ;;  %v110_v50 = vsel %vm76_vm0, %v71_v44, 0.0  ;;  %v346_v52 = vpack.c.bf16 %v53_v49, %v52_v48  ;;  %v74_v54 = vmul.f32 %v3192_v2, %v52_v48  ;;  %v75_v56 = vmul.f32 %v3192_v2, %v53_v49 }
   0xc   :  { %v113_v53 = vsel %vm76_vm0, %v72_v47, 0.0  ;;  %v116_v55 = vsel %vm76_vm0, %v73_v51, 0.0 }
   0xd   :  { %2563 = vmatpush3.bf16.msra.mxu0 %v341_v17  ;;  %v119_v57 = vsel %vm76_vm0, %v74_v54, 0.0  ;;  %v122_v58 = vsel %vm76_vm0, %v75_v56, 0.0 }
   0xe   :  { %90 = vadd.xlane.f32.xlu0 %v89_v26  ;;  %2564 = vmatprep.subr.bf16.mxu0 %v342_v24 }
   0xf   :  { %93 = vadd.xlane.f32.xlu1 %v92_v29 }
  0x11   :  { %2565 = vmatpush3.bf16.msra.mxu0 %v342_v24 }
  0x12   :  { %96 = vadd.xlane.f32.xlu0 %v95_v32  ;;  %2566 = vmatprep.subr.bf16.mxu0 %v343_v31 }
  0x13   :  { %99 = vadd.xlane.f32.xlu1 %v98_v36 }
  0x15   :  { %2567 = vmatpush3.bf16.msra.mxu0 %v343_v31 }
  0x16   :  { %102 = vadd.xlane.f32.xlu0 %v101_v39  ;;  %2568 = vmatprep.subr.bf16.mxu0 %v344_v38 }
  0x17   :  { %105 = vadd.xlane.f32.xlu1 %v104_v43 }
  0x19   :  { %2569 = vmatpush3.bf16.msra.mxu0 %v344_v38 }
  0x1a   :  { %108 = vadd.xlane.f32.xlu0 %v107_v46  ;;  %2570 = vmatprep.subr.bf16.mxu0 %v345_v45 }
  0x1b   :  { %111 = vadd.xlane.f32.xlu1 %v110_v50 }
  0x1d   :  { %2571 = vmatpush3.bf16.msra.mxu0 %v345_v45 }
  0x1e   :  { %114 = vadd.xlane.f32.xlu0 %v113_v53  ;;  %2572 = vmatprep.subr.bf16.mxu0 %v346_v52 }
  0x1f   :  { %117 = vadd.xlane.f32.xlu1 %v116_v55 }
  0x21   :  { %2573 = vmatpush3.bf16.msra.mxu0 %v346_v52 }
  0x22   :  { %120 = vadd.xlane.f32.xlu0 %v119_v57 }
  0x23   :  { %123 = vadd.xlane.f32.xlu1 %v122_v58 }
  0x24   :  { %2575 = vmatmul.mubr.bf16.vlgmr.msra.gmra.mrb[0].mxu0 %v3281_v59 }
  0x25   :  { %2578 = vmatprep.mubr.bf16.mxu0 %v3286_v60 }
  0x2c   :  { %2579 = vmatmul.mubr.bf16.gmra.mrb[4].mxu0 %v3293_v61 }
  0x2d   :  { %2582 = vmatprep.mubr.bf16.mxu0 %v3298_v62 }
  0x34   :  { %2583 = vmatmul.mubr.bf16.gmra.mrb[8].mxu0 %v3305_v63 }
  0x35   :  { %2586 = vmatprep.mubr.bf16.mxu0 %v3310_v0 }
  0x3c   :  { %2587 = vmatmul.mubr.bf16.gmra.mrb[12].mxu0 %v3317_v3 }
  0x3d   :  { %2638 = vmatprep.mubr.bf16.mxu0 %v3228_v23 }
  0x93   :  { %v79_v5 = vpop.xlane.xlu0 %78 }
  0x94   :  { %v131_v6 = vadd.f32 %v3321_v4, %v79_v5  ;;  %v85_v7 = vpop.xlane.xlu1 %84 }
  0x95   :  { %v133_v8 = vadd.f32 %v3321_v4, %v85_v7 }
  0x96   :  { %v2374_v9 = vmul.f32 -1.442695, %v131_v6 }
  0x97   :  { %v82_v10 = vpop.xlane.xlu0 %81  ;;  %v2376_v11 = vmul.f32 -1.442695, %v133_v8 }
  0x98   :  { %2745 = vpow2.f32 %v2374_v9  ;;  %v132_v12 = vadd.f32 %v3321_v4, %v82_v10  ;;  %v88_v13 = vpop.xlane.xlu1 %87 }
  0x99   :  { %2747 = vpow2.f32 %v2376_v11  ;;  %v134_v14 = vadd.f32 %v3321_v4, %v88_v13 }
  0x9a   :  { %v2375_v15 = vmul.f32 -1.442695, %v132_v12 }
  0x9b   :  { %v2377_v16 = vmul.f32 -1.442695, %v134_v14  ;;  %v91_v17 = vpop.xlane.xlu0 %90 }
  0x9c   :  { %2749 = vpow2.f32 %v2375_v15  ;;  %v135_v18 = vadd.f32 %v3321_v4, %v91_v17  ;;  %v94_v19 = vpop.xlane.xlu1 %93 }
  0x9d   :  { %2751 = vpow2.f32 %v2377_v16  ;;  %v136_v20 = vadd.f32 %v3321_v4, %v94_v19 }
  0x9e   :  { %v2378_v21 = vmul.f32 -1.442695, %v135_v18 }
  0x9f   :  { %v97_v22 = vpop.xlane.xlu0 %96  ;;  %v2379_v24 = vmul.f32 -1.442695, %v136_v20 }
  0xa0   :  { %v137_v25 = vadd.f32 %v3321_v4, %v97_v22  ;;  %v100_v26 = vpop.xlane.xlu1 %99  ;;  %2753 = vpow2.f32 %v2378_v21 }
  0xa1   :  { %2755 = vpow2.f32 %v2379_v24  ;;  %v138_v32 = vadd.f32 %v3321_v4, %v100_v26 }
  0xa2   :  { %v2746_v27 = vpop.eup %2745  ;;  %v2380_v31 = vmul.f32 -1.442695, %v137_v25 }
  0xa3   :  { %v2748_v28 = vpop.eup %2747  ;;  %v195_v29 = vadd.f32 1.0, %v2746_v27  ;;  %v103_v30 = vpop.xlane.xlu0 %102  ;;  %v2381_v41 = vmul.f32 -1.442695, %v138_v32 }
  0xa4   :  { %v106_v33 = vpop.xlane.xlu1 %105  ;;  %v197_v36 = vadd.f32 1.0, %v2748_v28  ;;  %v139_v43 = vadd.f32 %v3321_v4, %v103_v30 }
  0xa5   :  { %2757 = vrcp.f32 %v195_v29  ;;  %v140_v34 = vadd.f32 %v3321_v4, %v106_v33 }
  0xa6   :  { %v2750_v35 = vpop.eup %2749  ;;  %2759 = vpow2.f32 %v2380_v31  ;;  %v2382_v49 = vmul.f32 -1.442695, %v139_v43 }
  0xa7   :  { %v2752_v37 = vpop.eup %2751  ;;  %v196_v38 = vadd.f32 1.0, %v2750_v35  ;;  %v2383_v39 = vmul.f32 -1.442695, %v140_v34  ;;  %v109_v40 = vpop.xlane.xlu0 %108 }
  0xa8   :  { %v112_v42 = vpop.xlane.xlu1 %111  ;;  %v198_v45 = vadd.f32 1.0, %v2752_v37  ;;  %v141_v50 = vadd.f32 %v3321_v4, %v109_v40 }
  0xa9   :  { %2761 = vrcp.f32 %v196_v38  ;;  %v142_v44 = vadd.f32 %v3321_v4, %v112_v42 }
  0xaa   :  { %2763 = vrcp.f32 %v197_v36  ;;  %v2754_v47 = vpop.eup %2753  ;;  %v2384_v58 = vmul.f32 -1.442695, %v141_v50 }
  0xab   :  { %2765 = vpow2.f32 %v2383_v39  ;;  %v2385_v46 = vmul.f32 -1.442695, %v142_v44  ;;  %v115_v51 = vpop.xlane.xlu0 %114  ;;  %v2756_v53 = vpop.eup %2755  ;;  %v199_v55 = vadd.f32 1.0, %v2754_v47 }
  0xac   :  { %2767 = vpow2.f32 %v2381_v41  ;;  %v118_v48 = vpop.xlane.xlu1 %117  ;;  %v200_v6 = vadd.f32 1.0, %v2756_v53  ;;  %v143_v7 = vadd.f32 %v3321_v4, %v115_v51 }
  0xad   :  { %v144_v52 = vadd.f32 %v3321_v4, %v118_v48  ;;  %2769 = vrcp.f32 %v198_v45 }
  0xae   :  { %2771 = vpow2.f32 %v2385_v46  ;;  %v2386_v15 = vmul.f32 -1.442695, %v143_v7 }
  0xaf   :  { %v2758_v54 = vpop.eup %2757  ;;  %v2387_v56 = vmul.f32 -1.442695, %v144_v52  ;;  %2773 = vpow2.f32 %v2382_v49  ;;  %v121_v9 = vpop.xlane.xlu0 %120 }
  0xb0   :  { %v124_v57 = vpop.xlane.xlu1 %123  ;;  %245 = vperm.xlu0 %2735, %v2758_v54   ;;  %v2760_v5 = vpop.eup %2759  ;;  %v145_v16 = vadd.f32 %v3321_v4, %v121_v9 }
  0xb1   :  { %v146_v1 = vadd.f32 %v3321_v4, %v124_v57  ;;  %2775 = vpow2.f32 %v2387_v56  ;;  %v201_v17 = vadd.f32 1.0, %v2760_v5 }
  0xb2   :  { %2777 = vrcp.f32 %v199_v55  ;;  %v2388_v22 = vmul.f32 -1.442695, %v145_v16 }
  0xb3   :  { %v2762_v8 = vpop.eup %2761  ;;  %v2389_v10 = vmul.f32 -1.442695, %v146_v1  ;;  %2779 = vpow2.f32 %v2384_v58 }
  0xb4   :  { %v2764_v11 = vpop.eup %2763  ;;  %250 = vperm.xlu1 %2736, %v2762_v8   ;;  %2781 = vrcp.f32 %v200_v6 }
  0xb5   :  { %v2766_v12 = vpop.eup %2765  ;;  %2783 = vpow2.f32 %v2389_v10 }
  0xb6   :  { %v2768_v13 = vpop.eup %2767  ;;  %v204_v14 = vadd.f32 1.0, %v2766_v12 }
  0xb7   :  { %v2770_v18 = vpop.eup %2769  ;;  %v202_v20 = vadd.f32 1.0, %v2768_v13 }
  0xb8   :  { %2785 = vrcp.f32 %v204_v14  ;;  %255 = vperm.xlu1 %2736, %v2764_v11   ;;  %v2772_v19 = vpop.eup %2771 }
  0xb9   :  { %v206_v21 = vadd.f32 1.0, %v2772_v19  ;;  %2787 = vpow2.f32 %v2386_v15  ;;  %v2774_v24 = vpop.eup %2773 }
  0xba   :  { %2789 = vrcp.f32 %v201_v17  ;;  %v203_v29 = vadd.f32 1.0, %v2774_v24 }
  0xbb   :  { %v2776_v25 = vpop.eup %2775  ;;  %2791 = vrcp.f32 %v206_v21 }
  0xbc   :  { %260 = vperm.xlu1 %2736, %v2770_v18   ;;  %v2778_v26 = vpop.eup %2777  ;;  %2793 = vrcp.f32 %v202_v20  ;;  %v208_v27 = vadd.f32 1.0, %v2776_v25 }
  0xbd   :  { %2795 = vpow2.f32 %v2388_v22  ;;  %v2780_v28 = vpop.eup %2779 }
  0xbe   :  { %2797 = vrcp.f32 %v208_v27  ;;  %v2782_v30 = vpop.eup %2781  ;;  %v205_v34 = vadd.f32 1.0, %v2780_v28 }
  0xbf   :  { %v2784_v31 = vpop.eup %2783  ;;  %2799 = vrcp.f32 %v203_v29 }
  0xc0   :  { %265 = vperm.xlu1 %2736, %v2778_v26   ;;  %v210_v33 = vadd.f32 1.0, %v2784_v31 }
  0xc2   :  { %v2786_v32 = vpop.eup %2785  ;;  %2801 = vrcp.f32 %v210_v33 }
  0xc3   :  { %290 = vperm.xlu0 %2735, %v2786_v32   ;;  %v2788_v35 = vpop.eup %2787  ;;  %2803 = vrcp.f32 %v205_v34 }
  0xc4   :  { %270 = vperm.xlu1 %2736, %v2782_v30   ;;  %v2790_v36 = vpop.eup %2789  ;;  %v207_v39 = vadd.f32 1.0, %v2788_v35 }
  0xc5   :  { %v2792_v37 = vpop.eup %2791 }
  0xc6   :  { %v2794_v38 = vpop.eup %2793  ;;  %2805 = vrcp.f32 %v207_v39 }
  0xc7   :  { %300 = vperm.xlu0 %2735, %v2792_v37   ;;  %v2796_v40 = vpop.eup %2795 }
  0xc8   :  { %275 = vperm.xlu1 %2736, %v2790_v36   ;;  %v2798_v41 = vpop.eup %2797  ;;  %v209_v42 = vadd.f32 1.0, %v2796_v40 }
  0xc9   :  { %v2800_v43 = vpop.eup %2799 }
  0xca   :  { %2807 = vrcp.f32 %v209_v42 }
  0xcb   :  { %310 = vperm.xlu0 %2735, %v2798_v41  }
  0xcc   :  { %280 = vperm.xlu1 %2736, %v2794_v38   ;;  %v2802_v44 = vpop.eup %2801 }
  0xcd   :  { %v2804_v45 = vpop.eup %2803 }
  0xcf   :  { %320 = vperm.xlu0 %2735, %v2802_v44  }
  0xd0   :  { %285 = vperm.xlu1 %2736, %v2800_v43   ;;  %v2806_v46 = vpop.eup %2805 }
  0xd4   :  { %295 = vperm.xlu1 %2736, %v2804_v45   ;;  %v2808_v47 = vpop.eup %2807 }
  0xd8   :  { %305 = vperm.xlu1 %2736, %v2806_v46  }
  0xdc   :  { %315 = vperm.xlu1 %2736, %v2808_v47  }
  0xf7   :  { %v3339_v48 = vpop.f32.mrb[0].mxu0 }
  0xf8   :  { %v3341_v49 = vpop.f32.mrb[1].mxu0  ;;  %v494_v50 = vmul.f32 %v3339_v48, %v3192_v2 }
  0xf9   :  { %v3345_v51 = vpop.f32.mrb[2].mxu0  ;;  %v492_v55 = vmul.f32 %v3192_v2, %v3341_v49 }
  0xfa   :  { %v781_v52 = vpack.c.bf16 %v3345_v51, %v3339_v48  ;;  %v3349_v53 = vpop.f32.mrb[3].mxu0  ;;  %v514_v54 = vsel %vm76_vm0, %v494_v50, 0.0  ;;  %v495_v5 = vmul.f32 %v3345_v51, %v3192_v2 }
  0xfb   :  { %515 = vadd.xlane.f32.xlu0 %v514_v54  ;;  %v780_v56 = vpack.c.bf16 %v3349_v53, %v3341_v49  ;;  %v493_v57 = vmul.f32 %v3192_v2, %v3349_v53  ;;  %v508_v1 = vsel %vm76_vm0, %v492_v55, 0.0 }
  0xfc   :  { %v517_v12 = vsel %vm76_vm0, %v495_v5, 0.0 }
  0xfd   :  { %2590 = vmatprep.subr.bf16.mxu1 %v780_v56  ;;  %v511_v58 = vsel %vm76_vm0, %v493_v57, 0.0 }
  0xfe   :  { %2591 = vmatpush3.bf16.msra.mxu1 %v780_v56 }
  0xff   :  { %2592 = vmatprep.subr.bf16.mxu1 %v781_v52  ;;  %v3362_v6 = vpop.f32.mrb[4].mxu0  ;;  %512 = vadd.xlane.f32.xlu0 %v511_v58 }
 0x100   :  { %509 = vadd.xlane.f32.xlu1 %v508_v1  ;;  %v3364_v7 = vpop.f32.mrb[5].mxu0  ;;  %v498_v8 = vmul.f32 %v3362_v6, %v3192_v2 }
 0x101   :  { %v3368_v9 = vpop.f32.mrb[6].mxu0  ;;  %v496_v16 = vmul.f32 %v3192_v2, %v3364_v7 }
 0x102   :  { %v783_v10 = vpack.c.bf16 %v3368_v9, %v3362_v6  ;;  %v3372_v11 = vpop.f32.mrb[7].mxu0  ;;  %2593 = vmatpush3.bf16.msra.mxu1 %v781_v52  ;;  %v526_v13 = vsel %vm76_vm0, %v498_v8, 0.0  ;;  %v499_v14 = vmul.f32 %v3368_v9, %v3192_v2 }
 0x103   :  { %v782_v15 = vpack.c.bf16 %v3372_v11, %v3364_v7  ;;  %527 = vadd.xlane.f32.xlu0 %v526_v13  ;;  %v497_v18 = vmul.f32 %v3192_v2, %v3372_v11  ;;  %v520_v19 = vsel %vm76_vm0, %v496_v16, 0.0 }
 0x104   :  { %518 = vadd.xlane.f32.xlu1 %v517_v12  ;;  %v529_v17 = vsel %vm76_vm0, %v499_v14, 0.0 }
 0x105   :  { %2594 = vmatprep.subr.bf16.mxu1 %v782_v15  ;;  %v523_v27 = vsel %vm76_vm0, %v497_v18, 0.0 }
 0x106   :  { %2595 = vmatpush3.bf16.msra.mxu1 %v782_v15 }
 0x107   :  { %v3386_v20 = vpop.f32.mrb[8].mxu0  ;;  %2596 = vmatprep.subr.bf16.mxu1 %v783_v10  ;;  %521 = vadd.xlane.f32.xlu0 %v520_v19 }
 0x108   :  { %530 = vadd.xlane.f32.xlu1 %v529_v17  ;;  %v3388_v21 = vpop.f32.mrb[9].mxu0  ;;  %v502_v22 = vmul.f32 %v3386_v20, %v3192_v2 }
 0x109   :  { %v3392_v24 = vpop.f32.mrb[10].mxu0  ;;  %v500_v31 = vmul.f32 %v3192_v2, %v3388_v21 }
 0x10a   :  { %v785_v25 = vpack.c.bf16 %v3392_v24, %v3386_v20  ;;  %v3396_v26 = vpop.f32.mrb[11].mxu0  ;;  %2597 = vmatpush3.bf16.msra.mxu1 %v783_v10  ;;  %v538_v28 = vsel %vm76_vm0, %v502_v22, 0.0  ;;  %v503_v29 = vmul.f32 %v3392_v24, %v3192_v2 }
 0x10b   :  { %v784_v30 = vpack.c.bf16 %v3396_v26, %v3388_v21  ;;  %539 = vadd.xlane.f32.xlu0 %v538_v28  ;;  %v501_v33 = vmul.f32 %v3192_v2, %v3396_v26  ;;  %v532_v34 = vsel %vm76_vm0, %v500_v31, 0.0 }
 0x10c   :  { %524 = vadd.xlane.f32.xlu1 %v523_v27  ;;  %v541_v32 = vsel %vm76_vm0, %v503_v29, 0.0 }
 0x10d   :  { %2598 = vmatprep.subr.bf16.mxu1 %v784_v30  ;;  %v535_v41 = vsel %vm76_vm0, %v501_v33, 0.0 }
 0x10e   :  { %2599 = vmatpush3.bf16.msra.mxu1 %v784_v30 }
 0x10f   :  { %v3410_v35 = vpop.f32.mrb[12].mxu0  ;;  %2600 = vmatprep.subr.bf16.mxu1 %v785_v25  ;;  %533 = vadd.xlane.f32.xlu0 %v532_v34 }
 0x110   :  { %542 = vadd.xlane.f32.xlu1 %v541_v32  ;;  %4423 = vst [vmem:[#allocation3_spill] sm:$0xff] %v3410_v35  ;;  %v3412_v36 = vpop.f32.mrb[13].mxu0  ;;  %v506_v37 = vmul.f32 %v3410_v35, %v3192_v2 }
 0x111   :  { %4424 = vst [vmem:[#allocation4_spill] sm:$0xff] %v3412_v36  ;;  %v3416_v38 = vpop.f32.mrb[14].mxu0  ;;  %v504_v45 = vmul.f32 %v3192_v2, %v3412_v36 }
 0x112   :  { %4425 = vst [vmem:[#allocation5_spill] sm:$0xff] %v3416_v38  ;;  %v787_v39 = vpack.c.bf16 %v3416_v38, %v3410_v35  ;;  %v3420_v40 = vpop.f32.mrb[15].mxu0  ;;  %2601 = vmatpush3.bf16.msra.mxu1 %v785_v25  ;;  %v550_v42 = vsel %vm76_vm0, %v506_v37, 0.0  ;;  %v507_v43 = vmul.f32 %v3416_v38, %v3192_v2 }
 0x113   :  { %4426 = vst [vmem:[#allocation6_spill] sm:$0xff] %v3420_v40  ;;  %v786_v44 = vpack.c.bf16 %v3420_v40, %v3412_v36  ;;  %551 = vadd.xlane.f32.xlu0 %v550_v42  ;;  %v505_v47 = vmul.f32 %v3192_v2, %v3420_v40  ;;  %v544_v50 = vsel %vm76_vm0, %v504_v45, 0.0 }
 0x114   :  { %536 = vadd.xlane.f32.xlu1 %v535_v41  ;;  %v553_v46 = vsel %vm76_vm0, %v507_v43, 0.0 }
 0x115   :  { %2602 = vmatprep.subr.bf16.mxu1 %v786_v44  ;;  %v547_v52 = vsel %vm76_vm0, %v505_v47, 0.0 }
 0x116   :  { %2603 = vmatpush3.bf16.msra.mxu1 %v786_v44 }
 0x117   :  { %2604 = vmatprep.subr.bf16.mxu1 %v787_v39  ;;  %545 = vadd.xlane.f32.xlu0 %v544_v50 }
 0x118   :  { %554 = vadd.xlane.f32.xlu1 %v553_v46 }
 0x11a   :  { %2605 = vmatpush3.bf16.msra.mxu1 %v787_v39 }
 0x11c   :  { %548 = vadd.xlane.f32.xlu1 %v547_v52 }
 0x11d   :  { %2607 = vmatmul.mubr.bf16.vlgmr.msra.gmra.mrb[0].mxu1 %v3281_v59 }
 0x11e   :  { %2610 = vmatprep.mubr.bf16.mxu1 %v3286_v60 }
 0x125   :  { %2611 = vmatmul.mubr.bf16.gmra.mrb[4].mxu1 %v3293_v61 }
 0x126   :  { %2614 = vmatprep.mubr.bf16.mxu1 %v3298_v62 }
 0x12d   :  { %2615 = vmatmul.mubr.bf16.gmra.mrb[8].mxu1 %v3305_v63 }
 0x12e   :  { %2618 = vmatprep.mubr.bf16.mxu1 %v3310_v0 }
 0x12f   :  { %v3455_v1 = vpop.permute.xlu0 %245 }
 0x133   :  { %v3443_v2 = vpop.permute.xlu1 %250 }
 0x135   :  { %2619 = vmatmul.mubr.bf16.gmra.mrb[12].mxu1 %v3317_v3 }
 0x136   :  { %2670 = vmatprep.mubr.bf16.mxu1 %v3228_v23 }
 0x137   :  { %v3445_v54 = vpop.permute.xlu1 %255 }
 0x13b   :  { %v3447_v55 = vpop.permute.xlu1 %260 }
 0x13f   :  { %v3449_v56 = vpop.permute.xlu1 %265 }
 0x142   :  { %v3459_v8 = vpop.permute.xlu0 %290 }
 0x143   :  { %v3451_v57 = vpop.permute.xlu1 %270 }
 0x146   :  { %v3463_v23 = vpop.permute.xlu0 %300 }
 0x147   :  { %v3453_v58 = vpop.permute.xlu1 %275 }
 0x14a   :  { %v3467_v13 = vpop.permute.xlu0 %310 }
 0x14b   :  { %v3457_v5 = vpop.permute.xlu1 %280  ;;  %4427 = vst [vmem:[#allocation7_spill] sm:$0xff] %v3467_v13 }
 0x14e   :  { %v3471_v15 = vpop.permute.xlu0 %320 }
 0x14f   :  { %v3461_v10 = vpop.permute.xlu1 %285  ;;  %4429 = vst [vmem:[#allocation9_spill] sm:$0xff] %v3471_v15 }
 0x153   :  { %v3465_v12 = vpop.permute.xlu1 %295 }
 0x157   :  { %v3469_v14 = vpop.permute.xlu1 %305 }
 0x158   :  { %4428 = vst [vmem:[#allocation8_spill] sm:$0xff] %v3469_v14 }
 0x15b   :  { %v3473_v16 = vpop.permute.xlu1 %315 }
 0x15c   :  { %4430 = vst [vmem:[#allocation10_spill] sm:$0xff] %v3473_v16 }
 0x188   :  { %v516_v17 = vpop.xlane.xlu0 %515 }
 0x189   :  { %v558_v18 = vadd.f32 %v3321_v4, %v516_v17 }
 0x18b   :  { %v2400_v19 = vmul.f32 -1.442695, %v558_v18 }
 0x18c   :  { %v513_v27 = vpop.xlane.xlu0 %512 }
 0x18d   :  { %v510_v22 = vpop.xlane.xlu1 %509  ;;  %2809 = vpow2.f32 %v2400_v19  ;;  %v557_v28 = vadd.f32 %v3321_v4, %v513_v27 }
 0x18e   :  { %v556_v25 = vadd.f32 %v3321_v4, %v510_v22 }
 0x18f   :  { %v2399_v30 = vmul.f32 -1.442695, %v557_v28 }
 0x190   :  { %v2398_v29 = vmul.f32 -1.442695, %v556_v25  ;;  %v528_v33 = vpop.xlane.xlu0 %527 }
 0x191   :  { %v519_v31 = vpop.xlane.xlu1 %518  ;;  %v562_v34 = vadd.f32 %v3321_v4, %v528_v33 }
 0x192   :  { %2811 = vpow2.f32 %v2398_v29  ;;  %v559_v32 = vadd.f32 %v3321_v4, %v519_v31 }
 0x193   :  { %2813 = vpow2.f32 %v2399_v30  ;;  %v2404_v39 = vmul.f32 -1.442695, %v562_v34 }
 0x194   :  { %v2401_v37 = vmul.f32 -1.442695, %v559_v32  ;;  %v522_v42 = vpop.xlane.xlu0 %521 }
 0x195   :  { %v531_v41 = vpop.xlane.xlu1 %530  ;;  %v560_v44 = vadd.f32 %v3321_v4, %v522_v42 }
 0x196   :  { %2815 = vpow2.f32 %v2401_v37  ;;  %v563_v43 = vadd.f32 %v3321_v4, %v531_v41 }
 0x197   :  { %2817 = vpow2.f32 %v2404_v39  ;;  %v2810_v45 = vpop.eup %2809  ;;  %v2402_v50 = vmul.f32 -1.442695, %v560_v44 }
 0x198   :  { %v2405_v46 = vmul.f32 -1.442695, %v563_v43  ;;  %v622_v47 = vadd.f32 1.0, %v2810_v45  ;;  %v540_v18 = vpop.xlane.xlu0 %539 }
 0x199   :  { %v525_v52 = vpop.xlane.xlu1 %524  ;;  %v566_v19 = vadd.f32 %v3321_v4, %v540_v18 }
 0x19a   :  { %2819 = vpow2.f32 %v2405_v46  ;;  %v561_v17 = vadd.f32 %v3321_v4, %v525_v52 }
 0x19b   :  { %2821 = vrcp.f32 %v622_v47  ;;  %v2408_v29 = vmul.f32 -1.442695, %v566_v19 }
 0x19c   :  { %v2812_v22 = vpop.eup %2811  ;;  %2823 = vpow2.f32 %v2402_v50  ;;  %v2403_v25 = vmul.f32 -1.442695, %v561_v17  ;;  %v534_v32 = vpop.xlane.xlu0 %533 }
 0x19d   :  { %v2814_v27 = vpop.eup %2813  ;;  %v620_v28 = vadd.f32 1.0, %v2812_v22  ;;  %v543_v30 = vpop.xlane.xlu1 %542  ;;  %v564_v34 = vadd.f32 %v3321_v4, %v534_v32 }
 0x19e   :  { %v621_v31 = vadd.f32 1.0, %v2814_v27  ;;  %2825 = vpow2.f32 %v2403_v25  ;;  %v567_v33 = vadd.f32 %v3321_v4, %v543_v30 }
 0x19f   :  { %2827 = vrcp.f32 %v620_v28  ;;  %v2406_v43 = vmul.f32 -1.442695, %v564_v34 }
 0x1a0   :  { %v2816_v37 = vpop.eup %2815  ;;  %2829 = vrcp.f32 %v621_v31  ;;  %v2409_v39 = vmul.f32 -1.442695, %v567_v33  ;;  %v552_v47 = vpop.xlane.xlu0 %551 }
 0x1a1   :  { %v2818_v41 = vpop.eup %2817  ;;  %v623_v42 = vadd.f32 1.0, %v2816_v37  ;;  %2831 = vpow2.f32 %v2408_v29  ;;  %v537_v44 = vpop.xlane.xlu1 %536  ;;  %v570_v50 = vadd.f32 %v3321_v4, %v552_v47 }
 0x1a2   :  { %v626_v45 = vadd.f32 1.0, %v2818_v41  ;;  %2833 = vpow2.f32 %v2409_v39  ;;  %v565_v46 = vadd.f32 %v3321_v4, %v537_v44 }
 0x1a3   :  { %2835 = vrcp.f32 %v623_v42  ;;  %v2412_v22 = vmul.f32 -1.442695, %v570_v50 }
 0x1a4   :  { %v2820_v52 = vpop.eup %2819  ;;  %2837 = vrcp.f32 %v626_v45  ;;  %v2407_v17 = vmul.f32 -1.442695, %v565_v46  ;;  %v546_v28 = vpop.xlane.xlu0 %545 }
 0x1a5   :  { %v2822_v18 = vpop.eup %2821  ;;  %v627_v19 = vadd.f32 1.0, %v2820_v52  ;;  %2839 = vpow2.f32 %v2406_v43  ;;  %v555_v25 = vpop.xlane.xlu1 %554  ;;  %v568_v31 = vadd.f32 %v3321_v4, %v546_v28 }
 0x1a6   :  { %v2824_v27 = vpop.eup %2823  ;;  %2841 = vpow2.f32 %v2407_v17  ;;  %v571_v29 = vadd.f32 %v3321_v4, %v555_v25  ;;  %680 = vperm.xlu1 %2736, %v2822_v18  }
 0x1a7   :  { %v624_v30 = vadd.f32 1.0, %v2824_v27  ;;  %2843 = vrcp.f32 %v627_v19  ;;  %v2410_v39 = vmul.f32 -1.442695, %v568_v31 }
 0x1a8   :  { %v2826_v32 = vpop.eup %2825  ;;  %2845 = vpow2.f32 %v2412_v22  ;;  %v2413_v33 = vmul.f32 -1.442695, %v571_v29 }
 0x1a9   :  { %v2828_v34 = vpop.eup %2827  ;;  %2847 = vrcp.f32 %v624_v30  ;;  %v625_v37 = vadd.f32 1.0, %v2826_v32  ;;  %v549_v41 = vpop.xlane.xlu1 %548 }
 0x1aa   :  { %v2830_v42 = vpop.eup %2829  ;;  %2849 = vpow2.f32 %v2413_v33  ;;  %v569_v43 = vadd.f32 %v3321_v4, %v549_v41  ;;  %670 = vperm.xlu0 %2735, %v2828_v34  }
 0x1ab   :  { %v2832_v44 = vpop.eup %2831  ;;  %2851 = vrcp.f32 %v625_v37  ;;  %675 = vperm.xlu1 %2736, %v2830_v42  }
 0x1ac   :  { %v2834_v45 = vpop.eup %2833  ;;  %v630_v46 = vadd.f32 1.0, %v2832_v44  ;;  %2853 = vpow2.f32 %v2410_v39  ;;  %v2411_v47 = vmul.f32 -1.442695, %v569_v43 }
 0x1ad   :  { %v2836_v50 = vpop.eup %2835  ;;  %v631_v52 = vadd.f32 1.0, %v2834_v45 }
 0x1ae   :  { %v2838_v17 = vpop.eup %2837  ;;  %2855 = vrcp.f32 %v630_v46  ;;  %685 = vperm.xlu0 %2735, %v2836_v50  }
 0x1af   :  { %v2840_v18 = vpop.eup %2839  ;;  %2857 = vrcp.f32 %v631_v52  ;;  %700 = vperm.xlu1 %2736, %v2838_v17  }
 0x1b0   :  { %v2842_v19 = vpop.eup %2841  ;;  %v628_v22 = vadd.f32 1.0, %v2840_v18  ;;  %2859 = vpow2.f32 %v2411_v47  ;;  %v3498_v18 = vld [vmem:[%s4387_s2] ss:$0 sm:$0xff] }
 0x1b1   :  { %v2844_v4 = vpop.eup %2843  ;;  %v629_v25 = vadd.f32 1.0, %v2842_v19 }
 0x1b2   :  { %v2846_v27 = vpop.eup %2845  ;;  %2861 = vrcp.f32 %v628_v22  ;;  %705 = vperm.xlu0 %2735, %v2844_v4  }
 0x1b3   :  { %v2848_v28 = vpop.eup %2847  ;;  %2863 = vrcp.f32 %v629_v25  ;;  %v634_v29 = vadd.f32 1.0, %v2846_v27 }
 0x1b4   :  { %v2850_v30 = vpop.eup %2849  ;;  %690 = vperm.xlu1 %2736, %v2848_v28  }
 0x1b5   :  { %v2852_v31 = vpop.eup %2851  ;;  %2865 = vrcp.f32 %v634_v29  ;;  %v635_v32 = vadd.f32 1.0, %v2850_v30 }
 0x1b6   :  { %v2854_v33 = vpop.eup %2853  ;;  %695 = vperm.xlu0 %2735, %v2852_v31  }
 0x1b7   :  { %v632_v34 = vadd.f32 1.0, %v2854_v33  ;;  %2867 = vrcp.f32 %v635_v32 }
 0x1b8   :  { %v2856_v37 = vpop.eup %2855 }
 0x1b9   :  { %v2858_v39 = vpop.eup %2857  ;;  %2869 = vrcp.f32 %v632_v34  ;;  %720 = vperm.xlu1 %2736, %v2856_v37  }
 0x1ba   :  { %v2860_v41 = vpop.eup %2859  ;;  %725 = vperm.xlu0 %2735, %v2858_v39  }
 0x1bb   :  { %v633_v42 = vadd.f32 1.0, %v2860_v41 }
 0x1bc   :  { %v2862_v43 = vpop.eup %2861 }
 0x1bd   :  { %v2864_v44 = vpop.eup %2863  ;;  %2871 = vrcp.f32 %v633_v42  ;;  %710 = vperm.xlu1 %2736, %v2862_v43  }
 0x1be   :  { %715 = vperm.xlu0 %2735, %v2864_v44  }
 0x1bf   :  { %v2866_v45 = vpop.eup %2865 }
 0x1c1   :  { %v2868_v46 = vpop.eup %2867  ;;  %740 = vperm.xlu1 %2736, %v2866_v45  }
 0x1c2   :  { %745 = vperm.xlu0 %2735, %v2868_v46  }
 0x1c3   :  { %v2870_v47 = vpop.eup %2869 }
 0x1c5   :  { %730 = vperm.xlu1 %2736, %v2870_v47  }
 0x1c7   :  { %v2872_v50 = vpop.eup %2871 }
 0x1c8   :  { %735 = vperm.xlu0 %2735, %v2872_v50  }
 0x1f0   :  { %v3491_v52 = vpop.f32.mrb[0].mxu1 }
 0x1f1   :  { %v3493_v17 = vpop.f32.mrb[1].mxu1  ;;  %v887_v19 = vmul.f32 %v3498_v18, %v3491_v52 }
 0x1f2   :  { %v3502_v22 = vpop.f32.mrb[2].mxu1  ;;  %v885_v4 = vmul.f32 %v3498_v18, %v3493_v17 }
 0x1f3   :  { %v1174_v25 = vpack.c.bf16 %v3502_v22, %v3491_v52  ;;  %v3508_v27 = vpop.f32.mrb[3].mxu1  ;;  %v907_v28 = vsel %vm76_vm0, %v887_v19, 0.0  ;;  %v888_v32 = vmul.f32 %v3498_v18, %v3502_v22 }
 0x1f4   :  { %v1173_v29 = vpack.c.bf16 %v3508_v27, %v3493_v17  ;;  %908 = vadd.xlane.f32.xlu0 %v907_v28  ;;  %v901_v30 = vsel %vm76_vm0, %v885_v4, 0.0  ;;  %v886_v31 = vmul.f32 %v3498_v18, %v3508_v27 }
 0x1f5   :  { %902 = vadd.xlane.f32.xlu1 %v901_v30  ;;  %v910_v37 = vsel %vm76_vm0, %v888_v32, 0.0 }
 0x1f6   :  { %2622 = vmatprep.subr.bf16.mxu0 %v1173_v29  ;;  %v904_v33 = vsel %vm76_vm0, %v886_v31, 0.0 }
 0x1f7   :  { %2623 = vmatpush3.bf16.msra.mxu0 %v1173_v29 }
 0x1f8   :  { %v3519_v34 = vpop.f32.mrb[4].mxu1  ;;  %2624 = vmatprep.subr.bf16.mxu0 %v1174_v25  ;;  %905 = vadd.xlane.f32.xlu0 %v904_v33 }
 0x1f9   :  { %v3522_v39 = vpop.f32.mrb[5].mxu1  ;;  %911 = vadd.xlane.f32.xlu1 %v910_v37  ;;  %v891_v41 = vmul.f32 %v3498_v18, %v3519_v34 }
 0x1fa   :  { %v3526_v42 = vpop.f32.mrb[6].mxu1  ;;  %v889_v47 = vmul.f32 %v3498_v18, %v3522_v39 }
 0x1fb   :  { %v1176_v43 = vpack.c.bf16 %v3526_v42, %v3519_v34  ;;  %v3530_v44 = vpop.f32.mrb[7].mxu1  ;;  %2625 = vmatpush3.bf16.msra.mxu0 %v1174_v25  ;;  %v919_v45 = vsel %vm76_vm0, %v891_v41, 0.0  ;;  %v892_v46 = vmul.f32 %v3498_v18, %v3526_v42 }
 0x1fc   :  { %v1175_v50 = vpack.c.bf16 %v3530_v44, %v3522_v39  ;;  %920 = vadd.xlane.f32.xlu0 %v919_v45  ;;  %v890_v4 = vmul.f32 %v3498_v18, %v3530_v44  ;;  %v913_v25 = vsel %vm76_vm0, %v889_v47, 0.0 }
 0x1fd   :  { %v922_v19 = vsel %vm76_vm0, %v892_v46, 0.0 }
 0x1fe   :  { %2626 = vmatprep.subr.bf16.mxu0 %v1175_v50  ;;  %923 = vadd.xlane.f32.xlu1 %v922_v19  ;;  %v916_v30 = vsel %vm76_vm0, %v890_v4, 0.0 }
 0x1ff   :  { %2627 = vmatpush3.bf16.msra.mxu0 %v1175_v50 }
 0x200   :  { %v3543_v28 = vpop.f32.mrb[8].mxu1  ;;  %2628 = vmatprep.subr.bf16.mxu0 %v1176_v43  ;;  %914 = vadd.xlane.f32.xlu0 %v913_v25 }
 0x201   :  { %v3545_v29 = vpop.f32.mrb[9].mxu1  ;;  %v895_v31 = vmul.f32 %v3498_v18, %v3543_v28 }
 0x202   :  { %4431 = vst [vmem:[#allocation11_spill] sm:$0xff] %v3545_v29  ;;  %v3550_v32 = vpop.f32.mrb[10].mxu1  ;;  %917 = vadd.xlane.f32.xlu1 %v916_v30  ;;  %v893_v46 = vmul.f32 %v3498_v18, %v3545_v29 }
 0x203   :  { %4432 = vst [vmem:[#allocation12_spill] sm:$0xff] %v3550_v32  ;;  %v1178_v33 = vpack.c.bf16 %v3550_v32, %v3543_v28  ;;  %v3554_v37 = vpop.f32.mrb[11].mxu1  ;;  %2629 = vmatpush3.bf16.msra.mxu0 %v1176_v43  ;;  %v931_v41 = vsel %vm76_vm0, %v895_v31, 0.0  ;;  %v896_v45 = vmul.f32 %v3498_v18, %v3550_v32 }
 0x204   :  { %4433 = vst [vmem:[#allocation13_spill] sm:$0xff] %v3554_v37  ;;  %v1177_v47 = vpack.c.bf16 %v3554_v37, %v3545_v29  ;;  %932 = vadd.xlane.f32.xlu0 %v931_v41  ;;  %v894_v19 = vmul.f32 %v3498_v18, %v3554_v37  ;;  %v925_v43 = vsel %vm76_vm0, %v893_v46, 0.0 }
 0x205   :  { %v934_v50 = vsel %vm76_vm0, %v896_v45, 0.0 }
 0x206   :  { %2630 = vmatprep.subr.bf16.mxu0 %v1177_v47  ;;  %935 = vadd.xlane.f32.xlu1 %v934_v50  ;;  %v928_v30 = vsel %vm76_vm0, %v894_v19, 0.0 }
 0x207   :  { %2631 = vmatpush3.bf16.msra.mxu0 %v1177_v47 }
 0x208   :  { %v3567_v4 = vpop.f32.mrb[12].mxu1  ;;  %2632 = vmatprep.subr.bf16.mxu0 %v1178_v33  ;;  %926 = vadd.xlane.f32.xlu0 %v925_v43 }
 0x209   :  { %4434 = vst [vmem:[#allocation14_spill] sm:$0xff] %v3567_v4  ;;  %v3569_v25 = vpop.f32.mrb[13].mxu1  ;;  %v899_v31 = vmul.f32 %v3498_v18, %v3567_v4 }
 0x20a   :  { %4435 = vst [vmem:[#allocation15_spill] sm:$0xff] %v3569_v25  ;;  %v3574_v41 = vpop.f32.mrb[14].mxu1  ;;  %929 = vadd.xlane.f32.xlu1 %v928_v30  ;;  %v897_v19 = vmul.f32 %v3498_v18, %v3569_v25 }
 0x20b   :  { %4436 = vst [vmem:[#allocation16_spill] sm:$0xff] %v3574_v41  ;;  %v1180_v45 = vpack.c.bf16 %v3574_v41, %v3567_v4  ;;  %v3578_v47 = vpop.f32.mrb[15].mxu1  ;;  %2633 = vmatpush3.bf16.msra.mxu0 %v1178_v33  ;;  %v943_v46 = vsel %vm76_vm0, %v899_v31, 0.0  ;;  %v900_v50 = vmul.f32 %v3498_v18, %v3574_v41 }
 0x20c   :  { %4437 = vst [vmem:[#allocation17_spill] sm:$0xff] %v3578_v47  ;;  %v1179_v43 = vpack.c.bf16 %v3578_v47, %v3569_v25  ;;  %944 = vadd.xlane.f32.xlu0 %v943_v46  ;;  %v898_v40 = vmul.f32 %v3498_v18, %v3578_v47  ;;  %v937_v33 = vsel %vm76_vm0, %v897_v19, 0.0  ;;  %v3634_v25 = vld [vmem:[#allocation2] ss:$0 sm:$0xff] }
 0x20d   :  { %v946_v30 = vsel %vm76_vm0, %v900_v50, 0.0 }
 0x20e   :  { %2634 = vmatprep.subr.bf16.mxu0 %v1179_v43  ;;  %947 = vadd.xlane.f32.xlu1 %v946_v30  ;;  %v940_v31 = vsel %vm76_vm0, %v898_v40, 0.0  ;;  %v3130_v40 = vld [vmem:[%s4389_s0] sm:$0xff]  }
 0x20f   :  { %2635 = vmatpush3.bf16.msra.mxu0 %v1179_v43 }
 0x210   :  { %2636 = vmatprep.subr.bf16.mxu0 %v1180_v45  ;;  %938 = vadd.xlane.f32.xlu0 %v937_v33 }
 0x212   :  { %941 = vadd.xlane.f32.xlu1 %v940_v31 }
 0x213   :  { %2637 = vmatpush3.bf16.msra.mxu0 %v1180_v45 }
 0x216   :  { %2639 = vmatmul.mubr.bf16.vlgmr.msra.gmra.mrb[16].mxu0 %v3281_v59 }
 0x217   :  { %2642 = vmatprep.mubr.bf16.mxu0 %v3286_v60 }
 0x21e   :  { %2643 = vmatmul.mubr.bf16.gmra.mrb[20].mxu0 %v3293_v61 }
 0x21f   :  { %2646 = vmatprep.mubr.bf16.mxu0 %v3298_v62 }
 0x225   :  { %v3604_v59 = vpop.permute.xlu1 %680 }
 0x226   :  { %2647 = vmatmul.mubr.bf16.gmra.mrb[24].mxu0 %v3305_v63 }
 0x227   :  { %2650 = vmatprep.mubr.bf16.mxu0 %v3310_v0 }
 0x229   :  { %v3602_v45 = vpop.permute.xlu0 %670 }
 0x22a   :  { %v3608_v61 = vpop.permute.xlu1 %675 }
 0x22d   :  { %v3606_v60 = vpop.permute.xlu0 %685 }
 0x22e   :  { %2651 = vmatmul.mubr.bf16.gmra.mrb[28].mxu0 %v3317_v3  ;;  %v3612_v63 = vpop.permute.xlu1 %700 }
 0x22f   :  { %2702 = vmatprep.mubr.bf16.mxu0 %v3130_v40 }
 0x231   :  { %v3610_v62 = vpop.permute.xlu0 %705 }
 0x233   :  { %v3616_v3 = vpop.permute.xlu1 %690 }
 0x235   :  { %v3614_v0 = vpop.permute.xlu0 %695 }
 0x238   :  { %v3620_v50 = vpop.permute.xlu1 %720 }
 0x239   :  { %v3618_v46 = vpop.permute.xlu0 %725 }
 0x23c   :  { %v3624_v43 = vpop.permute.xlu1 %710 }
 0x23d   :  { %v3622_v19 = vpop.permute.xlu0 %715 }
 0x23e   :  { %4438 = vst [vmem:[#allocation18_spill] sm:$0xff] %v3622_v19 }
 0x240   :  { %v3628_v33 = vpop.permute.xlu1 %740 }
 0x241   :  { %v3626_v30 = vpop.permute.xlu0 %745  ;;  %4440 = vst [vmem:[#allocation20_spill] sm:$0xff] %v3628_v33 }
 0x242   :  { %4439 = vst [vmem:[#allocation19_spill] sm:$0xff] %v3626_v30 }
 0x244   :  { %v3632_v40 = vpop.permute.xlu1 %730 }
 0x245   :  { %4442 = vst [vmem:[#allocation22_spill] sm:$0xff] %v3632_v40 }
 0x247   :  { %v3630_v31 = vpop.permute.xlu0 %735 }
 0x248   :  { %4441 = vst [vmem:[#allocation21_spill] sm:$0xff] %v3630_v31 }
 0x281   :  { %v909_v47 = vpop.xlane.xlu0 %908 }
 0x282   :  { %v951_v41 = vadd.f32 %v3634_v25, %v909_v47  ;;  %v903_v13 = vpop.xlane.xlu1 %902 }
 0x283   :  { %v949_v36 = vadd.f32 %v3634_v25, %v903_v13 }
 0x284   :  { %v2416_v14 = vmul.f32 -1.442695, %v951_v41 }
 0x285   :  { %v2414_v4 = vmul.f32 -1.442695, %v949_v36  ;;  %v906_v37 = vpop.xlane.xlu0 %905 }
 0x286   :  { %2873 = vpow2.f32 %v2416_v14  ;;  %v950_v38 = vadd.f32 %v3634_v25, %v906_v37  ;;  %v912_v30 = vpop.xlane.xlu1 %911 }
 0x287   :  { %2875 = vpow2.f32 %v2414_v4  ;;  %v952_v31 = vadd.f32 %v3634_v25, %v912_v30 }
 0x288   :  { %v2415_v15 = vmul.f32 -1.442695, %v950_v38 }
 0x289   :  { %v2417_v40 = vmul.f32 -1.442695, %v952_v31  ;;  %v921_v29 = vpop.xlane.xlu0 %920 }
 0x28a   :  { %2877 = vpow2.f32 %v2415_v15  ;;  %v955_v35 = vadd.f32 %v3634_v25, %v921_v29 }
 0x28b   :  { %2879 = vpow2.f32 %v2417_v40  ;;  %v924_v47 = vpop.xlane.xlu1 %923 }
 0x28c   :  { %v2420_v33 = vmul.f32 -1.442695, %v955_v35  ;;  %v956_v13 = vadd.f32 %v3634_v25, %v924_v47 }
 0x28d   :  { %v915_v36 = vpop.xlane.xlu0 %914 }
 0x28e   :  { %2881 = vpow2.f32 %v2420_v33  ;;  %v2421_v14 = vmul.f32 -1.442695, %v956_v13  ;;  %v953_v37 = vadd.f32 %v3634_v25, %v915_v36 }
 0x28f   :  { %v918_v41 = vpop.xlane.xlu1 %917 }
 0x290   :  { %v2874_v4 = vpop.eup %2873  ;;  %2883 = vpow2.f32 %v2421_v14  ;;  %v2418_v30 = vmul.f32 -1.442695, %v953_v37  ;;  %v954_v38 = vadd.f32 %v3634_v25, %v918_v41 }
 0x291   :  { %v2876_v31 = vpop.eup %2875  ;;  %v1015_v15 = vadd.f32 1.0, %v2874_v4  ;;  %v933_v16 = vpop.xlane.xlu0 %932 }
 0x292   :  { %v1013_v29 = vadd.f32 1.0, %v2876_v31  ;;  %2885 = vpow2.f32 %v2418_v30  ;;  %v2419_v40 = vmul.f32 -1.442695, %v954_v38  ;;  %v959_v35 = vadd.f32 %v3634_v25, %v933_v16 }
 0x293   :  { %2887 = vrcp.f32 %v1015_v15  ;;  %v936_v47 = vpop.xlane.xlu1 %935 }
 0x294   :  { %v2878_v33 = vpop.eup %2877  ;;  %2889 = vrcp.f32 %v1013_v29  ;;  %v2424_v13 = vmul.f32 -1.442695, %v959_v35  ;;  %v960_v36 = vadd.f32 %v3634_v25, %v936_v47 }
 0x295   :  { %v2880_v32 = vpop.eup %2879  ;;  %v1014_v14 = vadd.f32 1.0, %v2878_v33  ;;  %2891 = vpow2.f32 %v2419_v40  ;;  %v927_v37 = vpop.xlane.xlu0 %926 }
 0x296   :  { %v1016_v41 = vadd.f32 1.0, %v2880_v32  ;;  %2893 = vpow2.f32 %v2424_v13  ;;  %v2425_v4 = vmul.f32 -1.442695, %v960_v36  ;;  %v957_v31 = vadd.f32 %v3634_v25, %v927_v37 }
 0x297   :  { %2895 = vrcp.f32 %v1014_v14  ;;  %v930_v30 = vpop.xlane.xlu1 %929 }
 0x298   :  { %v2882_v38 = vpop.eup %2881  ;;  %2897 = vrcp.f32 %v1016_v41  ;;  %v2422_v16 = vmul.f32 -1.442695, %v957_v31  ;;  %v958_v15 = vadd.f32 %v3634_v25, %v930_v30 }
 0x299   :  { %v1019_v29 = vadd.f32 1.0, %v2882_v38  ;;  %2899 = vpow2.f32 %v2425_v4  ;;  %v945_v35 = vpop.xlane.xlu0 %944 }
 0x29a   :  { %v2884_v47 = vpop.eup %2883  ;;  %2901 = vpow2.f32 %v2422_v16  ;;  %v2423_v33 = vmul.f32 -1.442695, %v958_v15  ;;  %v963_v40 = vadd.f32 %v3634_v25, %v945_v35 }
 0x29b   :  { %2903 = vrcp.f32 %v1019_v29  ;;  %v1020_v32 = vadd.f32 1.0, %v2884_v47  ;;  %v948_v13 = vpop.xlane.xlu1 %947 }
 0x29c   :  { %v2886_v36 = vpop.eup %2885  ;;  %2905 = vpow2.f32 %v2423_v33  ;;  %v2428_v14 = vmul.f32 -1.442695, %v963_v40  ;;  %v964_v37 = vadd.f32 %v3634_v25, %v948_v13 }
 0x29d   :  { %v2888_v41 = vpop.eup %2887  ;;  %2907 = vrcp.f32 %v1020_v32  ;;  %v1017_v31 = vadd.f32 1.0, %v2886_v36  ;;  %v939_v30 = vpop.xlane.xlu0 %938 }
 0x29e   :  { %v2890_v38 = vpop.eup %2889  ;;  %2909 = vpow2.f32 %v2428_v14  ;;  %v2429_v4 = vmul.f32 -1.442695, %v964_v37  ;;  %v961_v16 = vadd.f32 %v3634_v25, %v939_v30  ;;  %1073 = vperm.xlu1 %2736, %v2888_v41  }
 0x29f   :  { %v2892_v15 = vpop.eup %2891  ;;  %2911 = vrcp.f32 %v1017_v31  ;;  %1063 = vperm.xlu0 %2735, %v2890_v38   ;;  %v942_v29 = vpop.xlane.xlu1 %941 }
 0x2a0   :  { %v2894_v35 = vpop.eup %2893  ;;  %v1018_v47 = vadd.f32 1.0, %v2892_v15  ;;  %2913 = vpow2.f32 %v2429_v4  ;;  %v2426_v33 = vmul.f32 -1.442695, %v961_v16  ;;  %v962_v40 = vadd.f32 %v3634_v25, %v942_v29 }
 0x2a1   :  { %v2896_v13 = vpop.eup %2895  ;;  %v1023_v32 = vadd.f32 1.0, %v2894_v35 }
 0x2a2   :  { %v2898_v36 = vpop.eup %2897  ;;  %2915 = vrcp.f32 %v1018_v47  ;;  %v2427_v19 = vmul.f32 -1.442695, %v962_v40  ;;  %1068 = vperm.xlu1 %2736, %v2896_v13  }
 0x2a3   :  { %v2900_v14 = vpop.eup %2899  ;;  %2917 = vrcp.f32 %v1023_v32  ;;  %1078 = vperm.xlu0 %2735, %v2898_v36  }
 0x2a4   :  { %v2902_v37 = vpop.eup %2901  ;;  %v1024_v41 = vadd.f32 1.0, %v2900_v14  ;;  %2919 = vpow2.f32 %v2426_v33 }
 0x2a5   :  { %v2904_v31 = vpop.eup %2903  ;;  %v1021_v30 = vadd.f32 1.0, %v2902_v37  ;;  %2921 = vpow2.f32 %v2427_v19 }
 0x2a6   :  { %v2906_v38 = vpop.eup %2905  ;;  %2923 = vrcp.f32 %v1024_v41  ;;  %1093 = vperm.xlu1 %2736, %v2904_v31  }
 0x2a7   :  { %v2908_v4 = vpop.eup %2907  ;;  %2925 = vrcp.f32 %v1021_v30  ;;  %v1022_v16 = vadd.f32 1.0, %v2906_v38 }
 0x2a8   :  { %v2910_v15 = vpop.eup %2909  ;;  %1098 = vperm.xlu0 %2735, %v2908_v4  }
 0x2a9   :  { %v2912_v29 = vpop.eup %2911  ;;  %2927 = vrcp.f32 %v1022_v16  ;;  %v1027_v35 = vadd.f32 1.0, %v2910_v15 }
 0x2aa   :  { %v2914_v47 = vpop.eup %2913  ;;  %1083 = vperm.xlu1 %2736, %v2912_v29  }
 0x2ab   :  { %2929 = vrcp.f32 %v1027_v35  ;;  %v1028_v40 = vadd.f32 1.0, %v2914_v47 }
 0x2ac   :  { %v2916_v13 = vpop.eup %2915 }
 0x2ad   :  { %v2918_v33 = vpop.eup %2917  ;;  %2931 = vrcp.f32 %v1028_v40  ;;  %1088 = vperm.xlu0 %2735, %v2916_v13  }
 0x2ae   :  { %v2920_v19 = vpop.eup %2919  ;;  %1113 = vperm.xlu1 %2736, %v2918_v33  }
 0x2af   :  { %v2922_v32 = vpop.eup %2921  ;;  %v1025_v36 = vadd.f32 1.0, %v2920_v19 }
 0x2b0   :  { %v2924_v14 = vpop.eup %2923  ;;  %v1026_v37 = vadd.f32 1.0, %v2922_v32 }
 0x2b1   :  { %v2926_v41 = vpop.eup %2925  ;;  %2933 = vrcp.f32 %v1025_v36  ;;  %1118 = vperm.xlu0 %2735, %v2924_v14  }
 0x2b2   :  { %2935 = vrcp.f32 %v1026_v37  ;;  %1103 = vperm.xlu1 %2736, %v2926_v41  }
 0x2b3   :  { %v2928_v31 = vpop.eup %2927 }
 0x2b5   :  { %v2930_v30 = vpop.eup %2929  ;;  %1108 = vperm.xlu0 %2735, %v2928_v31  }
 0x2b6   :  { %1133 = vperm.xlu1 %2736, %v2930_v30  }
 0x2b7   :  { %v2932_v38 = vpop.eup %2931 }
 0x2b9   :  { %1138 = vperm.xlu0 %2735, %v2932_v38  }
 0x2bb   :  { %v2934_v4 = vpop.eup %2933 }
 0x2bc   :  { %v2936_v16 = vpop.eup %2935  ;;  %1123 = vperm.xlu1 %2736, %v2934_v4  }
 0x2bd   :  { %1128 = vperm.xlu0 %2735, %v2936_v16  }
 0x2e9   :  { %v3652_v15 = vpop.f32.mrb[16].mxu0 }
 0x2ea   :  { %v3654_v29 = vpop.f32.mrb[17].mxu0  ;;  %v1280_v35 = vmul.f32 %v3498_v18, %v3652_v15 }
 0x2eb   :  { %v1278_v47 = vmul.f32 %v3498_v18, %v3654_v29  ;;  %v3660_v40 = vpop.f32.mrb[18].mxu0 }
 0x2ec   :  { %v1567_v13 = vpack.c.bf16 %v3660_v40, %v3652_v15  ;;  %v3664_v33 = vpop.f32.mrb[19].mxu0  ;;  %v1300_v19 = vsel %vm76_vm0, %v1280_v35, 0.0  ;;  %v1281_v32 = vmul.f32 %v3498_v18, %v3660_v40 }
 0x2ed   :  { %v1566_v36 = vpack.c.bf16 %v3664_v33, %v3654_v29  ;;  %1301 = vadd.xlane.f32.xlu0 %v1300_v19  ;;  %v1294_v14 = vsel %vm76_vm0, %v1278_v47, 0.0  ;;  %v1279_v37 = vmul.f32 %v3498_v18, %v3664_v33 }
 0x2ee   :  { %1295 = vadd.xlane.f32.xlu1 %v1294_v14  ;;  %v1303_v30 = vsel %vm76_vm0, %v1281_v32, 0.0 }
 0x2ef   :  { %2654 = vmatprep.subr.bf16.mxu1 %v1566_v36  ;;  %v1297_v41 = vsel %vm76_vm0, %v1279_v37, 0.0 }
 0x2f0   :  { %2655 = vmatpush3.bf16.msra.mxu1 %v1566_v36 }
 0x2f1   :  { %v3675_v31 = vpop.f32.mrb[20].mxu0  ;;  %2656 = vmatprep.subr.bf16.mxu1 %v1567_v13  ;;  %1298 = vadd.xlane.f32.xlu0 %v1297_v41 }
 0x2f2   :  { %4443 = vst [vmem:[#allocation23_spill] sm:$0xff] %v3675_v31  ;;  %v3678_v38 = vpop.f32.mrb[21].mxu0  ;;  %1304 = vadd.xlane.f32.xlu1 %v1303_v30  ;;  %v1284_v4 = vmul.f32 %v3498_v18, %v3675_v31 }
 0x2f3   :  { %4444 = vst [vmem:[#allocation24_spill] sm:$0xff] %v3678_v38  ;;  %v3682_v16 = vpop.f32.mrb[22].mxu0  ;;  %v1282_v32 = vmul.f32 %v3498_v18, %v3678_v38 }
 0x2f4   :  { %4445 = vst [vmem:[#allocation25_spill] sm:$0xff] %v3682_v16  ;;  %v1285_v35 = vmul.f32 %v3498_v18, %v3682_v16  ;;  %v1569_v47 = vpack.c.bf16 %v3682_v16, %v3675_v31  ;;  %v3688_v19 = vpop.f32.mrb[23].mxu0  ;;  %2657 = vmatpush3.bf16.msra.mxu1 %v1567_v13  ;;  %v1312_v36 = vsel %vm76_vm0, %v1284_v4, 0.0 }
 0x2f5   :  { %4446 = vst [vmem:[#allocation26_spill] sm:$0xff] %v3688_v19  ;;  %v1568_v14 = vpack.c.bf16 %v3688_v19, %v3678_v38  ;;  %1313 = vadd.xlane.f32.xlu0 %v1312_v36  ;;  %v1283_v37 = vmul.f32 %v3498_v18, %v3688_v19  ;;  %v1306_v30 = vsel %vm76_vm0, %v1282_v32, 0.0 }
 0x2f6   :  { %v1315_v41 = vsel %vm76_vm0, %v1285_v35, 0.0 }
 0x2f7   :  { %2658 = vmatprep.subr.bf16.mxu1 %v1568_v14  ;;  %1316 = vadd.xlane.f32.xlu1 %v1315_v41  ;;  %v1309_v36 = vsel %vm76_vm0, %v1283_v37, 0.0 }
 0x2f8   :  { %2659 = vmatpush3.bf16.msra.mxu1 %v1568_v14 }
 0x2f9   :  { %v3699_v13 = vpop.f32.mrb[24].mxu0  ;;  %2660 = vmatprep.subr.bf16.mxu1 %v1569_v47  ;;  %1307 = vadd.xlane.f32.xlu0 %v1306_v30 }
 0x2fa   :  { %4447 = vst [vmem:[#allocation27_spill] sm:$0xff] %v3699_v13  ;;  %v1288_v4 = vmul.f32 %v3498_v18, %v3699_v13  ;;  %v3703_v16 = vpop.f32.mrb[25].mxu0 }
 0x2fb   :  { %4448 = vst [vmem:[#allocation28_spill] sm:$0xff] %v3703_v16  ;;  %v3706_v38 = vpop.f32.mrb[26].mxu0  ;;  %1310 = vadd.xlane.f32.xlu1 %v1309_v36  ;;  %v1286_v35 = vmul.f32 %v3498_v18, %v3703_v16 }
 0x2fc   :  { %4449 = vst [vmem:[#allocation29_spill] sm:$0xff] %v3706_v38  ;;  %v1289_v32 = vmul.f32 %v3498_v18, %v3706_v38  ;;  %v1571_v14 = vpack.c.bf16 %v3706_v38, %v3699_v13  ;;  %v3714_v41 = vpop.f32.mrb[27].mxu0  ;;  %2661 = vmatpush3.bf16.msra.mxu1 %v1569_v47  ;;  %v1324_v30 = vsel %vm76_vm0, %v1288_v4, 0.0 }
 0x2fd   :  { %4450 = vst [vmem:[#allocation30_spill] sm:$0xff] %v3714_v41  ;;  %v1570_v37 = vpack.c.bf16 %v3714_v41, %v3703_v16  ;;  %1325 = vadd.xlane.f32.xlu0 %v1324_v30  ;;  %v1287_v36 = vmul.f32 %v3498_v18, %v3714_v41  ;;  %v1318_v31 = vsel %vm76_vm0, %v1286_v35, 0.0 }
 0x2fe   :  { %v1327_v19 = vsel %vm76_vm0, %v1289_v32, 0.0 }
 0x2ff   :  { %2662 = vmatprep.subr.bf16.mxu1 %v1570_v37  ;;  %1328 = vadd.xlane.f32.xlu1 %v1327_v19  ;;  %v1321_v30 = vsel %vm76_vm0, %v1287_v36, 0.0 }
 0x300   :  { %2663 = vmatpush3.bf16.msra.mxu1 %v1570_v37 }
 0x301   :  { %v3723_v38 = vpop.f32.mrb[28].mxu0  ;;  %2664 = vmatprep.subr.bf16.mxu1 %v1571_v14  ;;  %1319 = vadd.xlane.f32.xlu0 %v1318_v31 }
 0x302   :  { %4451 = vst [vmem:[#allocation31_spill] sm:$0xff] %v3723_v38  ;;  %v1292_v47 = vmul.f32 %v3498_v18, %v3723_v38  ;;  %v3727_v4 = vpop.f32.mrb[29].mxu0 }
 0x303   :  { %v3730_v16 = vpop.f32.mrb[30].mxu0  ;;  %1322 = vadd.xlane.f32.xlu1 %v1321_v30  ;;  %v1290_v19 = vmul.f32 %v3498_v18, %v3727_v4 }
 0x304   :  { %4452 = vst [vmem:[#allocation32_spill] sm:$0xff] %v3730_v16  ;;  %v1293_v35 = vmul.f32 %v3498_v18, %v3730_v16  ;;  %v1573_v32 = vpack.c.bf16 %v3730_v16, %v3723_v38  ;;  %v3738_v31 = vpop.f32.mrb[31].mxu0  ;;  %2665 = vmatpush3.bf16.msra.mxu1 %v1571_v14  ;;  %v1336_v37 = vsel %vm76_vm0, %v1292_v47, 0.0  ;;  %v3751_v47 = vld [vmem:[%s4389_s0 + $0x8] sm:$0xff]  }
 0x305   :  { %4453 = vst [vmem:[#allocation33_spill] sm:$0xff] %v3738_v31  ;;  %v1572_v36 = vpack.c.bf16 %v3738_v31, %v3727_v4  ;;  %1337 = vadd.xlane.f32.xlu0 %v1336_v37  ;;  %v1291_v30 = vmul.f32 %v3498_v18, %v3738_v31  ;;  %v1330_v13 = vsel %vm76_vm0, %v1290_v19, 0.0  ;;  %v3757_v18 = vld [vmem:[%s4389_s0 + $0x10] sm:$0xff]   ;;  %v3137_v37 = vld [vmem:[%s4386_s1] sm:$0xff]  ;;  %v3138_v16 = vld [vmem:[%s4386_s1 + $0x8] sm:$0xff] }
 0x306   :  { %v1339_v41 = vsel %vm76_vm0, %v1293_v35, 0.0  ;;  %v3136_v19 = vld [vmem:[%s4386_s1 + $0x10] sm:$0xff]  ;;  %v324_v31 = vmul.f32 %v3138_v16, %v3443_v2  ;;  %v3798_v2 = vld [vmem:[%s4389_s0 + $0x28] sm:$0xff]   ;;  %v754_v16 = vmul.f32 %v3362_v6, %v3612_v63 }
 0x307   :  { %2666 = vmatprep.subr.bf16.mxu1 %v1572_v36  ;;  %1340 = vadd.xlane.f32.xlu1 %v1339_v41  ;;  %v1333_v14 = vsel %vm76_vm0, %v1291_v30, 0.0  ;;  %v3135_v41 = vld [vmem:[%s4389_s0 + $0x20] sm:$0xff]   ;;  %v325_v35 = vmul.f32 %v3136_v19, %v3445_v54  ;;  %v748_v30 = vmul.f32 %v3602_v45, %v3341_v49 }
 0x308   :  { %2667 = vmatpush3.bf16.msra.mxu1 %v1572_v36  ;;  %v323_v36 = vmul.f32 %v3137_v37, %v3455_v1  ;;  %v3139_v1 = vld [vmem:[%s4386_s1 + $0x18] sm:$0xff]  ;;  %v751_v37 = vmul.f32 %v3345_v51, %v3606_v60 }
 0x309   :  { %2668 = vmatprep.subr.bf16.mxu1 %v1573_v32  ;;  %1331 = vadd.xlane.f32.xlu0 %v1330_v13  ;;  %v3763_v13 = vld [vmem:[%s4389_s0 + $0x18] sm:$0xff]   ;;  %v326_v49 = vmul.f32 %v3139_v1, %v3447_v55 }
 0x30a   :  { %v764_v45 = vadd.f32 %v748_v30, %v323_v36 }
 0x30b   :  { %1334 = vadd.xlane.f32.xlu1 %v1333_v14  ;;  %v767_v36 = vadd.f32 %v751_v37, %v326_v49  ;;  %v753_v49 = vmul.f32 %v3614_v0, %v3372_v11  ;;  %v759_v11 = vmul.f32 %v3392_v24, %v3618_v46 }
 0x30c   :  { %2669 = vmatpush3.bf16.msra.mxu1 %v1573_v32  ;;  %v750_v32 = vmul.f32 %v3339_v48, %v3604_v59  ;;  %v749_v48 = vmul.f32 %v3608_v61, %v3349_v53 }
 0x30e   :  { %v766_v54 = vadd.f32 %v750_v32, %v325_v35  ;;  %v765_v61 = vadd.f32 %v749_v48, %v324_v31  ;;  %v752_v48 = vmul.f32 %v3616_v3, %v3364_v7  ;;  %v3146_v7 = vld [vmem:[%s4386_s1 + $0x28] sm:$0xff] }
 0x30f   :  { %2671 = vmatmul.mubr.bf16.vlgmr.msra.gmra.mrb[16].mxu1 %v3751_v47 }
 0x310   :  { %2674 = vmatprep.mubr.bf16.mxu1 %v3757_v18 }
 0x317   :  { %2675 = vmatmul.mubr.bf16.gmra.mrb[20].mxu1 %v3763_v13 }
 0x318   :  { %2678 = vmatprep.mubr.bf16.mxu1 %v3135_v41 }
 0x31d   :  { %v1074_v14 = vpop.permute.xlu1 %1073 }
 0x31e   :  { %v1143_v59 = vmul.f32 %v3491_v52, %v1074_v14  ;;  %v1064_v19 = vpop.permute.xlu0 %1063  ;;  %v3806_v52 = vld [vmem:[%s4389_s0 + $0x30] sm:$0xff]  }
 0x31f   :  { %v1141_v38 = vmul.f32 %v1064_v19, %v3493_v17  ;;  %2679 = vmatmul.mubr.bf16.gmra.mrb[24].mxu1 %v3798_v2  ;;  %v3142_v17 = vld [vmem:[%s4386_s1 + $0x30] sm:$0xff] }
 0x320   :  { %v3801_v53 = vadd.f32 %v1143_v59, %v766_v54  ;;  %2682 = vmatprep.mubr.bf16.mxu1 %v3806_v52  ;;  %v329_v60 = vmul.f32 %v3142_v17, %v3453_v58  ;;  %v755_v54 = vmul.f32 %v3368_v9, %v3610_v62  ;;  %v3839_v9 = vld [vmem:[%s4389_s0 + $0x38] sm:$0xff]  }
 0x321   :  { %v3809_v55 = vadd.f32 %v1141_v38, %v764_v45  ;;  %v1069_v51 = vpop.permute.xlu1 %1068  ;;  %v3143_v38 = vld [vmem:[%s4386_s1 + $0x38] sm:$0xff] }
 0x322   :  { %v1142_v35 = vmul.f32 %v1069_v51, %v3508_v27  ;;  %v1079_v32 = vpop.permute.xlu0 %1078  ;;  %v330_v14 = vmul.f32 %v3143_v38, %v3457_v5  ;;  %v3144_v27 = vld [vmem:[%s4386_s1 + $0x20] sm:$0xff]  ;;  %v770_v63 = vadd.f32 %v754_v16, %v329_v60  ;;  %v3148_v60 = vld [vmem:[%s4386_s1 + $0x58] sm:$0xff] }
 0x323   :  { %v1144_v30 = vmul.f32 %v3502_v22, %v1079_v32  ;;  %v327_v22 = vmul.f32 %v3144_v27, %v3449_v56  ;;  %v328_v56 = vmul.f32 %v3146_v7, %v3451_v57  ;;  %v4460_v7 = vld [vmem:[#allocation9_spill] sm:$0xff] }
 0x324   :  { %v3825_v58 = vadd.f32 %v1142_v35, %v765_v61  ;;  %v771_v59 = vadd.f32 %v755_v54, %v330_v14  ;;  %v756_v35 = vmul.f32 %v3624_v43, %v3388_v21  ;;  %v4455_v14 = vld [vmem:[#allocation12_spill] sm:$0xff]  ;;  %v4456_v43 = vld [vmem:[#allocation10_spill] sm:$0xff] }
 0x325   :  { %v3827_v31 = vadd.f32 %v1144_v30, %v767_v36  ;;  %v1094_v6 = vpop.permute.xlu1 %1093  ;;  %v768_v37 = vadd.f32 %v752_v48, %v327_v22  ;;  %v769_v61 = vadd.f32 %v753_v49, %v328_v56  ;;  %v4457_v22 = vld [vmem:[#allocation20_spill] sm:$0xff]  ;;  %v4462_v49 = vld [vmem:[#allocation5_spill] sm:$0xff] }
 0x326   :  { %v1147_v5 = vmul.f32 %v3519_v34, %v1094_v6  ;;  %v3147_v34 = vld [vmem:[%s4386_s1 + $0x50] sm:$0xff] }
 0x327   :  { %2683 = vmatmul.mubr.bf16.gmra.mrb[28].mxu1 %v3839_v9  ;;  %v1099_v62 = vpop.permute.xlu0 %1098  ;;  %v333_v3 = vmul.f32 %v3147_v34, %v3465_v12  ;;  %v334_v12 = vmul.f32 %v3148_v60, %v3463_v23  ;;  %v4464_v60 = vld [vmem:[#allocation14_spill] sm:$0xff] }
 0x328   :  { %v3842_v19 = vadd.f32 %v1147_v5, %v770_v63  ;;  %v1148_v1 = vmul.f32 %v3526_v42, %v1099_v62  ;;  %2710 = vmatprep.mubr.bf16.mxu1 %v3135_v41  ;;  %v758_v42 = vmul.f32 %v3386_v20, %v3620_v50  ;;  %v4458_v63 = vld [vmem:[#allocation3_spill] sm:$0xff] }
 0x329   :  { %v1084_v45 = vpop.permute.xlu1 %1083  ;;  %v775_v30 = vadd.f32 %v759_v11, %v334_v12  ;;  %v762_v48 = vmul.f32 %v4458_v63, %v4457_v22  ;;  %v4459_v5 = vld [vmem:[#allocation11_spill] sm:$0xff]  ;;  %v3153_v11 = vld [vmem:[%s4386_s1 + $0x60] sm:$0xff] }
 0x32a   :  { %v3857_v41 = vadd.f32 %v1148_v1, %v771_v59  ;;  %v1145_v51 = vmul.f32 %v1084_v45, %v3522_v39  ;;  %v3149_v39 = vld [vmem:[%s4386_s1 + $0x40] sm:$0xff]  ;;  %v774_v16 = vadd.f32 %v758_v42, %v333_v3  ;;  %v3152_v1 = vld [vmem:[%s4386_s1 + $0x78] sm:$0xff] }
 0x32b   :  { %v331_v50 = vmul.f32 %v3149_v39, %v3461_v10  ;;  %v4454_v10 = vld [vmem:[#allocation18_spill] sm:$0xff]  ;;  %v338_v56 = vmul.f32 %v3152_v1, %v4460_v7  ;;  %v4461_v3 = vld [vmem:[#allocation19_spill] sm:$0xff]  ;;  %v4466_v39 = vld [vmem:[#allocation4_spill] sm:$0xff] }
 0x32c   :  { %v3860_v17 = vadd.f32 %v1145_v51, %v768_v37  ;;  %v1089_v57 = vpop.permute.xlu0 %1088  ;;  %v757_v38 = vmul.f32 %v4454_v10, %v3396_v26  ;;  %v763_v45 = vmul.f32 %v4462_v49, %v4461_v3  ;;  %v4463_v37 = vld [vmem:[#allocation13_spill] sm:$0xff]  ;;  %v4469_v10 = vld [vmem:[#allocation6_spill] sm:$0xff] }
 0x32d   :  { %v1146_v0 = vmul.f32 %v1089_v57, %v3530_v44  ;;  %v1114_v20 = vpop.permute.xlu1 %1113  ;;  %v3150_v44 = vld [vmem:[%s4386_s1 + $0x48] sm:$0xff]  ;;  %v772_v27 = vadd.f32 %v756_v35, %v331_v50 }
 0x32e   :  { %v1151_v32 = vmul.f32 %v3543_v28, %v1114_v20  ;;  %v332_v46 = vmul.f32 %v3150_v44, %v3459_v8  ;;  %v3151_v28 = vld [vmem:[%s4386_s1 + $0x70] sm:$0xff] }
 0x32f   :  { %v3876_v23 = vadd.f32 %v1146_v0, %v769_v61  ;;  %v337_v6 = vmul.f32 %v3151_v28, %v4456_v43  ;;  %v4465_v0 = vld [vmem:[#allocation8_spill] sm:$0xff]  ;;  %v4467_v50 = vld [vmem:[#allocation22_spill] sm:$0xff]  ;;  %v4468_v44 = vld [vmem:[#allocation7_spill] sm:$0xff] }
 0x330   :  { %v3878_v36 = vadd.f32 %v1151_v32, %v774_v16  ;;  %v1119_v24 = vpop.permute.xlu0 %1118  ;;  %v773_v34 = vadd.f32 %v757_v38, %v332_v46  ;;  %v335_v20 = vmul.f32 %v3153_v11, %v4465_v0  ;;  %v760_v16 = vmul.f32 %v4467_v50, %v4466_v39  ;;  %v4470_v38 = vld [vmem:[#allocation21_spill] sm:$0xff] }
 0x331   :  { %v1152_v54 = vmul.f32 %v4455_v14, %v1119_v24  ;;  %v1104_v21 = vpop.permute.xlu1 %1103  ;;  %v778_v57 = vadd.f32 %v762_v48, %v337_v6  ;;  %v3154_v24 = vld [vmem:[%s4386_s1 + $0x68] sm:$0xff]  ;;  %v761_v14 = vmul.f32 %v4470_v38, %v4469_v10 }
 0x332   :  { %v1149_v62 = vmul.f32 %v1104_v21, %v4459_v5  ;;  %v336_v46 = vmul.f32 %v3154_v24, %v4468_v44  ;;  %v776_v6 = vadd.f32 %v760_v16, %v335_v20  ;;  %v4473_v5 = vld [vmem:[#allocation17_spill] sm:$0xff] }
 0x333   :  { %v3894_v8 = vadd.f32 %v1152_v54, %v775_v30  ;;  %v779_v30 = vadd.f32 %v763_v45, %v338_v56  ;;  %v4471_v54 = vld [vmem:[#allocation16_spill] sm:$0xff] }
 0x334   :  { %v3896_v59 = vadd.f32 %v1149_v62, %v772_v27  ;;  %v1109_v26 = vpop.permute.xlu0 %1108  ;;  %v4472_v27 = vld [vmem:[#allocation15_spill] sm:$0xff]  ;;  %v777_v48 = vadd.f32 %v761_v14, %v336_v46 }
 0x335   :  { %v1150_v42 = vmul.f32 %v1109_v26, %v4463_v37  ;;  %v1134_v51 = vpop.permute.xlu1 %1133 }
 0x336   :  { %v1155_v12 = vmul.f32 %v4464_v60, %v1134_v51 }
 0x337   :  { %v3906_v61 = vadd.f32 %v1150_v42, %v773_v34 }
 0x338   :  { %v3914_v35 = vadd.f32 %v1155_v12, %v778_v57  ;;  %v1139_v32 = vpop.permute.xlu0 %1138 }
 0x339   :  { %v1156_v21 = vmul.f32 %v4471_v54, %v1139_v32 }
 0x33b   :  { %v3923_v28 = vadd.f32 %v1156_v21, %v779_v30  ;;  %v1124_v43 = vpop.permute.xlu1 %1123 }
 0x33c   :  { %v1153_v22 = vmul.f32 %v1124_v43, %v4472_v27  ;;  %v1129_v63 = vpop.permute.xlu0 %1128 }
 0x33d   :  { %v1154_v62 = vmul.f32 %v1129_v63, %v4473_v5 }
 0x33e   :  { %v3927_v26 = vadd.f32 %v1153_v22, %v776_v6 }
 0x33f   :  { %v3929_v1 = vadd.f32 %v1154_v62, %v777_v48 }
 0x37a   :  { %v1302_v7 = vpop.xlane.xlu0 %1301 }
 0x37b   :  { %v1344_v56 = vadd.f32 %v3634_v25, %v1302_v7  ;;  %v1296_v34 = vpop.xlane.xlu1 %1295 }
 0x37c   :  { %v1342_v3 = vadd.f32 %v3634_v25, %v1296_v34 }
 0x37d   :  { %v2432_v49 = vmul.f32 -1.442695, %v1344_v56 }
 0x37e   :  { %v2430_v45 = vmul.f32 -1.442695, %v1342_v3  ;;  %v1299_v37 = vpop.xlane.xlu0 %1298 }
 0x37f   :  { %2937 = vpow2.f32 %v2432_v49  ;;  %v1343_v42 = vadd.f32 %v3634_v25, %v1299_v37  ;;  %v1305_v51 = vpop.xlane.xlu1 %1304 }
 0x380   :  { %2939 = vpow2.f32 %v2430_v45  ;;  %v1345_v57 = vadd.f32 %v3634_v25, %v1305_v51 }
 0x381   :  { %v2431_v60 = vmul.f32 -1.442695, %v1343_v42 }
 0x382   :  { %v2433_v12 = vmul.f32 -1.442695, %v1345_v57  ;;  %v1314_v11 = vpop.xlane.xlu0 %1313 }
 0x383   :  { %2941 = vpow2.f32 %v2431_v60  ;;  %v1348_v0 = vadd.f32 %v3634_v25, %v1314_v11 }
 0x384   :  { %2943 = vpow2.f32 %v2433_v12  ;;  %v1317_v20 = vpop.xlane.xlu1 %1316 }
 0x385   :  { %v2436_v39 = vmul.f32 -1.442695, %v1348_v0  ;;  %v1349_v50 = vadd.f32 %v3634_v25, %v1317_v20 }
 0x386   :  { %v1308_v16 = vpop.xlane.xlu0 %1307 }
 0x387   :  { %2945 = vpow2.f32 %v2436_v39  ;;  %v2437_v32 = vmul.f32 -1.442695, %v1349_v50  ;;  %v1346_v24 = vadd.f32 %v3634_v25, %v1308_v16 }
 0x388   :  { %v1311_v44 = vpop.xlane.xlu1 %1310 }
 0x389   :  { %v2938_v46 = vpop.eup %2937  ;;  %2947 = vpow2.f32 %v2437_v32  ;;  %v2434_v30 = vmul.f32 -1.442695, %v1346_v24  ;;  %v1347_v10 = vadd.f32 %v3634_v25, %v1311_v44 }
 0x38a   :  { %v2940_v38 = vpop.eup %2939  ;;  %v1408_v14 = vadd.f32 1.0, %v2938_v46  ;;  %v1326_v54 = vpop.xlane.xlu0 %1325 }
 0x38b   :  { %v1406_v21 = vadd.f32 1.0, %v2940_v38  ;;  %2949 = vpow2.f32 %v2434_v30  ;;  %v2435_v43 = vmul.f32 -1.442695, %v1347_v10  ;;  %v1352_v6 = vadd.f32 %v3634_v25, %v1326_v54 }
 0x38c   :  { %2951 = vrcp.f32 %v1408_v14  ;;  %v3940_v27 = vpop.xlane.xlu1 %1328 }
 0x38d   :  { %v2942_v22 = vpop.eup %2941  ;;  %2953 = vrcp.f32 %v1406_v21  ;;  %v2440_v63 = vmul.f32 -1.442695, %v1352_v6 }
 0x38e   :  { %v2944_v48 = vpop.eup %2943  ;;  %v1407_v5 = vadd.f32 1.0, %v2942_v22  ;;  %2955 = vpow2.f32 %v2435_v43  ;;  %v1320_v62 = vpop.xlane.xlu0 %1319 }
 0x38f   :  { %v1409_v7 = vadd.f32 1.0, %v2944_v48  ;;  %2957 = vpow2.f32 %v2440_v63  ;;  %v1350_v56 = vadd.f32 %v3634_v25, %v1320_v62 }
 0x390   :  { %2959 = vrcp.f32 %v1407_v5  ;;  %v1323_v34 = vpop.xlane.xlu1 %1322 }
 0x391   :  { %v2946_v3 = vpop.eup %2945  ;;  %2961 = vrcp.f32 %v1409_v7  ;;  %v2438_v49 = vmul.f32 -1.442695, %v1350_v56  ;;  %v1351_v45 = vadd.f32 %v3634_v25, %v1323_v34 }
 0x392   :  { %v1412_v37 = vadd.f32 1.0, %v2946_v3  ;;  %v3944_v42 = vpop.xlane.xlu0 %1337  ;;  %v3952_v3 = vld [vmem:[%s4387_s2] ss:$0 sm:$0xff] }
 0x393   :  { %v2948_v51 = vpop.eup %2947  ;;  %2963 = vpow2.f32 %v2438_v49  ;;  %v2439_v57 = vmul.f32 -1.442695, %v1351_v45 }
 0x394   :  { %2965 = vrcp.f32 %v1412_v37  ;;  %v1413_v60 = vadd.f32 1.0, %v2948_v51 }
 0x395   :  { %v2950_v12 = vpop.eup %2949  ;;  %2967 = vpow2.f32 %v2439_v57 }
 0x396   :  { %v2952_v11 = vpop.eup %2951  ;;  %2969 = vrcp.f32 %v1413_v60  ;;  %v1410_v0 = vadd.f32 1.0, %v2950_v12  ;;  %v1332_v20 = vpop.xlane.xlu0 %1331 }
 0x397   :  { %v2954_v39 = vpop.eup %2953  ;;  %v1354_v50 = vadd.f32 %v3634_v25, %v1332_v20  ;;  %1466 = vperm.xlu1 %2736, %v2952_v11  }
 0x398   :  { %v2956_v16 = vpop.eup %2955  ;;  %2971 = vrcp.f32 %v1410_v0  ;;  %1456 = vperm.xlu0 %2735, %v2954_v39  }
 0x399   :  { %v2958_v32 = vpop.eup %2957  ;;  %v1411_v24 = vadd.f32 1.0, %v2956_v16  ;;  %v2442_v44 = vmul.f32 -1.442695, %v1354_v50 }
 0x39a   :  { %v2960_v46 = vpop.eup %2959  ;;  %v1416_v30 = vadd.f32 1.0, %v2958_v32 }
 0x39b   :  { %v2962_v10 = vpop.eup %2961  ;;  %2973 = vrcp.f32 %v1411_v24  ;;  %1461 = vperm.xlu1 %2736, %v2960_v46  }
 0x39c   :  { %2975 = vrcp.f32 %v1416_v30  ;;  %1471 = vperm.xlu0 %2735, %v2962_v10  }
 0x39d   :  { %v2964_v38 = vpop.eup %2963  ;;  %2977 = vpow2.f32 %v2442_v44 }
 0x39e   :  { %v2966_v14 = vpop.eup %2965  ;;  %v1414_v54 = vadd.f32 1.0, %v2964_v38 }
 0x39f   :  { %v2968_v21 = vpop.eup %2967  ;;  %1486 = vperm.xlu1 %2736, %v2966_v14  }
 0x3a0   :  { %v2970_v25 = vpop.eup %2969  ;;  %2979 = vrcp.f32 %v1414_v54  ;;  %v1415_v43 = vadd.f32 1.0, %v2968_v21 }
 0x3a1   :  { %1491 = vperm.xlu0 %2735, %v2970_v25  }
 0x3a2   :  { %v2972_v6 = vpop.eup %2971  ;;  %2981 = vrcp.f32 %v1415_v43 }
 0x3a3   :  { %1476 = vperm.xlu1 %2736, %v2972_v6  }
 0x3a5   :  { %v2974_v22 = vpop.eup %2973 }
 0x3a6   :  { %v2976_v63 = vpop.eup %2975  ;;  %1481 = vperm.xlu0 %2735, %v2974_v22  }
 0x3a7   :  { %v2978_v48 = vpop.eup %2977  ;;  %1506 = vperm.xlu1 %2736, %v2976_v63  }
 0x3a8   :  { %v1418_v5 = vadd.f32 1.0, %v2978_v48 }
 0x3aa   :  { %v2980_v62 = vpop.eup %2979  ;;  %2983 = vrcp.f32 %v1418_v5 }
 0x3ab   :  { %1496 = vperm.xlu1 %2736, %v2980_v62  }
 0x3ac   :  { %v2982_v7 = vpop.eup %2981 }
 0x3ad   :  { %1501 = vperm.xlu0 %2735, %v2982_v7  }
 0x3b4   :  { %v2984_v56 = vpop.eup %2983 }
 0x3b5   :  { %1516 = vperm.xlu1 %2736, %v2984_v56  }
 0x3e2   :  { %v3947_v34 = vpop.f32.mrb[16].mxu1 }
 0x3e3   :  { %v1673_v49 = vmul.f32 %v3952_v3, %v3947_v34  ;;  %v3956_v45 = vpop.f32.mrb[17].mxu1 }
 0x3e4   :  { %v1671_v37 = vmul.f32 %v3952_v3, %v3956_v45  ;;  %v3960_v51 = vpop.f32.mrb[18].mxu1 }
 0x3e5   :  { %v1960_v57 = vpack.c.bf16 %v3960_v51, %v3947_v34  ;;  %v3964_v60 = vpop.f32.mrb[19].mxu1  ;;  %v1693_v12 = vsel %vm76_vm0, %v1673_v49, 0.0  ;;  %v1674_v11 = vmul.f32 %v3952_v3, %v3960_v51 }
 0x3e6   :  { %v1672_v0 = vmul.f32 %v3952_v3, %v3964_v60  ;;  %v1959_v20 = vpack.c.bf16 %v3964_v60, %v3956_v45  ;;  %1694 = vadd.xlane.f32.xlu0 %v1693_v12  ;;  %v1687_v39 = vsel %vm76_vm0, %v1671_v37, 0.0 }
 0x3e7   :  { %1688 = vadd.xlane.f32.xlu1 %v1687_v39  ;;  %v1696_v32 = vsel %vm76_vm0, %v1674_v11, 0.0 }
 0x3e8   :  { %2686 = vmatprep.subr.bf16.mxu0 %v1959_v20  ;;  %2718 = vmatprep.subr.bf16.mxu1 %v1959_v20  ;;  %v1690_v50 = vsel %vm76_vm0, %v1672_v0, 0.0 }
 0x3e9   :  { %2687 = vmatpush3.bf16.msra.mxu0 %v1959_v20  ;;  %2726 = vmatpush3.bf16.msra.mxu1 %v1959_v20 }
 0x3ea   :  { %v3975_v16 = vpop.f32.mrb[20].mxu1  ;;  %2688 = vmatprep.subr.bf16.mxu0 %v1960_v57  ;;  %2719 = vmatprep.subr.bf16.mxu1 %v1960_v57 }
 0x3eb   :  { %v1677_v24 = vmul.f32 %v3952_v3, %v3975_v16  ;;  %1691 = vadd.xlane.f32.xlu0 %v1690_v50  ;;  %v3980_v44 = vpop.f32.mrb[21].mxu1  ;;  %1697 = vadd.xlane.f32.xlu1 %v1696_v32 }
 0x3ec   :  { %v3982_v46 = vpop.f32.mrb[22].mxu1  ;;  %v1675_v54 = vmul.f32 %v3952_v3, %v3980_v44 }
 0x3ed   :  { %v1678_v30 = vmul.f32 %v3952_v3, %v3982_v46  ;;  %v1962_v10 = vpack.c.bf16 %v3982_v46, %v3975_v16  ;;  %v3988_v38 = vpop.f32.mrb[23].mxu1  ;;  %2689 = vmatpush3.bf16.msra.mxu0 %v1960_v57  ;;  %2727 = vmatpush3.bf16.msra.mxu1 %v1960_v57  ;;  %v1705_v14 = vsel %vm76_vm0, %v1677_v24, 0.0 }
 0x3ee   :  { %v1961_v21 = vpack.c.bf16 %v3988_v38, %v3980_v44  ;;  %v1676_v43 = vmul.f32 %v3952_v3, %v3988_v38  ;;  %v1699_v22 = vsel %vm76_vm0, %v1675_v54, 0.0 }
 0x3ef   :  { %1706 = vadd.xlane.f32.xlu0 %v1705_v14  ;;  %v1708_v25 = vsel %vm76_vm0, %v1678_v30, 0.0 }
 0x3f0   :  { %2690 = vmatprep.subr.bf16.mxu0 %v1961_v21  ;;  %2720 = vmatprep.subr.bf16.mxu1 %v1961_v21  ;;  %v1702_v62 = vsel %vm76_vm0, %v1676_v43, 0.0 }
 0x3f1   :  { %1709 = vadd.xlane.f32.xlu1 %v1708_v25  ;;  %2691 = vmatpush3.bf16.msra.mxu0 %v1961_v21 }
 0x3f2   :  { %2728 = vmatpush3.bf16.msra.mxu1 %v1961_v21  ;;  %v3998_v6 = vpop.f32.mrb[24].mxu1  ;;  %2692 = vmatprep.subr.bf16.mxu0 %v1962_v10 }
 0x3f3   :  { %v1681_v63 = vmul.f32 %v3952_v3, %v3998_v6  ;;  %2721 = vmatprep.subr.bf16.mxu1 %v1962_v10  ;;  %1700 = vadd.xlane.f32.xlu0 %v1699_v22  ;;  %v4003_v48 = vpop.f32.mrb[25].mxu1 }
 0x3f4   :  { %v4005_v5 = vpop.f32.mrb[26].mxu1  ;;  %v1679_v57 = vmul.f32 %v3952_v3, %v4003_v48 }
 0x3f5   :  { %v1682_v7 = vmul.f32 %v3952_v3, %v4005_v5  ;;  %v1964_v56 = vpack.c.bf16 %v4005_v5, %v3998_v6  ;;  %1703 = vadd.xlane.f32.xlu1 %v1702_v62  ;;  %v4012_v49 = vpop.f32.mrb[27].mxu1  ;;  %2693 = vmatpush3.bf16.msra.mxu0 %v1962_v10  ;;  %v1717_v37 = vsel %vm76_vm0, %v1681_v63, 0.0 }
 0x3f6   :  { %v1963_v12 = vpack.c.bf16 %v4012_v49, %v4003_v48  ;;  %2729 = vmatpush3.bf16.msra.mxu1 %v1962_v10  ;;  %v1680_v0 = vmul.f32 %v3952_v3, %v4012_v49  ;;  %v1711_v39 = vsel %vm76_vm0, %v1679_v57, 0.0 }
 0x3f7   :  { %1718 = vadd.xlane.f32.xlu0 %v1717_v37  ;;  %v1720_v11 = vsel %vm76_vm0, %v1682_v7, 0.0 }
 0x3f8   :  { %2694 = vmatprep.subr.bf16.mxu0 %v1963_v12  ;;  %2722 = vmatprep.subr.bf16.mxu1 %v1963_v12  ;;  %v1714_v30 = vsel %vm76_vm0, %v1680_v0, 0.0 }
 0x3f9   :  { %1721 = vadd.xlane.f32.xlu1 %v1720_v11  ;;  %2695 = vmatpush3.bf16.msra.mxu0 %v1963_v12 }
 0x3fa   :  { %2730 = vmatpush3.bf16.msra.mxu1 %v1963_v12  ;;  %v4022_v20 = vpop.f32.mrb[28].mxu1  ;;  %2696 = vmatprep.subr.bf16.mxu0 %v1964_v56 }
 0x3fb   :  { %v1685_v50 = vmul.f32 %v3952_v3, %v4022_v20  ;;  %2723 = vmatprep.subr.bf16.mxu1 %v1964_v56  ;;  %1712 = vadd.xlane.f32.xlu0 %v1711_v39  ;;  %v4027_v32 = vpop.f32.mrb[29].mxu1 }
 0x3fc   :  { %v4029_v24 = vpop.f32.mrb[30].mxu1  ;;  %v1683_v25 = vmul.f32 %v3952_v3, %v4027_v32 }
 0x3fd   :  { %v1686_v10 = vmul.f32 %v3952_v3, %v4029_v24  ;;  %v1966_v14 = vpack.c.bf16 %v4029_v24, %v4022_v20  ;;  %1715 = vadd.xlane.f32.xlu1 %v1714_v30  ;;  %v4036_v54 = vpop.f32.mrb[31].mxu1  ;;  %2697 = vmatpush3.bf16.msra.mxu0 %v1964_v56  ;;  %v1729_v21 = vsel %vm76_vm0, %v1685_v50, 0.0 }
 0x3fe   :  { %v1965_v43 = vpack.c.bf16 %v4036_v54, %v4027_v32  ;;  %2731 = vmatpush3.bf16.msra.mxu1 %v1964_v56  ;;  %v1684_v63 = vmul.f32 %v3952_v3, %v4036_v54  ;;  %v1723_v62 = vsel %vm76_vm0, %v1683_v25, 0.0  ;;  %v4052_v56 = vpop.xlane.xlu1 %1340 }
 0x3ff   :  { %1730 = vadd.xlane.f32.xlu0 %v1729_v21  ;;  %v1732_v22 = vsel %vm76_vm0, %v1686_v10, 0.0 }
 0x400   :  { %2698 = vmatprep.subr.bf16.mxu0 %v1965_v43  ;;  %2724 = vmatprep.subr.bf16.mxu1 %v1965_v43  ;;  %v1726_v7 = vsel %vm76_vm0, %v1684_v63, 0.0 }
 0x401   :  { %1733 = vadd.xlane.f32.xlu1 %v1732_v22  ;;  %2699 = vmatpush3.bf16.msra.mxu0 %v1965_v43 }
 0x402   :  { %2732 = vmatpush3.bf16.msra.mxu1 %v1965_v43  ;;  %2700 = vmatprep.subr.bf16.mxu0 %v1966_v14  ;;  %v4056_v37 = vpop.xlane.xlu1 %1334  ;;  %v4477_v43 = vld [vmem:[#allocation26_spill] sm:$0xff] }
 0x403   :  { %2725 = vmatprep.subr.bf16.mxu1 %v1966_v14  ;;  %1724 = vadd.xlane.f32.xlu0 %v1723_v62  ;;  %v4478_v62 = vld [vmem:[#allocation27_spill] sm:$0xff] }
 0x405   :  { %1727 = vadd.xlane.f32.xlu1 %v1726_v7  ;;  %2701 = vmatpush3.bf16.msra.mxu0 %v1966_v14 }
 0x406   :  { %2733 = vmatpush3.bf16.msra.mxu1 %v1966_v14 }
 0x408   :  { %2703 = vmatmul.mubr.bf16.vlgmr.msra.gmra.mrb[32].mxu0 %v3751_v47 }
 0x409   :  { %2711 = vmatmul.mubr.bf16.vlgmr.msra.gmra.mrb[32].mxu1 %v3798_v2  ;;  %2706 = vmatprep.mubr.bf16.mxu0 %v3757_v18 }
 0x40a   :  { %2714 = vmatprep.mubr.bf16.mxu1 %v3806_v52 }
 0x410   :  { %2707 = vmatmul.mubr.bf16.gmra.mrb[36].mxu0 %v3763_v13 }
 0x411   :  { %2715 = vmatmul.mubr.bf16.gmra.mrb[36].mxu1 %v3839_v9 }
 0x416   :  { %v1467_v57 = vpop.permute.xlu1 %1466 }
 0x417   :  { %v1536_v12 = vmul.f32 %v3652_v15, %v1467_v57  ;;  %v1457_v11 = vpop.permute.xlu0 %1456 }
 0x418   :  { %v1534_v47 = vmul.f32 %v1457_v11, %v3654_v29  ;;  %v4474_v29 = vld [vmem:[#allocation23_spill] sm:$0xff] }
 0x419   :  { %v4061_v2 = vadd.f32 %v1536_v12, %v3801_v53 }
 0x41a   :  { %v4064_v18 = vadd.f32 %v1534_v47, %v3809_v55  ;;  %v1462_v52 = vpop.permute.xlu1 %1461  ;;  %v4475_v55 = vld [vmem:[#allocation25_spill] sm:$0xff] }
 0x41b   :  { %v1535_v0 = vmul.f32 %v1462_v52, %v3664_v33  ;;  %v1472_v13 = vpop.permute.xlu0 %1471 }
 0x41c   :  { %v1537_v9 = vmul.f32 %v3660_v40, %v1472_v13  ;;  %v4476_v40 = vld [vmem:[#allocation24_spill] sm:$0xff] }
 0x41d   :  { %v4069_v39 = vadd.f32 %v1535_v0, %v3825_v58 }
 0x41e   :  { %v4072_v15 = vadd.f32 %v1537_v9, %v3827_v31  ;;  %v1487_v50 = vpop.permute.xlu1 %1486 }
 0x41f   :  { %v1540_v30 = vmul.f32 %v4474_v29, %v1487_v50 }
 0x420   :  { %v1492_v53 = vpop.permute.xlu0 %1491 }
 0x421   :  { %v4076_v10 = vadd.f32 %v1540_v30, %v3842_v19  ;;  %v1541_v14 = vmul.f32 %v4475_v55, %v1492_v53 }
 0x422   :  { %v1477_v21 = vpop.permute.xlu1 %1476 }
 0x423   :  { %v4080_v33 = vadd.f32 %v1541_v14, %v3857_v41  ;;  %v1538_v25 = vmul.f32 %v1477_v21, %v4476_v40  ;;  %v4479_v41 = vld [vmem:[#allocation28_spill] sm:$0xff] }
 0x425   :  { %v4084_v58 = vadd.f32 %v1538_v25, %v3860_v17  ;;  %v1482_v31 = vpop.permute.xlu0 %1481  ;;  %v4480_v17 = vld [vmem:[#allocation30_spill] sm:$0xff] }
 0x426   :  { %v1539_v22 = vmul.f32 %v1482_v31, %v4477_v43  ;;  %v1507_v63 = vpop.permute.xlu1 %1506 }
 0x427   :  { %v1544_v7 = vmul.f32 %v4478_v62, %v1507_v63 }
 0x428   :  { %v4089_v19 = vadd.f32 %v1539_v22, %v3876_v23 }
 0x429   :  { %v4092_v57 = vadd.f32 %v1544_v7, %v3878_v36 }
 0x42a   :  { %v1497_v12 = vpop.permute.xlu1 %1496 }
 0x42b   :  { %v1542_v11 = vmul.f32 %v1497_v12, %v4479_v41 }
 0x42c   :  { %v1502_v47 = vpop.permute.xlu0 %1501 }
 0x42d   :  { %v4096_v52 = vadd.f32 %v1542_v11, %v3896_v59  ;;  %v1543_v0 = vmul.f32 %v1502_v47, %v4480_v17 }
 0x42f   :  { %v4100_v13 = vadd.f32 %v1543_v0, %v3906_v61 }
 0x434   :  { %v1517_v9 = vpop.permute.xlu1 %1516 }
 0x435   :  { %v1546_v50 = vmul.f32 %v1517_v9, %v3727_v4 }
 0x437   :  { %v4104_v23 = vadd.f32 %v1546_v50, %v3927_v26 }
 0x473   :  { %v4106_v36 = vpop.xlane.xlu0 %1694 }
 0x474   :  { %v1689_v62 = vpop.xlane.xlu1 %1688 }
 0x478   :  { %v1692_v29 = vpop.xlane.xlu0 %1691 }
 0x47c   :  { %v4137_v12 = vpop.xlane.xlu0 %1706 }
 0x4db   :  { %v4108_v30 = vpop.f32.mrb[32].mxu0 }
 0x4dc   :  { %v2066_v59 = vmul.f32 %v3952_v3, %v4108_v30  ;;  %v4112_v53 = vpop.f32.mrb[33].mxu0  ;;  %v4114_v55 = vpop.f32.mrb[32].mxu1 }
 0x4dd   :  { %4481 = vst [vmem:[#allocation18_spill] sm:$0xff] %v4112_v53  ;;  %4482 = vst [vmem:[#allocation12_spill] sm:$0xff] %v4114_v55  ;;  %v2064_v61 = vmul.f32 %v3952_v3, %v4112_v53  ;;  %v4118_v14 = vpop.f32.mrb[34].mxu0  ;;  %v2074_v4 = vmul.f32 %v3952_v3, %v4114_v55  ;;  %v4122_v26 = vpop.f32.mrb[33].mxu1 }
 0x4de   :  { %4483 = vst [vmem:[#allocation10_spill] sm:$0xff] %v4118_v14  ;;  %4484 = vst [vmem:[#allocation20_spill] sm:$0xff] %v4122_v26  ;;  %v4124_v21 = vpop.f32.mrb[35].mxu0  ;;  %v2086_v40 = vsel %vm76_vm0, %v2066_v59, 0.0  ;;  %v4127_v25 = vpop.f32.mrb[34].mxu1  ;;  %v2067_v31 = vmul.f32 %v3952_v3, %v4118_v14  ;;  %v2072_v7 = vmul.f32 %v3952_v3, %v4122_v26 }
 0x4df   :  { %4485 = vst [vmem:[#allocation3_spill] sm:$0xff] %v4124_v21  ;;  %4486 = vst [vmem:[#allocation11_spill] sm:$0xff] %v4127_v25  ;;  %2087 = vadd.xlane.f32.xlu0 %v2086_v40  ;;  %v2080_v43 = vsel %vm76_vm0, %v2064_v61, 0.0  ;;  %v4132_v22 = vpop.f32.mrb[35].mxu1  ;;  %v2110_v63 = vsel %vm76_vm0, %v2074_v4, 0.0  ;;  %v2075_v41 = vmul.f32 %v3952_v3, %v4127_v25  ;;  %v2065_v59 = vmul.f32 %v3952_v3, %v4124_v21  ;;  %v1698_v25 = vpop.xlane.xlu1 %1697 }
 0x4e0   :  { %4487 = vst [vmem:[#allocation9_spill] sm:$0xff] %v4132_v22  ;;  %2081 = vadd.xlane.f32.xlu1 %v2080_v43  ;;  %v2089_v11 = vsel %vm76_vm0, %v2067_v31, 0.0  ;;  %v2104_v61 = vsel %vm76_vm0, %v2072_v7, 0.0  ;;  %v2073_v31 = vmul.f32 %v3952_v3, %v4132_v22  ;;  %v4166_v26 = vld [vmem:[#allocation2] ss:$0 sm:$0xff]  ;;  %v1701_v53 = vpop.xlane.xlu0 %1700 }
 0x4e1   :  { %v2113_v43 = vsel %vm76_vm0, %v2075_v41, 0.0  ;;  %v1356_v7 = vadd.f32 %v4166_v26, %v3944_v42  ;;  %v1353_v21 = vadd.f32 %v4166_v26, %v3940_v27  ;;  %v1736_v14 = vadd.f32 %v4166_v26, %v1692_v29 }
 0x4e2   :  { %v2107_v22 = vsel %vm76_vm0, %v2073_v31, 0.0  ;;  %v1355_v55 = vadd.f32 %v4166_v26, %v4056_v37 }
 0x4e3   :  { %2111 = vadd.xlane.f32.xlu0 %v2110_v63  ;;  %v4142_v47 = vpop.f32.mrb[36].mxu0  ;;  %v2444_v42 = vmul.f32 -1.442695, %v1356_v7  ;;  %v2441_v27 = vmul.f32 -1.442695, %v1353_v21  ;;  %v1710_v31 = vpop.xlane.xlu1 %1709  ;;  %v1357_v21 = vadd.f32 %v4166_v26, %v4052_v56 }
 0x4e4   :  { %4488 = vst [vmem:[#allocation19_spill] sm:$0xff] %v4142_v47  ;;  %2090 = vadd.xlane.f32.xlu1 %v2089_v11  ;;  %v4144_v17 = vpop.f32.mrb[37].mxu0  ;;  %v4146_v0 = vpop.f32.mrb[36].mxu1  ;;  %v2070_v11 = vmul.f32 %v3952_v3, %v4142_v47  ;;  %v2447_v29 = vmul.f32 -1.442695, %v1736_v14  ;;  %v1735_v14 = vadd.f32 %v4166_v26, %v1689_v62 }
 0x4e5   :  { %v4148_v9 = vpop.f32.mrb[38].mxu0  ;;  %v4150_v50 = vpop.f32.mrb[37].mxu1  ;;  %2985 = vpow2.f32 %v2444_v42  ;;  %v2068_v37 = vmul.f32 %v3952_v3, %v4144_v17 }
 0x4e6   :  { %4489 = vst [vmem:[#allocation5_spill] sm:$0xff] %v4148_v9  ;;  %v4155_v4 = vpop.f32.mrb[39].mxu0  ;;  %v4157_v40 = vpop.f32.mrb[38].mxu1  ;;  %v2071_v41 = vmul.f32 %v3952_v3, %v4148_v9  ;;  %v2098_v47 = vsel %vm76_vm0, %v2070_v11, 0.0  ;;  %v1737_v11 = vadd.f32 %v4166_v26, %v4106_v36  ;;  %2987 = vpow2.f32 %v2441_v27 }
 0x4e7   :  { %4490 = vst [vmem:[#allocation13_spill] sm:$0xff] %v4157_v40  ;;  %2105 = vadd.xlane.f32.xlu0 %v2104_v61  ;;  %v4162_v63 = vpop.f32.mrb[39].mxu1  ;;  %v2083_v61 = vsel %vm76_vm0, %v2065_v59, 0.0  ;;  %v2079_v59 = vmul.f32 %v3952_v3, %v4157_v40  ;;  %v1719_v9 = vpop.xlane.xlu0 %1718  ;;  %v2069_v7 = vmul.f32 %v3952_v3, %v4155_v4  ;;  %2989 = vpow2.f32 %v2447_v29 }
 0x4e8   :  { %2114 = vadd.xlane.f32.xlu1 %v2113_v43  ;;  %v2078_v43 = vmul.f32 %v3952_v3, %v4146_v0  ;;  %v1739_v36 = vadd.f32 %v4166_v26, %v1701_v53  ;;  %v1704_v42 = vpop.xlane.xlu1 %1703  ;;  %v2092_v56 = vsel %vm76_vm0, %v2068_v37, 0.0  ;;  %v1742_v53 = vadd.f32 %v4166_v26, %v1710_v31 }
 0x4e9   :  { %v1738_v37 = vadd.f32 %v4166_v26, %v1698_v25  ;;  %v1745_v25 = vadd.f32 %v4166_v26, %v1719_v9 }
 0x4ea   :  { %v2450_v62 = vmul.f32 -1.442695, %v1739_v36 }
 0x4eb   :  { %2084 = vadd.xlane.f32.xlu0 %v2083_v61  ;;  %v2101_v61 = vsel %vm76_vm0, %v2071_v41, 0.0  ;;  %v2125_v41 = vsel %vm76_vm0, %v2079_v59, 0.0  ;;  %v1713_v27 = vpop.xlane.xlu0 %1712  ;;  %v2095_v59 = vsel %vm76_vm0, %v2069_v7, 0.0  ;;  %v2453_v7 = vmul.f32 -1.442695, %v1742_v53 }
 0x4ec   :  { %2108 = vadd.xlane.f32.xlu1 %v2107_v22  ;;  %v2122_v22 = vsel %vm76_vm0, %v2078_v43, 0.0  ;;  %v2448_v43 = vmul.f32 -1.442695, %v1737_v11  ;;  %v2446_v11 = vmul.f32 -1.442695, %v1735_v14 }
 0x4ed   :  { %v2449_v14 = vmul.f32 -1.442695, %v1738_v37 }
 0x4ef   :  { %2099 = vadd.xlane.f32.xlu0 %v2098_v47  ;;  %v2443_v47 = vmul.f32 -1.442695, %v1355_v55  ;;  %v2445_v55 = vmul.f32 -1.442695, %v1357_v21 }
 0x4f0   :  { %2102 = vadd.xlane.f32.xlu1 %v2101_v61  ;;  %v2076_v61 = vmul.f32 %v3952_v3, %v4150_v50 }
 0x4f1   :  { %2991 = vpow2.f32 %v2443_v47 }
 0x4f2   :  { %2993 = vpow2.f32 %v2448_v43  ;;  %v2116_v29 = vsel %vm76_vm0, %v2076_v61, 0.0  ;;  %v1743_v43 = vadd.f32 %v4166_v26, %v1713_v27  ;;  %v1740_v61 = vadd.f32 %v4166_v26, %v1704_v42 }
 0x4f3   :  { %2123 = vadd.xlane.f32.xlu0 %v2122_v22  ;;  %v2077_v22 = vmul.f32 %v3952_v3, %v4162_v63  ;;  %2995 = vpow2.f32 %v2445_v55  ;;  %v1722_v3 = vpop.xlane.xlu1 %1721  ;;  %v1741_v27 = vadd.f32 %v4166_v26, %v4137_v12  ;;  %v2456_v42 = vmul.f32 -1.442695, %v1745_v25 }
 0x4f4   :  { %2126 = vadd.xlane.f32.xlu1 %v2125_v41  ;;  %v2986_v41 = vpop.eup %2985  ;;  %2997 = vpow2.f32 %v2450_v62  ;;  %v2451_v62 = vmul.f32 -1.442695, %v1740_v61 }
 0x4f5   :  { %v2119_v21 = vsel %vm76_vm0, %v2077_v22, 0.0  ;;  %v2988_v47 = vpop.eup %2987  ;;  %v1420_v31 = vadd.f32 1.0, %v2986_v41  ;;  %2999 = vpow2.f32 %v2446_v11  ;;  %v2454_v22 = vmul.f32 -1.442695, %v1743_v43 }
 0x4f6   :  { %v2990_v36 = vpop.eup %2989  ;;  %v1417_v55 = vadd.f32 1.0, %v2988_v47  ;;  %3001 = vpow2.f32 %v2453_v7  ;;  %v2452_v7 = vmul.f32 -1.442695, %v1741_v27 }
 0x4f7   :  { %2093 = vadd.xlane.f32.xlu0 %v2092_v56  ;;  %v1731_v56 = vpop.xlane.xlu0 %1730  ;;  %3003 = vrcp.f32 %v1420_v31  ;;  %v1716_v40 = vpop.xlane.xlu1 %1715 }
 0x4f8   :  { %2096 = vadd.xlane.f32.xlu1 %v2095_v59  ;;  %3005 = vpow2.f32 %v2449_v14  ;;  %v1749_v12 = vadd.f32 %v4166_v26, %v1731_v56 }
 0x4f9   :  { %3007 = vrcp.f32 %v1417_v55 }
 0x4fa   :  { %3009 = vpow2.f32 %v2454_v22  ;;  %v2460_v27 = vmul.f32 -1.442695, %v1749_v12 }
 0x4fb   :  { %2117 = vadd.xlane.f32.xlu0 %v2116_v29  ;;  %v2992_v59 = vpop.eup %2991  ;;  %v1800_v29 = vadd.f32 1.0, %v2990_v36  ;;  %v1744_v36 = vadd.f32 %v4166_v26, %v1716_v40  ;;  %v1734_v14 = vpop.xlane.xlu1 %1733 }
 0x4fc   :  { %2120 = vadd.xlane.f32.xlu1 %v2119_v21  ;;  %v1725_v21 = vpop.xlane.xlu0 %1724  ;;  %v2994_v53 = vpop.eup %2993  ;;  %v1419_v11 = vadd.f32 1.0, %v2992_v59 }
 0x4fd   :  { %v2996_v41 = vpop.eup %2995  ;;  %v1747_v37 = vadd.f32 %v4166_v26, %v1725_v21  ;;  %v1801_v47 = vadd.f32 1.0, %v2994_v53  ;;  %3011 = vrcp.f32 %v1800_v29  ;;  %v2455_v29 = vmul.f32 -1.442695, %v1744_v36 }
 0x4fe   :  { %v2998_v9 = vpop.eup %2997  ;;  %3013 = vpow2.f32 %v2451_v62  ;;  %v1421_v31 = vadd.f32 1.0, %v2996_v41  ;;  %v1746_v53 = vadd.f32 %v4166_v26, %v1722_v3 }
 0x4ff   :  { %v3000_v43 = vpop.eup %2999  ;;  %3015 = vrcp.f32 %v1419_v11  ;;  %v2458_v61 = vmul.f32 -1.442695, %v1747_v37  ;;  %v1803_v55 = vadd.f32 1.0, %v2998_v9  ;;  %v1728_v11 = vpop.xlane.xlu1 %1727 }
 0x500   :  { %3017 = vpow2.f32 %v2456_v42  ;;  %v3002_v59 = vpop.eup %3001  ;;  %v1799_v25 = vadd.f32 1.0, %v3000_v43  ;;  %v1748_v9 = vadd.f32 %v4166_v26, %v1728_v11 }
 0x501   :  { %3019 = vrcp.f32 %v1801_v47  ;;  %v3004_v22 = vpop.eup %3003  ;;  %v1806_v62 = vadd.f32 1.0, %v3002_v59  ;;  %v2457_v47 = vmul.f32 -1.442695, %v1746_v53 }
 0x502   :  { %3021 = vpow2.f32 %v2452_v7  ;;  %v3006_v21 = vpop.eup %3005 }
 0x503   :  { %3023 = vrcp.f32 %v1421_v31  ;;  %v3008_v40 = vpop.eup %3007  ;;  %v1802_v42 = vadd.f32 1.0, %v3006_v21 }
 0x504   :  { %3025 = vpow2.f32 %v2458_v61  ;;  %v3010_v56 = vpop.eup %3009  ;;  %v1750_v61 = vadd.f32 %v4166_v26, %v1734_v14 }
 0x505   :  { %3027 = vrcp.f32 %v1803_v55  ;;  %v1807_v7 = vadd.f32 1.0, %v3010_v56  ;;  %v2459_v55 = vmul.f32 -1.442695, %v1748_v9 }
 0x506   :  { %3029 = vrcp.f32 %v1799_v25 }
 0x507   :  { %v3012_v41 = vpop.eup %3011  ;;  %3031 = vpow2.f32 %v2455_v29 }
 0x508   :  { %v3014_v37 = vpop.eup %3013  ;;  %3033 = vpow2.f32 %v2460_v27  ;;  %v2461_v27 = vmul.f32 -1.442695, %v1750_v61 }
 0x509   :  { %v3016_v3 = vpop.eup %3015  ;;  %3035 = vrcp.f32 %v1806_v62  ;;  %v1804_v36 = vadd.f32 1.0, %v3014_v37 }
 0x50a   :  { %v3018_v43 = vpop.eup %3017  ;;  %3037 = vrcp.f32 %v1802_v42 }
 0x50b   :  { %v3020_v31 = vpop.eup %3019  ;;  %3039 = vpow2.f32 %v2457_v47  ;;  %v1809_v25 = vadd.f32 1.0, %v3018_v43 }
 0x50c   :  { %v3022_v12 = vpop.eup %3021  ;;  %3041 = vrcp.f32 %v1807_v7 }
 0x50d   :  { %1526 = vperm.xlu1 %2736, %v3004_v22   ;;  %v3024_v59 = vpop.eup %3023  ;;  %v1805_v21 = vadd.f32 1.0, %v3022_v12  ;;  %3043 = vrcp.f32 %v1804_v36 }
 0x50e   :  { %v3026_v22 = vpop.eup %3025  ;;  %3045 = vpow2.f32 %v2459_v55 }
 0x50f   :  { %v3028_v29 = vpop.eup %3027  ;;  %3047 = vrcp.f32 %v1809_v25  ;;  %v1811_v62 = vadd.f32 1.0, %v3026_v22 }
 0x510   :  { %v3030_v53 = vpop.eup %3029  ;;  %3049 = vrcp.f32 %v1805_v21 }
 0x511   :  { %1511 = vperm.xlu0 %2735, %v3008_v40   ;;  %1854 = vperm.xlu1 %2736, %v3012_v41   ;;  %v3032_v40 = vpop.eup %3031  ;;  %3051 = vpow2.f32 %v2461_v27 }
 0x512   :  { %v3034_v11 = vpop.eup %3033  ;;  %v1808_v56 = vadd.f32 1.0, %v3032_v40  ;;  %3053 = vrcp.f32 %v1811_v62 }
 0x513   :  { %v3036_v14 = vpop.eup %3035  ;;  %v1813_v42 = vadd.f32 1.0, %v3034_v11 }
 0x514   :  { %v3038_v41 = vpop.eup %3037  ;;  %3055 = vrcp.f32 %v1808_v56 }
 0x515   :  { %1859 = vperm.xlu1 %2736, %v3020_v31   ;;  %1521 = vperm.xlu0 %2735, %v3016_v3   ;;  %v3040_v37 = vpop.eup %3039  ;;  %3057 = vrcp.f32 %v1813_v42 }
 0x516   :  { %v3042_v47 = vpop.eup %3041  ;;  %v1810_v3 = vadd.f32 1.0, %v3040_v37 }
 0x517   :  { %v3044_v9 = vpop.eup %3043 }
 0x518   :  { %v3046_v7 = vpop.eup %3045  ;;  %3059 = vrcp.f32 %v1810_v3 }
 0x519   :  { %1869 = vperm.xlu1 %2736, %v3028_v29   ;;  %1531 = vperm.xlu0 %2735, %v3024_v59   ;;  %v3048_v43 = vpop.eup %3047  ;;  %v1812_v36 = vadd.f32 1.0, %v3046_v7 }
 0x51a   :  { %v3050_v31 = vpop.eup %3049 }
 0x51b   :  { %v3052_v12 = vpop.eup %3051  ;;  %3061 = vrcp.f32 %v1812_v36 }
 0x51c   :  { %v3054_v61 = vpop.eup %3053  ;;  %v1814_v55 = vadd.f32 1.0, %v3052_v12 }
 0x51d   :  { %1849 = vperm.xlu0 %2735, %v3030_v53   ;;  %1884 = vperm.xlu1 %2736, %v3036_v14  }
 0x51e   :  { %v3056_v59 = vpop.eup %3055  ;;  %3063 = vrcp.f32 %v1814_v55 }
 0x51f   :  { %v3058_v25 = vpop.eup %3057 }
 0x521   :  { %1864 = vperm.xlu0 %2735, %v3038_v41   ;;  %1889 = vperm.xlu1 %2736, %v3042_v47  }
 0x522   :  { %v3060_v22 = vpop.eup %3059 }
 0x525   :  { %1899 = vperm.xlu1 %2736, %v3048_v43   ;;  %1874 = vperm.xlu0 %2735, %v3044_v9   ;;  %v3062_v29 = vpop.eup %3061 }
 0x528   :  { %v3064_v21 = vpop.eup %3063 }
 0x529   :  { %1909 = vperm.xlu1 %2736, %v3054_v61   ;;  %1879 = vperm.xlu0 %2735, %v3050_v31  }
 0x52d   :  { %1919 = vperm.xlu1 %2736, %v3058_v25   ;;  %1894 = vperm.xlu0 %2735, %v3056_v59  }
 0x531   :  { %1904 = vperm.xlu0 %2735, %v3060_v22  }
 0x535   :  { %1914 = vperm.xlu0 %2735, %v3062_v29  }
 0x539   :  { %1924 = vperm.xlu0 %2735, %v3064_v21  }
 0x56c   :  { %v2088_v53 = vpop.xlane.xlu0 %2087 }
 0x56d   :  { %v2130_v27 = vadd.f32 %v4166_v26, %v2088_v53  ;;  %v2082_v40 = vpop.xlane.xlu1 %2081 }
 0x56e   :  { %v2128_v62 = vadd.f32 %v4166_v26, %v2082_v40 }
 0x56f   :  { %v2464_v11 = vmul.f32 -1.442695, %v2130_v27 }
 0x570   :  { %v2462_v14 = vmul.f32 -1.442695, %v2128_v62  ;;  %v2112_v56 = vpop.xlane.xlu0 %2111 }
 0x571   :  { %3065 = vpow2.f32 %v2464_v11  ;;  %v2138_v41 = vadd.f32 %v4166_v26, %v2112_v56  ;;  %v2091_v42 = vpop.xlane.xlu1 %2090 }
 0x572   :  { %v2131_v37 = vadd.f32 %v4166_v26, %v2091_v42  ;;  %3067 = vpow2.f32 %v2462_v14 }
 0x573   :  { %v2472_v47 = vmul.f32 -1.442695, %v2138_v41 }
 0x574   :  { %v2465_v9 = vmul.f32 -1.442695, %v2131_v37  ;;  %v2106_v3 = vpop.xlane.xlu0 %2105 }
 0x575   :  { %3069 = vpow2.f32 %v2472_v47  ;;  %v2136_v7 = vadd.f32 %v4166_v26, %v2106_v3  ;;  %v2115_v43 = vpop.xlane.xlu1 %2114 }
 0x576   :  { %3071 = vpow2.f32 %v2465_v9  ;;  %v2139_v31 = vadd.f32 %v4166_v26, %v2115_v43 }
 0x577   :  { %v2470_v36 = vmul.f32 -1.442695, %v2136_v7 }
 0x578   :  { %v2473_v12 = vmul.f32 -1.442695, %v2139_v31  ;;  %v2085_v61 = vpop.xlane.xlu0 %2084 }
 0x579   :  { %3073 = vpow2.f32 %v2470_v36  ;;  %v2129_v55 = vadd.f32 %v4166_v26, %v2085_v61  ;;  %v2109_v59 = vpop.xlane.xlu1 %2108 }
 0x57a   :  { %3075 = vpow2.f32 %v2473_v12  ;;  %v2137_v25 = vadd.f32 %v4166_v26, %v2109_v59 }
 0x57b   :  { %v3066_v22 = vpop.eup %3065  ;;  %v2463_v29 = vmul.f32 -1.442695, %v2129_v55 }
 0x57c   :  { %v2194_v21 = vadd.f32 1.0, %v3066_v22  ;;  %v2471_v53 = vmul.f32 -1.442695, %v2137_v25  ;;  %v2100_v27 = vpop.xlane.xlu0 %2099  ;;  %v3068_v11 = vpop.eup %3067 }
 0x57d   :  { %3077 = vpow2.f32 %v2463_v29  ;;  %v2134_v40 = vadd.f32 %v4166_v26, %v2100_v27  ;;  %v2103_v62 = vpop.xlane.xlu1 %2102  ;;  %v2192_v3 = vadd.f32 1.0, %v3068_v11 }
 0x57e   :  { %3079 = vrcp.f32 %v2194_v21  ;;  %v2135_v14 = vadd.f32 %v4166_v26, %v2103_v62 }
 0x57f   :  { %v3070_v56 = vpop.eup %3069  ;;  %v2468_v41 = vmul.f32 -1.442695, %v2134_v40  ;;  %3081 = vpow2.f32 %v2471_v53 }
 0x580   :  { %v3072_v42 = vpop.eup %3071  ;;  %v2202_v37 = vadd.f32 1.0, %v3070_v56  ;;  %v2469_v47 = vmul.f32 -1.442695, %v2135_v14  ;;  %v2124_v9 = vpop.xlane.xlu0 %2123 }
 0x581   :  { %v2195_v7 = vadd.f32 1.0, %v3072_v42  ;;  %3083 = vpow2.f32 %v2468_v41  ;;  %v2142_v43 = vadd.f32 %v4166_v26, %v2124_v9  ;;  %v2127_v31 = vpop.xlane.xlu1 %2126 }
 0x582   :  { %3085 = vrcp.f32 %v2202_v37  ;;  %v2143_v59 = vadd.f32 %v4166_v26, %v2127_v31 }
 0x583   :  { %v3074_v36 = vpop.eup %3073  ;;  %3087 = vrcp.f32 %v2195_v7  ;;  %v2476_v12 = vmul.f32 -1.442695, %v2142_v43 }
 0x584   :  { %v3076_v61 = vpop.eup %3075  ;;  %v2200_v55 = vadd.f32 1.0, %v3074_v36  ;;  %3089 = vpow2.f32 %v2469_v47  ;;  %v2094_v25 = vpop.xlane.xlu0 %2093  ;;  %v2477_v14 = vmul.f32 -1.442695, %v2143_v59 }
 0x585   :  { %3091 = vrcp.f32 %v2192_v3  ;;  %v2203_v22 = vadd.f32 1.0, %v3076_v61  ;;  %v2132_v29 = vadd.f32 %v4166_v26, %v2094_v25  ;;  %v2097_v21 = vpop.xlane.xlu1 %2096  ;;  %v4491_v25 = vld [vmem:[#allocation31_spill] sm:$0xff] }
 0x586   :  { %3093 = vpow2.f32 %v2476_v12  ;;  %v2133_v53 = vadd.f32 %v4166_v26, %v2097_v21 }
 0x587   :  { %v3078_v27 = vpop.eup %3077  ;;  %3095 = vrcp.f32 %v2203_v22  ;;  %v2466_v40 = vmul.f32 -1.442695, %v2132_v29 }
 0x588   :  { %v3080_v62 = vpop.eup %3079  ;;  %3097 = vrcp.f32 %v2200_v55  ;;  %v2193_v11 = vadd.f32 1.0, %v3078_v27  ;;  %v2467_v56 = vmul.f32 -1.442695, %v2133_v53  ;;  %v2118_v41 = vpop.xlane.xlu0 %2117 }
 0x589   :  { %3099 = vpow2.f32 %v2466_v40  ;;  %v2140_v42 = vadd.f32 %v4166_v26, %v2118_v41  ;;  %2252 = vperm.xlu1 %2736, %v3080_v62   ;;  %v2121_v37 = vpop.xlane.xlu1 %2120  ;;  %v3082_v47 = vpop.eup %3081  ;;  %v4492_v62 = vld [vmem:[#allocation29_spill] sm:$0xff] }
 0x58a   :  { %3101 = vrcp.f32 %v2193_v11  ;;  %v2141_v9 = vadd.f32 %v4166_v26, %v2121_v37  ;;  %v2201_v7 = vadd.f32 1.0, %v3082_v47 }
 0x58b   :  { %v3084_v3 = vpop.eup %3083  ;;  %3103 = vpow2.f32 %v2467_v56  ;;  %v2474_v43 = vmul.f32 -1.442695, %v2140_v42 }
 0x58c   :  { %v3086_v31 = vpop.eup %3085  ;;  %v2198_v36 = vadd.f32 1.0, %v3084_v3  ;;  %3105 = vpow2.f32 %v2477_v14  ;;  %v2475_v12 = vmul.f32 -1.442695, %v2141_v9 }
 0x58d   :  { %v3088_v61 = vpop.eup %3087  ;;  %3107 = vrcp.f32 %v2201_v7  ;;  %2292 = vperm.xlu1 %2736, %v3086_v31   ;;  %v1527_v55 = vpop.permute.xlu1 %1526 }
 0x58e   :  { %v3090_v59 = vpop.eup %3089  ;;  %3109 = vrcp.f32 %v2198_v36  ;;  %v1548_v22 = vmul.f32 %v4491_v25, %v1527_v55  ;;  %2257 = vperm.xlu0 %2735, %v3088_v61  }
 0x58f   :  { %v3092_v29 = vpop.eup %3091  ;;  %v2199_v21 = vadd.f32 1.0, %v3090_v59  ;;  %3111 = vpow2.f32 %v2474_v43  ;;  %v4493_v43 = vld [vmem:[#allocation33_spill] sm:$0xff] }
 0x590   :  { %v3094_v26 = vpop.eup %3093  ;;  %3113 = vpow2.f32 %v2475_v12  ;;  %v4236_v53 = vadd.f32 %v1548_v22, %v3914_v35  ;;  %v1512_v27 = vpop.permute.xlu0 %1511 }
 0x591   :  { %v3096_v40 = vpop.eup %3095  ;;  %v1545_v11 = vmul.f32 %v4492_v62, %v1512_v27  ;;  %2242 = vperm.xlu1 %2736, %v3092_v29   ;;  %v1855_v14 = vpop.permute.xlu1 %1854  ;;  %3115 = vrcp.f32 %v2199_v21  ;;  %v4494_v29 = vld [vmem:[#allocation32_spill] sm:$0xff] }
 0x592   :  { %v3098_v56 = vpop.eup %3097  ;;  %v1928_v41 = vmul.f32 %v1855_v14, %v3964_v60  ;;  %2297 = vperm.xlu0 %2735, %v3096_v40   ;;  %v2206_v14 = vadd.f32 1.0, %v3094_v26 }
 0x593   :  { %v3100_v42 = vpop.eup %3099  ;;  %v4241_v37 = vadd.f32 %v1545_v11, %v3894_v8 }
 0x594   :  { %v3102_v47 = vpop.eup %3101  ;;  %v2196_v9 = vadd.f32 1.0, %v3100_v42  ;;  %v4244_v35 = vadd.f32 %v1928_v41, %v4069_v39  ;;  %v1522_v3 = vpop.permute.xlu0 %1521 }
 0x595   :  { %v3104_v7 = vpop.eup %3103  ;;  %v1547_v31 = vmul.f32 %v1522_v3, %v4493_v43  ;;  %2282 = vperm.xlu1 %2736, %v3098_v56   ;;  %v1860_v36 = vpop.permute.xlu1 %1859 }
 0x596   :  { %v3106_v12 = vpop.eup %3105  ;;  %3117 = vrcp.f32 %v2196_v9  ;;  %v2197_v60 = vadd.f32 1.0, %v3104_v7  ;;  %v1929_v61 = vmul.f32 %v3947_v34, %v1860_v36  ;;  %2247 = vperm.xlu0 %2735, %v3102_v47  }
 0x597   :  { %v3108_v55 = vpop.eup %3107  ;;  %v4249_v8 = vadd.f32 %v1547_v31, %v3929_v1  ;;  %v2207_v42 = vadd.f32 1.0, %v3106_v12 }
 0x598   :  { %v3110_v59 = vpop.eup %3109  ;;  %3119 = vrcp.f32 %v2197_v60  ;;  %v4252_v39 = vadd.f32 %v1929_v61, %v4061_v2  ;;  %v1532_v25 = vpop.permute.xlu0 %1531 }
 0x599   :  { %v3112_v22 = vpop.eup %3111  ;;  %v1549_v21 = vmul.f32 %v4494_v29, %v1532_v25  ;;  %2272 = vperm.xlu1 %2736, %v3110_v59   ;;  %v1870_v27 = vpop.permute.xlu1 %1869 }
 0x59a   :  { %v3114_v40 = vpop.eup %3113  ;;  %v2204_v62 = vadd.f32 1.0, %v3112_v22  ;;  %v1931_v34 = vmul.f32 %v1870_v27, %v3980_v44  ;;  %2287 = vperm.xlu0 %2735, %v3108_v55  }
 0x59b   :  { %v2205_v11 = vadd.f32 1.0, %v3114_v40  ;;  %v1565_v1 = vadd.f32 %v1549_v21, %v3923_v28  ;;  %v3116_v41 = vpop.eup %3115 }
 0x59c   :  { %3121 = vrcp.f32 %v2204_v62  ;;  %v4258_v56 = vadd.f32 %v1931_v34, %v4084_v58  ;;  %v1850_v2 = vpop.permute.xlu0 %1849 }
 0x59d   :  { %3123 = vrcp.f32 %v2205_v11  ;;  %v1927_v47 = vmul.f32 %v1850_v2, %v3956_v45  ;;  %v1885_v9 = vpop.permute.xlu1 %1884 }
 0x59e   :  { %v1934_v3 = vmul.f32 %v3982_v46, %v1885_v9  ;;  %2277 = vperm.xlu0 %2735, %v3116_v41   ;;  %3125 = vrcp.f32 %v2206_v14 }
 0x59f   :  { %v4263_v44 = vadd.f32 %v1927_v47, %v4064_v18  ;;  %3127 = vrcp.f32 %v2207_v42 }
 0x5a0   :  { %v3118_v7 = vpop.eup %3117  ;;  %v4266_v28 = vadd.f32 %v1934_v3, %v4080_v33  ;;  %v1865_v58 = vpop.permute.xlu0 %1864  ;;  %v4498_v3 = vld [vmem:[#allocation11_spill] sm:$0xff] }
 0x5a1   :  { %v1930_v26 = vmul.f32 %v3960_v51, %v1865_v58  ;;  %2262 = vperm.xlu1 %2736, %v3118_v7   ;;  %v1890_v43 = vpop.permute.xlu1 %1889 }
 0x5a2   :  { %v3120_v31 = vpop.eup %3119  ;;  %v1935_v45 = vmul.f32 %v1890_v43, %v4003_v48 }
 0x5a3   :  { %v1946_v46 = vadd.f32 %v1930_v26, %v4072_v15  ;;  %2267 = vperm.xlu0 %2735, %v3120_v31   ;;  %v4499_v31 = vld [vmem:[#allocation20_spill] sm:$0xff] }
 0x5a4   :  { %v1951_v18 = vadd.f32 %v1935_v45, %v4096_v52  ;;  %v1875_v36 = vpop.permute.xlu0 %1874 }
 0x5a5   :  { %v1932_v12 = vmul.f32 %v1875_v36, %v3988_v38  ;;  %v1900_v60 = vpop.permute.xlu1 %1899  ;;  %v4500_v36 = vld [vmem:[#allocation3_spill] sm:$0xff] }
 0x5a6   :  { %v3122_v33 = vpop.eup %3121  ;;  %v1937_v61 = vmul.f32 %v3998_v6, %v1900_v60 }
 0x5a7   :  { %v3124_v55 = vpop.eup %3123  ;;  %v4275_v51 = vadd.f32 %v1932_v12, %v4089_v19  ;;  %2302 = vperm.xlu1 %2736, %v3122_v33  }
 0x5a8   :  { %v1953_v59 = vadd.f32 %v1937_v61, %v4092_v57  ;;  %2307 = vperm.xlu0 %2735, %v3124_v55   ;;  %v1880_v48 = vpop.permute.xlu0 %1879  ;;  %v3126_v52 = vpop.eup %3125  ;;  %v4501_v61 = vld [vmem:[#allocation19_spill] sm:$0xff] }
 0x5a9   :  { %v1933_v15 = vmul.f32 %v3975_v16, %v1880_v48  ;;  %v1910_v25 = vpop.permute.xlu1 %1909  ;;  %v3128_v38 = vpop.eup %3127  ;;  %v4502_v48 = vld [vmem:[#allocation9_spill] sm:$0xff] }
 0x5aa   :  { %v1939_v22 = vmul.f32 %v1910_v25, %v4027_v32 }
 0x5ab   :  { %v1949_v29 = vadd.f32 %v1933_v15, %v4076_v10  ;;  %2312 = vperm.xlu1 %2736, %v3126_v52   ;;  %v4503_v52 = vld [vmem:[#allocation5_spill] sm:$0xff] }
 0x5ac   :  { %v4282_v6 = vadd.f32 %v1939_v22, %v4104_v23  ;;  %2317 = vperm.xlu0 %2735, %v3128_v38   ;;  %v1895_v19 = vpop.permute.xlu0 %1894 }
 0x5ad   :  { %v1936_v21 = vmul.f32 %v1895_v19, %v4012_v49  ;;  %v1920_v57 = vpop.permute.xlu1 %1919 }
 0x5ae   :  { %v1941_v27 = vmul.f32 %v4022_v20, %v1920_v57 }
 0x5af   :  { %v1952_v16 = vadd.f32 %v1936_v21, %v4100_v13 }
 0x5b0   :  { %v4288_v40 = vadd.f32 %v1941_v27, %v4236_v53  ;;  %v1905_v32 = vpop.permute.xlu0 %1904 }
 0x5b1   :  { %v1938_v62 = vmul.f32 %v4005_v5, %v1905_v32  ;;  %v4495_v5 = vld [vmem:[#allocation12_spill] sm:$0xff] }
 0x5b3   :  { %v1954_v10 = vadd.f32 %v1938_v62, %v4241_v37 }
 0x5b4   :  { %v1915_v34 = vpop.permute.xlu0 %1914 }
 0x5b5   :  { %v1940_v23 = vmul.f32 %v1915_v34, %v4036_v54 }
 0x5b7   :  { %v1956_v11 = vadd.f32 %v1940_v23, %v4249_v8  ;;  %v4496_v8 = vld [vmem:[#allocation10_spill] sm:$0xff] }
 0x5b8   :  { %v1925_v14 = vpop.permute.xlu0 %1924 }
 0x5b9   :  { %v1942_v49 = vmul.f32 %v4029_v24, %v1925_v14 }
 0x5bb   :  { %v4295_v2 = vadd.f32 %v1942_v49, %v1565_v1 }
 0x608   :  { %v2253_v20 = vpop.permute.xlu1 %2252 }
 0x609   :  { %v2322_v13 = vmul.f32 %v4108_v30, %v2253_v20  ;;  %v4497_v30 = vld [vmem:[#allocation18_spill] sm:$0xff] }
 0x60b   :  { %v2338_v53 = vadd.f32 %v2322_v13, %v4252_v39 }
 0x60c   :  { %v2293_v41 = vpop.permute.xlu1 %2292 }
 0x60d   :  { %2354 = vst.msk [vmem:[%s4390_s4 + $0x10] sm:$0xff] %vm76_vm0, %v2338_v53  ;;  %v2330_v54 = vmul.f32 %v4495_v5, %v2293_v41  ;;  %v2258_v37 = vpop.permute.xlu0 %2257 }
 0x60e   :  { %v2323_v42 = vmul.f32 %v4496_v8, %v2258_v37 }
 0x60f   :  { %v2346_v47 = vadd.f32 %v2330_v54, %v1953_v59 }
 0x610   :  { %v2339_v24 = vadd.f32 %v2323_v42, %v1946_v46  ;;  %v2243_v1 = vpop.permute.xlu1 %2242 }
 0x611   :  { %2362 = vst.msk [vmem:[%s4390_s4 + $0x50] sm:$0xff] %vm76_vm0, %v2346_v47  ;;  %v2320_v39 = vmul.f32 %v2243_v1, %v4497_v30  ;;  %v2298_v9 = vpop.permute.xlu0 %2297 }
 0x612   :  { %2355 = vst.msk [vmem:[%s4390_s4 + $0x18] sm:$0xff] %vm76_vm0, %v2339_v24  ;;  %v2331_v7 = vmul.f32 %v4498_v3, %v2298_v9 }
 0x613   :  { %v2336_v58 = vadd.f32 %v2320_v39, %v4263_v44 }
 0x614   :  { %v2347_v26 = vadd.f32 %v2331_v7, %v1954_v10  ;;  %v2283_v43 = vpop.permute.xlu1 %2282 }
 0x615   :  { %2352 = vst.msk [vmem:[%s4390_s4] sm:$0xff] %vm76_vm0, %v2336_v58  ;;  %v2328_v45 = vmul.f32 %v2283_v43, %v4499_v31  ;;  %v2248_v46 = vpop.permute.xlu0 %2247 }
 0x616   :  { %2363 = vst.msk [vmem:[%s4390_s4 + $0x58] sm:$0xff] %vm76_vm0, %v2347_v26  ;;  %v2321_v12 = vmul.f32 %v2248_v46, %v4500_v36 }
 0x617   :  { %v2344_v60 = vadd.f32 %v2328_v45, %v1951_v18 }
 0x618   :  { %v2337_v44 = vadd.f32 %v2321_v12, %v4244_v35  ;;  %v2273_v33 = vpop.permute.xlu1 %2272 }
 0x619   :  { %2360 = vst.msk [vmem:[%s4390_s4 + $0x40] sm:$0xff] %vm76_vm0, %v2344_v60  ;;  %v2326_v55 = vmul.f32 %v4501_v61, %v2273_v33  ;;  %v2288_v59 = vpop.permute.xlu0 %2287 }
 0x61a   :  { %2353 = vst.msk [vmem:[%s4390_s4 + $0x8] sm:$0xff] %vm76_vm0, %v2337_v44  ;;  %v2329_v15 = vmul.f32 %v2288_v59, %v4502_v48 }
 0x61b   :  { %v2342_v25 = vadd.f32 %v2326_v55, %v1949_v29 }
 0x61c   :  { %v2345_v18 = vadd.f32 %v2329_v15, %v1952_v16 }
 0x61d   :  { %2358 = vst.msk [vmem:[%s4390_s4 + $0x30] sm:$0xff] %vm76_vm0, %v2342_v25  ;;  %v2278_v35 = vpop.permute.xlu0 %2277 }
 0x61e   :  { %2361 = vst.msk [vmem:[%s4390_s4 + $0x48] sm:$0xff] %vm76_vm0, %v2345_v18  ;;  %v2327_v22 = vmul.f32 %v4503_v52, %v2278_v35 }
 0x620   :  { %v2343_v38 = vadd.f32 %v2327_v22, %v4266_v28  ;;  %v2263_v19 = vpop.permute.xlu1 %2262 }
 0x621   :  { %v2324_v21 = vmul.f32 %v2263_v19, %v4144_v17 }
 0x622   :  { %2359 = vst.msk [vmem:[%s4390_s4 + $0x38] sm:$0xff] %vm76_vm0, %v2343_v38  ;;  %v2268_v29 = vpop.permute.xlu0 %2267 }
 0x623   :  { %v2340_v57 = vadd.f32 %v2324_v21, %v4258_v56  ;;  %v2325_v27 = vmul.f32 %v2268_v29, %v4155_v4 }
 0x625   :  { %2356 = vst.msk [vmem:[%s4390_s4 + $0x20] sm:$0xff] %vm76_vm0, %v2340_v57  ;;  %v2341_v28 = vadd.f32 %v2325_v27, %v4275_v51 }
 0x626   :  { %v2303_v16 = vpop.permute.xlu1 %2302 }
 0x627   :  { %2357 = vst.msk [vmem:[%s4390_s4 + $0x28] sm:$0xff] %vm76_vm0, %v2341_v28  ;;  %v2332_v17 = vmul.f32 %v2303_v16, %v4150_v50  ;;  %v2308_v32 = vpop.permute.xlu0 %2307  ;;  %v4504_v50 = vld [vmem:[#allocation13_spill] sm:$0xff] }
 0x628   :  { %v2333_v56 = vmul.f32 %v2308_v32, %v4162_v63 }
 0x629   :  { %v2348_v4 = vadd.f32 %v2332_v17, %v4282_v6 }
 0x62a   :  { %v2349_v62 = vadd.f32 %v2333_v56, %v1956_v11  ;;  %v2313_v10 = vpop.permute.xlu1 %2312 }
 0x62b   :  { %2364 = vst.msk [vmem:[%s4390_s4 + $0x60] sm:$0xff] %vm76_vm0, %v2348_v4  ;;  %v2334_v51 = vmul.f32 %v4146_v0, %v2313_v10  ;;  %v2318_v34 = vpop.permute.xlu0 %2317 }
 0x62c   :  { %2365 = vst.msk [vmem:[%s4390_s4 + $0x68] sm:$0xff] %vm76_vm0, %v2349_v62  ;;  %v2335_v23 = vmul.f32 %v4504_v50, %v2318_v34 }
 0x62d   :  { %v2350_v63 = vadd.f32 %v2334_v51, %v4288_v40 }
 0x62e   :  { %v2351_v6 = vadd.f32 %v2335_v23, %v4295_v2 }
 0x62f   :  { %2366 = vst.msk [vmem:[%s4390_s4 + $0x70] sm:$0xff] %vm76_vm0, %v2350_v63 }
 0x630   :  { %2367 = vst.msk [vmem:[%s4390_s4 + $0x78] sm:$0xff] %vm76_vm0, %v2351_v6 }

// kernel: deepergcn_dagnn_dist_forward.15
= control target key start
LH: loop header
LB: loop body
LE: loop exit
PB: predicated region body
PF: predicated region fallthrough
CT: control target
= control target key end

     0   :  { %v2190_v0 = vlaneseq  ;;  %v1346_v37 = vmov 0.0   ;;  %v1348_v38 = vmov 0.0   ;;  %v1350_v39 = vmov 0.0   ;;  %s2180_s0 = inlined_call_operand.vmem [shape: f32[128,32], index: 0, kind: input, shape index: {}, may-alias: {0,1}]   ;;  %s2181_s1 = inlined_call_operand.vmem [shape: f32[128,32], index: 1, kind: input, shape index: {}, may-alias: {0,1}]   ;;  %s2182_s5 = inlined_call_operand.<no memory space> [shape: f32[1,1], index: 5, kind: input, shape index: {}]   ;;  %s2183_s6 = inlined_call_operand.vmem [shape: s32[128,1], index: 6, kind: input, shape index: {}]   ;;  %s2184_s7 = inlined_call_operand.vmem [shape: s32[1,128], index: 7, kind: input, shape index: {}]   ;;  %s2185_s8 = inlined_call_operand.vmem [shape: f32[128,128], index: 8, kind: output, shape index: {0}]   ;;  %s2186_s9 = inlined_call_operand.vmem [shape: f32[128,128], index: 9, kind: output, shape index: {1}]   ;;  %s2187_s2 = inlined_call_operand.vmem [shape: f32[128,1], index: 2, kind: input, shape index: {}]   ;;  %s2188_s4 = inlined_call_operand.vmem [shape: f32[1,32], index: 4, kind: input, shape index: {}]   ;;  %s2189_s3 = inlined_call_operand.vmem [shape: f32[1,128], index: 3, kind: input, shape index: {}]  }
   0x1   :  { %v15_v1 = vstv %s2182_s5  ;;  %v1176_v2 = vld [vmem:[%s2180_s0] sm:$0xff]  ;;  %v1181_v3 = vld [vmem:[%s2180_s0 + $0x8] sm:$0xff]  ;;  %v1186_v4 = vld [vmem:[%s2180_s0 + $0x10] sm:$0xff]  ;;  %v1352_v40 = vmov 0.0   ;;  %v1354_v41 = vmov 0.0   ;;  %v1356_v42 = vmov 0.0  }
   0x2   :  { %2192 = vst [vmem:[#allocation3_spill] sm:$0xff] %v1176_v2  ;;  %2193 = vst [vmem:[#allocation4_spill] sm:$0xff] %v1181_v3  ;;  %v1191_v5 = vld [vmem:[%s2180_s0 + $0x18] sm:$0xff]  ;;  %v1196_v6 = vld [vmem:[%s2180_s0 + $0x20] sm:$0xff]  ;;  %v1204_v8 = vand.u32 127, %v2190_v0  ;;  %v1358_v43 = vmov 0.0  }
   0x3   :  { %2194 = vst [vmem:[#allocation5_spill] sm:$0xff] %v1186_v4  ;;  %16 = vst [vmem:[#allocation2] sm:$0x1] %v15_v1  ;;  %v1201_v7 = vld [vmem:[%s2180_s0 + $0x28] sm:$0xff]  ;;  %v1209_v9 = vld [vmem:[%s2180_s0 + $0x30] sm:$0xff]  ;;  %v1360_v44 = vmov 0.0  }
   0x4   :  { %2195 = vst [vmem:[#allocation6_spill] sm:$0xff] %v1191_v5  ;;  %2196 = vst [vmem:[#allocation7_spill] sm:$0xff] %v1196_v6  ;;  %v1214_v10 = vld [vmem:[%s2180_s0 + $0x38] sm:$0xff]  ;;  %v1219_v11 = vld [vmem:[%s2180_s0 + $0x40] sm:$0xff]  ;;  %v1362_v45 = vmov 0.0   ;;  %v1364_v46 = vmov 0.0  }
   0x5   :  { %2197 = vst [vmem:[#allocation8_spill] sm:$0xff] %v1201_v7  ;;  %v1224_v12 = vld [vmem:[%s2180_s0 + $0x48] sm:$0xff]  ;;  %v1229_v13 = vld [vmem:[%s2180_s0 + $0x50] sm:$0xff]  ;;  %v1234_v14 = vld [vmem:[%s2180_s0 + $0x58] sm:$0xff]  ;;  %v1366_v47 = vmov 0.0   ;;  %v1368_v48 = vmov 0.0  }
   0x6   :  { %v1239_v15 = vld [vmem:[%s2180_s0 + $0x60] sm:$0xff]  ;;  %v1244_v16 = vld [vmem:[%s2180_s0 + $0x68] sm:$0xff]  ;;  %v1249_v17 = vld [vmem:[%s2180_s0 + $0x70] sm:$0xff]  ;;  %v1370_v49 = vmov 0.0   ;;  %v1372_v50 = vmov 0.0   ;;  %v1374_v51 = vmov 0.0  }
   0x7   :  { %v1254_v18 = vld [vmem:[%s2180_s0 + $0x78] sm:$0xff]  ;;  %v1259_v19 = vld [vmem:[%s2188_s4] ss:$0 sm:$0xff]  ;;  %v1269_v21 = vld [vmem:[%s2187_s2 + $0x8] sm:$0xff]  ;;  %v1376_v52 = vmov 0.0  }
   0x8   :  { %v1264_v20 = vld [vmem:[%s2187_s2] sm:$0xff]  ;;  %v1274_v22 = vld [vmem:[%s2187_s2 + $0x10] sm:$0xff]  ;;  %v1279_v23 = vld [vmem:[%s2187_s2 + $0x18] sm:$0xff] }
   0x9   :  { %v1284_v24 = vld [vmem:[%s2187_s2 + $0x20] sm:$0xff]  ;;  %v1289_v25 = vld [vmem:[%s2187_s2 + $0x28] sm:$0xff]  ;;  %v1294_v26 = vld [vmem:[%s2187_s2 + $0x30] sm:$0xff] }
   0xa   :  { %v1299_v27 = vld [vmem:[%s2187_s2 + $0x38] sm:$0xff]  ;;  %v1304_v28 = vld [vmem:[%s2187_s2 + $0x40] sm:$0xff]  ;;  %v1309_v29 = vld [vmem:[%s2187_s2 + $0x48] sm:$0xff] }
   0xb   :  { %v1314_v30 = vld [vmem:[%s2187_s2 + $0x50] sm:$0xff]  ;;  %v1319_v31 = vld [vmem:[%s2187_s2 + $0x58] sm:$0xff]  ;;  %v1324_v32 = vld [vmem:[%s2187_s2 + $0x60] sm:$0xff] }
   0xc   :  { %v1329_v33 = vld [vmem:[%s2187_s2 + $0x68] sm:$0xff]  ;;  %v1334_v34 = vld [vmem:[%s2187_s2 + $0x70] sm:$0xff]  ;;  %v1339_v35 = vld [vmem:[%s2187_s2 + $0x78] sm:$0xff]  ;;  %s1378_s2 = smov 0  }
   0xd   :  { %v1344_v36 = vld [vmem:[%s2189_s3] ss:$0 sm:$0xff] }
   0xe LB: > { %s91_s10 = scalar_lea.vmem %s2181_s1, %s1116_s2  ;;  %v2198_v4 = vld [vmem:[#allocation5_spill] sm:$0xff]  ;;  %v2199_v2 = vld [vmem:[#allocation3_spill] sm:$0xff]  ;;  %v2200_v5 = vld [vmem:[#allocation6_spill] sm:$0xff]  ;;  %vm151_vm0 = vcmask 261120   ;;  %s1116_s2 = sphi %s1378_s2, %s74_s2   ;;  %v1112_v52 = vphi %v1376_v52, %v2238_v52   ;;  %v1108_v51 = vphi %v1374_v51, %v2237_v51   ;;  %v1104_v50 = vphi %v1372_v50, %v2236_v50   ;;  %v1100_v49 = vphi %v1370_v49, %v2235_v49   ;;  %v1096_v48 = vphi %v1368_v48, %v2234_v48   ;;  %v1092_v47 = vphi %v1366_v47, %v2233_v47   ;;  %v1088_v46 = vphi %v1364_v46, %v2232_v46   ;;  %v1084_v45 = vphi %v1362_v45, %v2231_v45   ;;  %v1080_v44 = vphi %v1360_v44, %v2230_v44   ;;  %v1076_v43 = vphi %v1358_v43, %v2229_v43   ;;  %v1072_v42 = vphi %v1356_v42, %v2228_v42   ;;  %v1068_v41 = vphi %v1354_v41, %v2227_v41   ;;  %v1064_v40 = vphi %v1352_v40, %v2226_v40   ;;  %v1060_v39 = vphi %v1350_v39, %v2225_v39   ;;  %v1056_v38 = vphi %v1348_v38, %v2224_v38   ;;  %v1052_v37 = vphi %v1346_v37, %v2223_v37  }
   0xf   : > { %v1435_v53 = vld [vmem:[%s91_s10] ss:$0 sm:$0xff]  ;;  %v2203_v6 = vld [vmem:[#allocation7_spill] sm:$0xff] }
  0x10   : > { %v99_v54 = vsub.f32 %v2198_v4, %v1435_v53  ;;  %v97_v55 = vsub.f32 %v2199_v2, %v1435_v53  ;;  %v100_v56 = vsub.f32 %v2200_v5, %v1435_v53  ;;  %v2201_v3 = vld [vmem:[#allocation4_spill] sm:$0xff]  ;;  %v101_v59 = vsub.f32 %v2203_v6, %v1435_v53 }
  0x11   : > { %v98_v57 = vsub.f32 %v2201_v3, %v1435_v53  ;;  %v2202_v7 = vld [vmem:[#allocation8_spill] sm:$0xff]  ;;  %v104_v63 = vsub.f32 %v1214_v10, %v1435_v53  ;;  %v103_v4 = vsub.f32 %v1209_v9, %v1435_v53 }
  0x12   : > { %v102_v58 = vsub.f32 %v2202_v7, %v1435_v53  ;;  %v115_v60 = vand.u32 2147483647, %v99_v54  ;;  %v113_v61 = vand.u32 2147483647, %v97_v55  ;;  %v116_v62 = vand.u32 2147483647, %v100_v56 }
  0x13   : > { %v114_v1 = vand.u32 2147483647, %v98_v57  ;;  %v117_v2 = vand.u32 2147483647, %v101_v59  ;;  %v119_v59 = vand.u32 2147483647, %v103_v4 }
  0x14   : > { %v118_v0 = vand.u32 2147483647, %v102_v58  ;;  %v137_v3 = vmul.f32 %v1259_v19, %v115_v60  ;;  %v135_v5 = vmul.f32 %v1259_v19, %v113_v61  ;;  %v138_v7 = vmul.f32 %v1259_v19, %v116_v62 }
  0x15   : > { %v136_v6 = vmul.f32 %v1259_v19, %v114_v1  ;;  %v139_v57 = vmul.f32 %v1259_v19, %v117_v2  ;;  %v120_v58 = vand.u32 2147483647, %v104_v63  ;;  %v106_v62 = vsub.f32 %v1224_v12, %v1435_v53 }
  0x16   : > { %v158_v54 = vsel %vm151_vm0, %v137_v3, 0.0  ;;  %v152_v55 = vsel %vm151_vm0, %v135_v5, 0.0  ;;  %v140_v56 = vmul.f32 %v1259_v19, %v118_v0  ;;  %v161_v60 = vsel %vm151_vm0, %v138_v7, 0.0 }
  0x17   : > { %159 = vadd.xlane.f32.xlu1 %v158_v54  ;;  %153 = vadd.xlane.f32.xlu0 %v152_v55  ;;  %v155_v61 = vsel %vm151_vm0, %v136_v6, 0.0  ;;  %v105_v3 = vsub.f32 %v1219_v11, %v1435_v53  ;;  %v164_v0 = vsel %vm151_vm0, %v139_v57, 0.0  ;;  %v142_v2 = vmul.f32 %v1259_v19, %v120_v58 }
  0x18   : > { %v167_v5 = vsel %vm151_vm0, %v140_v56, 0.0  ;;  %v141_v4 = vmul.f32 %v1259_v19, %v119_v59  ;;  %v122_v63 = vand.u32 2147483647, %v106_v62  ;;  %v108_v6 = vsub.f32 %v1234_v14, %v1435_v53 }
  0x19   : > { %v121_v7 = vand.u32 2147483647, %v105_v3  ;;  %v107_v1 = vsub.f32 %v1229_v13, %v1435_v53  ;;  %v173_v54 = vsel %vm151_vm0, %v142_v2, 0.0  ;;  %v110_v56 = vsub.f32 %v1244_v16, %v1435_v53 }
  0x1a   : > { %v170_v55 = vsel %vm151_vm0, %v141_v4, 0.0  ;;  %v109_v57 = vsub.f32 %v1239_v15, %v1435_v53  ;;  %v144_v58 = vmul.f32 %v1259_v19, %v122_v63 }
  0x1b   : > { %162 = vadd.xlane.f32.xlu1 %v161_v60  ;;  %156 = vadd.xlane.f32.xlu0 %v155_v61  ;;  %v143_v59 = vmul.f32 %v1259_v19, %v121_v7  ;;  %v124_v60 = vand.u32 2147483647, %v108_v6  ;;  %v123_v61 = vand.u32 2147483647, %v107_v1  ;;  %v126_v62 = vand.u32 2147483647, %v110_v56 }
  0x1c   : > { %v125_v3 = vand.u32 2147483647, %v109_v57  ;;  %v179_v2 = vsel %vm151_vm0, %v144_v58, 0.0 }
  0x1d   : > { %v176_v4 = vsel %vm151_vm0, %v143_v59, 0.0  ;;  %v146_v63 = vmul.f32 %v1259_v19, %v124_v60  ;;  %v145_v7 = vmul.f32 %v1259_v19, %v123_v61  ;;  %v148_v6 = vmul.f32 %v1259_v19, %v126_v62 }
  0x1f   : > { %168 = vadd.xlane.f32.xlu1 %v167_v5  ;;  %165 = vadd.xlane.f32.xlu0 %v164_v0  ;;  %v112_v5 = vsub.f32 %v1254_v18, %v1435_v53  ;;  %v111_v0 = vsub.f32 %v1249_v17, %v1435_v53  ;;  %v147_v53 = vmul.f32 %v1259_v19, %v125_v3  ;;  %v191_v57 = vsel %vm151_vm0, %v148_v6, 0.0 }
  0x20   : > { %v200_v3 = vstv %s1116_s2  ;;  %s74_s2 = sadd.s32 1, %s1116_s2  }
  0x21   : > { %v128_v1 = vand.u32 2147483647, %v112_v5  ;;  %v127_v56 = vand.u32 2147483647, %v111_v0  ;;  %v188_v58 = vsel %vm151_vm0, %v147_v53, 0.0  ;;  %vm1503_vm1 = vcmp.eq.s32.totalorder %v1204_v8, %v200_v3  ;;  %p1588_p0 = scmp.ge.s32.totalorder %s74_s2, 128  }
  0x22   :  { %v1118_v5 = vmov (%p1588_p0), 0   ;;  %v396_v9 = vld [vmem:[%s2183_s6] sm:$0xff] (%p1588_p0)  ;;  %v824_v10 = vld [vmem:[#allocation2] ss:$0 sm:$0xff] (%p1588_p0)  ;;  %v397_v12 = vld [vmem:[%s2183_s6 + $0x8] sm:$0xff] (%p1588_p0) }
  0x23   : > { %174 = vadd.xlane.f32.xlu1 %v173_v54  ;;  %171 = vadd.xlane.f32.xlu0 %v170_v55  ;;  %v185_v54 = vsel %vm151_vm0, %v146_v63, 0.0  ;;  %v182_v55 = vsel %vm151_vm0, %v145_v7, 0.0  ;;  %v150_v59 = vmul.f32 %v1259_v19, %v128_v1  ;;  %v149_v60 = vmul.f32 %v1259_v19, %v127_v56  ;;  %v398_v11 = vld [vmem:[%s2183_s6 + $0x10] sm:$0xff] (%p1588_p0)  ;;  %v400_v13 = vld [vmem:[%s2183_s6 + $0x20] sm:$0xff] (%p1588_p0)  ;;  %v399_v14 = vld [vmem:[%s2183_s6 + $0x18] sm:$0xff] (%p1588_p0) }
  0x24   :  { %981 = vset.pattern.permute.xlu1 (%p1588_p0), %v1118_v5  ;;  %980 = vset.pattern.permute.xlu0 (%p1588_p0), %v1118_v5  ;;  %v402_v15 = vld [vmem:[%s2183_s6 + $0x30] sm:$0xff] (%p1588_p0)  ;;  %v401_v16 = vld [vmem:[%s2183_s6 + $0x28] sm:$0xff] (%p1588_p0)  ;;  %v404_v17 = vld [vmem:[%s2183_s6 + $0x40] sm:$0xff] (%p1588_p0)  ;;  %vm519_vm2 = vcmp.ge.s32.totalorder (%p1588_p0), %v396_v9, 0  ;;  %vm520_vm3 = vcmp.ge.s32.totalorder (%p1588_p0), %v397_v12, 0  ;;  %vm521_vm4 = vcmp.ge.s32.totalorder (%p1588_p0), %v398_v11, 0 }
  0x25   : > { %v197_v61 = vsel %vm151_vm0, %v150_v59, 0.0  ;;  %v194_v62 = vsel %vm151_vm0, %v149_v60, 0.0  ;;  %v403_v18 = vld [vmem:[%s2183_s6 + $0x38] sm:$0xff] (%p1588_p0)  ;;  %v406_v19 = vld [vmem:[%s2183_s6 + $0x50] sm:$0xff] (%p1588_p0)  ;;  %vm522_vm5 = vcmp.ge.s32.totalorder (%p1588_p0), %v399_v14, 0  ;;  %vm523_vm6 = vcmp.ge.s32.totalorder (%p1588_p0), %v400_v13, 0 }
  0x26   :  { %vm524_vm7 = vcmp.ge.s32.totalorder (%p1588_p0), %v401_v16, 0  ;;  %vm525_vm8 = vcmp.ge.s32.totalorder (%p1588_p0), %v402_v15, 0  ;;  %vm526_vm9 = vcmp.ge.s32.totalorder (%p1588_p0), %v403_v18, 0  ;;  %vm527_vm10 = vcmp.ge.s32.totalorder (%p1588_p0), %v404_v17, 0 }
  0x27   : > { %180 = vadd.xlane.f32.xlu1 %v179_v2  ;;  %177 = vadd.xlane.f32.xlu0 %v176_v4  ;;  %vm529_vm12 = vcmp.ge.s32.totalorder (%p1588_p0), %v406_v19, 0 }
  0x2b   : > { %186 = vadd.xlane.f32.xlu1 %v185_v54  ;;  %183 = vadd.xlane.f32.xlu0 %v182_v55 }
  0x2f   : > { %192 = vadd.xlane.f32.xlu1 %v191_v57  ;;  %189 = vadd.xlane.f32.xlu0 %v188_v58 }
  0x33   : > { %198 = vadd.xlane.f32.xlu1 %v197_v61  ;;  %195 = vadd.xlane.f32.xlu0 %v194_v62 }
  0x44   :  { %232 = vperm.xlu1 (%p1588_p0), %981, %v1274_v22   ;;  %v407_v22 = vld [vmem:[%s2183_s6 + $0x58] sm:$0xff] (%p1588_p0) }
  0x45   :  { %vm530_vm13 = vcmp.ge.s32.totalorder (%p1588_p0), %v407_v22, 0 }
  0x48   :  { %237 = vperm.xlu1 (%p1588_p0), %981, %v1279_v23   ;;  %v410_v23 = vld [vmem:[%s2183_s6 + $0x70] sm:$0xff] (%p1588_p0) }
  0x49   :  { %222 = vperm.xlu0 (%p1588_p0), %980, %v1264_v20   ;;  %v405_v20 = vld [vmem:[%s2183_s6 + $0x48] sm:$0xff] (%p1588_p0)  ;;  %vm533_vm0 = vcmp.ge.s32.totalorder (%p1588_p0), %v410_v23, 0 }
  0x4a   :  { %vm528_vm11 = vcmp.ge.s32.totalorder (%p1588_p0), %v405_v20, 0 }
  0x4c   :  { %247 = vperm.xlu1 (%p1588_p0), %981, %v1289_v25   ;;  %v411_v25 = vld [vmem:[%s2183_s6 + $0x78] sm:$0xff] (%p1588_p0) }
  0x4d   :  { %227 = vperm.xlu0 (%p1588_p0), %980, %v1269_v21   ;;  %v408_v21 = vld [vmem:[%s2183_s6 + $0x60] sm:$0xff] (%p1588_p0) }
  0x4e   :  { %vm531_vm14 = vcmp.ge.s32.totalorder (%p1588_p0), %v408_v21, 0 }
  0x50   :  { %257 = vperm.xlu1 (%p1588_p0), %981, %v1299_v27   ;;  %v536_v27 = vsel (%p1588_p0), %vm520_vm3, 1, %v1118_v5 }
  0x51   :  { %242 = vperm.xlu0 (%p1588_p0), %980, %v1284_v24   ;;  %v409_v24 = vld [vmem:[%s2183_s6 + $0x68] sm:$0xff] (%p1588_p0) }
  0x52   :  { %vm532_vm15 = vcmp.ge.s32.totalorder (%p1588_p0), %v409_v24, 0 }
  0x54   :  { %267 = vperm.xlu1 (%p1588_p0), %981, %v1309_v29   ;;  %v538_v29 = vsel (%p1588_p0), %vm522_vm5, 1, %v1118_v5 }
  0x55   :  { %252 = vperm.xlu0 (%p1588_p0), %980, %v1294_v26   ;;  %v535_v26 = vsel (%p1588_p0), %vm519_vm2, 1, %v1118_v5 }
  0x58   :  { %277 = vperm.xlu1 (%p1588_p0), %981, %v1319_v31   ;;  %v540_v31 = vsel (%p1588_p0), %vm524_vm7, 1, %v1118_v5 }
  0x59   :  { %262 = vperm.xlu0 (%p1588_p0), %980, %v1304_v28   ;;  %v537_v28 = vsel (%p1588_p0), %vm521_vm4, 1, %v1118_v5 }
  0x5c   :  { %287 = vperm.xlu1 (%p1588_p0), %981, %v1329_v33   ;;  %v542_v33 = vsel (%p1588_p0), %vm526_vm9, 1, %v1118_v5 }
  0x5d   :  { %272 = vperm.xlu0 (%p1588_p0), %980, %v1314_v30   ;;  %v539_v30 = vsel (%p1588_p0), %vm523_vm6, 1, %v1118_v5 }
  0x60   :  { %297 = vperm.xlu1 (%p1588_p0), %981, %v1339_v35   ;;  %v544_v35 = vsel (%p1588_p0), %vm528_vm11, 1, %v1118_v5 }
  0x61   :  { %282 = vperm.xlu0 (%p1588_p0), %980, %v1324_v32   ;;  %v541_v32 = vsel (%p1588_p0), %vm525_vm8, 1, %v1118_v5 }
  0x64   :  { %452 = vperm.xlu1 (%p1588_p0), %981, %v396_v9  }
  0x65   :  { %292 = vperm.xlu0 (%p1588_p0), %980, %v1334_v34   ;;  %v543_v34 = vsel (%p1588_p0), %vm527_vm10, 1, %v1118_v5 }
  0x68   :  { %458 = vperm.xlu1 (%p1588_p0), %981, %v398_v11  }
  0x69   :  { %377 = vperm.xlu0 (%p1588_p0), %980, %v824_v10  }
  0x6c   :  { %464 = vperm.xlu1 (%p1588_p0), %981, %v400_v13  }
  0x6d   :  { %455 = vperm.xlu0 (%p1588_p0), %980, %v397_v12  }
  0x70   :  { %470 = vperm.xlu1 (%p1588_p0), %981, %v402_v15  }
  0x71   :  { %461 = vperm.xlu0 (%p1588_p0), %980, %v399_v14  }
  0x74   :  { %476 = vperm.xlu1 (%p1588_p0), %981, %v404_v17  }
  0x75   :  { %467 = vperm.xlu0 (%p1588_p0), %980, %v401_v16  }
  0x78   :  { %482 = vperm.xlu1 (%p1588_p0), %981, %v406_v19  }
  0x79   :  { %473 = vperm.xlu0 (%p1588_p0), %980, %v403_v18  }
  0x7c   :  { %488 = vperm.xlu1 (%p1588_p0), %981, %v408_v21  }
  0x7d   :  { %479 = vperm.xlu0 (%p1588_p0), %980, %v405_v20  }
  0x80   :  { %494 = vperm.xlu1 (%p1588_p0), %981, %v410_v23  }
  0x81   :  { %485 = vperm.xlu0 (%p1588_p0), %980, %v407_v22  }
  0x84   :  { %552 = vperm.xlu1 (%p1588_p0), %981, %v535_v26  }
  0x85   :  { %491 = vperm.xlu0 (%p1588_p0), %980, %v409_v24  }
  0x88   :  { %558 = vperm.xlu1 (%p1588_p0), %981, %v537_v28  }
  0x89   :  { %497 = vperm.xlu0 (%p1588_p0), %980, %v411_v25  }
  0x8c   :  { %564 = vperm.xlu1 (%p1588_p0), %981, %v539_v30  }
  0x8d   :  { %555 = vperm.xlu0 (%p1588_p0), %980, %v536_v27  }
  0x90   :  { %570 = vperm.xlu1 (%p1588_p0), %981, %v541_v32  }
  0x91   :  { %561 = vperm.xlu0 (%p1588_p0), %980, %v538_v29  }
  0x94   :  { %576 = vperm.xlu1 (%p1588_p0), %981, %v543_v34  }
  0x95   :  { %567 = vperm.xlu0 (%p1588_p0), %980, %v540_v31   ;;  %v2241_v31 = vlaneseq (%p1588_p0) }
  0x97   :  { %v1781_v32 = vshrl.u32 (%p1588_p0), %v2241_v31, 7 }
  0x99   :  { %573 = vperm.xlu0 (%p1588_p0), %980, %v542_v33   ;;  %vm631_vm2 = vcmp.ne.s32.totalorder (%p1588_p0), %v1781_v32, %v1204_v8 }
  0x9d   :  { %579 = vperm.xlu0 (%p1588_p0), %980, %v544_v35  }
  0xa4   : > { %v160_v0 = vpop.xlane.xlu1 %159  ;;  %v154_v2 = vpop.xlane.xlu0 %153 }
  0xa5   : > { %v1510_v50 = vsel %vm1503_vm1, %v160_v0, %v1104_v50   ;;  %v1515_v52 = vsel %vm1503_vm1, %v154_v2, %v1112_v52  }
  0xa6   : > { %v2206_v4 = vmov %v1510_v50  ;;  %v2207_v63 = vmov %v1515_v52 }
  0xa7   :  { %v340_v28 = vmul.f32 (%p1588_p0), 0.5, %v2206_v4  ;;  %v338_v29 = vmul.f32 (%p1588_p0), 0.5, %v2207_v63 }
  0xa8   : > { %v163_v7 = vpop.xlane.xlu1 %162  ;;  %v157_v6 = vpop.xlane.xlu0 %156 }
  0xa9   : > { %v1520_v49 = vsel %vm1503_vm1, %v163_v7, %v1100_v49   ;;  %v1525_v51 = vsel %vm1503_vm1, %v157_v6, %v1108_v51  }
  0xaa   : > { %v2208_v1 = vmov %v1520_v49  ;;  %v2209_v54 = vmov %v1525_v51 }
  0xab   :  { %v1778_v30 = vmul.f32 (%p1588_p0), 0.5, %v2208_v1  ;;  %v339_v33 = vmul.f32 (%p1588_p0), 0.5, %v2209_v54 }
  0xac   : > { %v169_v55 = vpop.xlane.xlu1 %168  ;;  %v166_v53 = vpop.xlane.xlu0 %165 }
  0xad   : > { %v1530_v47 = vsel %vm1503_vm1, %v169_v55, %v1092_v47   ;;  %v1535_v48 = vsel %vm1503_vm1, %v166_v53, %v1096_v48  }
  0xae   : > { %v2210_v56 = vmov %v1530_v47  ;;  %v2211_v57 = vmov %v1535_v48 }
  0xaf   :  { %v1785_v34 = vmul.f32 (%p1588_p0), 0.5, %v2210_v56  ;;  %v1788_v35 = vmul.f32 (%p1588_p0), 0.5, %v2211_v57 }
  0xb0   : > { %v175_v50 = vpop.xlane.xlu1 %174  ;;  %v172_v52 = vpop.xlane.xlu0 %171 }
  0xb1   : > { %v1540_v45 = vsel %vm1503_vm1, %v175_v50, %v1084_v45   ;;  %v1545_v46 = vsel %vm1503_vm1, %v172_v52, %v1088_v46   ;;  %v2236_v50 = vmov %v2206_v4  ;;  %v2238_v52 = vmov %v2207_v63 }
  0xb2   : > { %v2212_v58 = vmov %v1540_v45  ;;  %v2213_v59 = vmov %v1545_v46 }
  0xb4   : > { %v181_v49 = vpop.xlane.xlu1 %180  ;;  %v178_v51 = vpop.xlane.xlu0 %177 }
  0xb5   : > { %v1550_v43 = vsel %vm1503_vm1, %v181_v49, %v1076_v43   ;;  %v1555_v44 = vsel %vm1503_vm1, %v178_v51, %v1080_v44   ;;  %v2235_v49 = vmov %v2208_v1  ;;  %v2237_v51 = vmov %v2209_v54 }
  0xb6   : > { %v2214_v60 = vmov %v1550_v43  ;;  %v2215_v61 = vmov %v1555_v44 }
  0xb7   :  { %v1802_v54 = vmul.f32 (%p1588_p0), 0.5, %v2214_v60 }
  0xb8   : > { %v187_v47 = vpop.xlane.xlu1 %186  ;;  %v184_v48 = vpop.xlane.xlu0 %183 }
  0xb9   : > { %v1560_v41 = vsel %vm1503_vm1, %v187_v47, %v1068_v41   ;;  %v1565_v42 = vsel %vm1503_vm1, %v184_v48, %v1072_v42   ;;  %v2233_v47 = vmov %v2210_v56  ;;  %v2234_v48 = vmov %v2211_v57 }
  0xba   : > { %v2216_v62 = vmov %v1560_v41  ;;  %v2217_v3 = vmov %v1565_v42  ;;  %v1805_v56 = vadd.s32 (%p1588_p0), 8, %v1781_v32  ;;  %v1808_v57 = vmul.f32 (%p1588_p0), 0.5, %v2215_v61 }
  0xbb   : > { %v2227_v41 = vmov %v2216_v62  ;;  %v2228_v42 = vmov %v2217_v3 }
  0xbc   : > { %v193_v45 = vpop.xlane.xlu1 %192  ;;  %v190_v46 = vpop.xlane.xlu0 %189  ;;  %v549_v41 = vsel (%p1588_p0), %vm533_vm0, 1, %v1118_v5  ;;  %vm632_vm3 = vcmp.ne.s32.totalorder (%p1588_p0), %v1805_v56, %v1204_v8 }
  0xbd   : > { %v1570_v39 = vsel %vm1503_vm1, %v193_v45, %v1060_v39   ;;  %v1575_v40 = vsel %vm1503_vm1, %v190_v46, %v1064_v40   ;;  %v2231_v45 = vmov %v2212_v58  ;;  %v2232_v46 = vmov %v2213_v59  ;;  %73 = sbr.rel (!%p1588_p0) target bundleno = 14 (0xe), region = 68 }
  0xbe   : > { %v2218_v0 = vmov %v1570_v39  ;;  %v2219_v2 = vmov %v1575_v40 }
  0xbf   : > { %v2225_v39 = vmov %v2218_v0  ;;  %v2226_v40 = vmov %v2219_v2 }
  0xc0   : > { %v199_v43 = vpop.xlane.xlu1 %198  ;;  %v196_v44 = vpop.xlane.xlu0 %195  ;;  %v547_v39 = vsel (%p1588_p0), %vm531_vm14, 1, %v1118_v5  ;;  %v548_v40 = vsel (%p1588_p0), %vm532_vm15, 1, %v1118_v5 }
  0xc1   : > { %v1580_v37 = vsel %vm1503_vm1, %v199_v43, %v1052_v37   ;;  %v1585_v38 = vsel %vm1503_vm1, %v196_v44, %v1056_v38   ;;  %v2229_v43 = vmov %v2214_v60  ;;  %v2230_v44 = vmov %v2215_v61 }
  0xc2   : > { %v2220_v7 = vmov %v1580_v37  ;;  %v2221_v6 = vmov %v1585_v38  ;;  %vm534_vm1 = vcmp.ge.s32.totalorder (%p1588_p0), %v411_v25, 0  ;;  %v1821_v60 = vmul.f32 (%p1588_p0), 0.5, %v2218_v0 }
  0xc3   : > { %v2223_v37 = vmov %v2220_v7  ;;  %v2224_v38 = vmov %v2221_v6  ;;  %v550_v42 = vsel (%p1588_p0), %vm534_vm1, 1, %v1118_v5  ;;  %v353_v13 = vmul.f32 (%p1588_p0), 0.5, %v2220_v7 }
  0xc4   :  { %v545_v37 = vsel %vm529_vm12, 1, %v1118_v5  ;;  %v546_v38 = vsel %vm530_vm13, 1, %v1118_v5  ;;  %v233_v55 = vpop.permute.xlu1 %232  ;;  %2244 = vst [vmem:[#allocation7_spill] sm:$0xff] %v1821_v60  ;;  %v1827_v61 = vmul.f32 0.5, %v2221_v6  ;;  %v1845_v6 = vadd.s32 40, %v1781_v32 }
  0xc5   :  { %582 = vperm.xlu1 %981, %v545_v37   ;;  %585 = vperm.xlu0 %980, %v546_v38   ;;  %v1791_v37 = vmul.f32 0.5, %v2212_v58  ;;  %v1799_v38 = vmul.f32 0.5, %v2213_v59  ;;  %v1811_v58 = vmul.f32 0.5, %v2216_v62  ;;  %v308_v59 = vadd.f32 %v1344_v36, %v233_v55 }
  0xc6   :  { %2246 = vst [vmem:[#allocation9_spill] sm:$0xff] %v1827_v61  ;;  %v1837_v55 = vadd.s32 24, %v1781_v32  ;;  %vm636_vm11 = vcmp.ne.s32.totalorder %v1845_v6, %v1204_v8 }
  0xc8   :  { %v223_v53 = vpop.permute.xlu0 %222  ;;  %v238_v50 = vpop.permute.xlu1 %237  ;;  %vm634_vm5 = vcmp.ne.s32.totalorder %v1837_v55, %v1204_v8 }
  0xc9   :  { %588 = vperm.xlu1 %981, %v547_v39   ;;  %591 = vperm.xlu0 %980, %v548_v40   ;;  %v306_v1 = vadd.f32 %v1344_v36, %v223_v53  ;;  %v1814_v39 = vmul.f32 0.5, %v2217_v3  ;;  %v1817_v40 = vadd.s32 16, %v1781_v32  ;;  %v309_v53 = vadd.f32 %v1344_v36, %v238_v50 }
  0xcb   :  { %v322_v0 = vmul.f32 0.5, %v306_v1  ;;  %vm633_vm4 = vcmp.ne.s32.totalorder %v1817_v40, %v1204_v8 }
  0xcc   :  { %v228_v52 = vpop.permute.xlu0 %227  ;;  %v248_v49 = vpop.permute.xlu1 %247 }
  0xcd   :  { %594 = vperm.xlu1 %981, %v549_v41   ;;  %597 = vperm.xlu0 %980, %v550_v42   ;;  %v1824_v41 = vmul.f32 0.5, %v2219_v2  ;;  %v307_v62 = vadd.f32 %v1344_v36, %v228_v52  ;;  %v1842_v2 = vadd.s32 32, %v1781_v32  ;;  %v311_v52 = vadd.f32 %v1344_v36, %v248_v49 }
  0xce   :  { %v1865_v49 = vadd.s32 64, %v1781_v32 }
  0xcf   :  { %2245 = vst [vmem:[#allocation8_spill] sm:$0xff] %v1824_v41  ;;  %v323_v31 = vmul.f32 0.5, %v307_v62  ;;  %v1884_v62 = vadd.s32 88, %v1781_v32  ;;  %v327_v61 = vmul.f32 0.5, %v311_v52  ;;  %vm635_vm9 = vcmp.ne.s32.totalorder %v1842_v2, %v1204_v8 }
  0xd0   :  { %v1726_v51 = vpop.permute.xlu0 %242  ;;  %v1728_v47 = vpop.permute.xlu1 %257  ;;  %v1119_v41 = vmov 0.0  }
  0xd1   :  { %v310_v50 = vadd.f32 %v1344_v36, %v1726_v51  ;;  %v313_v1 = vadd.f32 %v1344_v36, %v1728_v47  ;;  %v1879_v51 = vadd.s32 80, %v1781_v32  ;;  %v325_v47 = vmul.f32 0.5, %v309_v53 }
  0xd2   :  { %v355_v53 = vadd.f32 %v339_v33, %v323_v31  ;;  %v1911_v33 = vadd.f32 %v1785_v34, %v327_v61 }
  0xd3   :  { %v329_v52 = vmul.f32 0.5, %v313_v1 }
  0xd4   :  { %v1730_v48 = vpop.permute.xlu0 %252  ;;  %v1732_v45 = vpop.permute.xlu1 %267 }
  0xd8   :  { %v1734_v46 = vpop.permute.xlu0 %262  ;;  %v1736_v43 = vpop.permute.xlu1 %277 }
  0xdc   :  { %v1738_v44 = vpop.permute.xlu0 %272  ;;  %v1740_v5 = vpop.permute.xlu1 %287 }
  0xe0   :  { %v1742_v9 = vpop.permute.xlu0 %282  ;;  %v298_v10 = vpop.permute.xlu1 %297 }
  0xe1   :  { %v321_v12 = vadd.f32 %v1344_v36, %v298_v10  ;;  %v1852_v10 = vld [vmem:[%s2184_s7] ss:$0 sm:$0xff] }
  0xe3   :  { %v337_v14 = vmul.f32 0.5, %v321_v12  ;;  %v1857_v12 = vadd.s32 48, %v1781_v32 }
  0xe4   :  { %v1744_v11 = vpop.permute.xlu0 %292  ;;  %v1748_v15 = vpop.permute.xlu1 %452 }
  0xe5   :  { %v369_v17 = vadd.f32 %v353_v13, %v337_v14  ;;  %v1860_v13 = vadd.s32 56, %v1781_v32  ;;  %v324_v14 = vmul.f32 0.5, %v308_v59  ;;  %v354_v59 = vadd.f32 %v338_v29, %v322_v0 }
  0xe6   :  { %vm503_vm6 = vcmp.eq.s32.totalorder %v1748_v15, %v1852_v10  ;;  %v326_v0 = vmul.f32 0.5, %v310_v50  ;;  %v314_v50 = vadd.f32 %v1344_v36, %v1734_v46  ;;  %vm637_vm0 = vcmp.ne.s32.totalorder %v1857_v12, %v1204_v8 }
  0xe7   :  { %v356_v29 = vadd.f32 %v340_v28, %v324_v14  ;;  %v315_v14 = vadd.f32 %v1344_v36, %v1732_v45  ;;  %v1927_v45 = vadd.f32 %v1791_v37, %v329_v52 }
  0xe8   :  { %v1750_v16 = vpop.permute.xlu0 %377  ;;  %v1752_v18 = vpop.permute.xlu1 %458 }
  0xe9   :  { %v1757_v20 = vadd.f32 %v1750_v16, %v369_v17  ;;  %v1868_v17 = vadd.s32 72, %v1781_v32  ;;  %v380_v15 = vadd.f32 %v1750_v16, %v354_v59  ;;  %vm505_vm1 = vcmp.eq.s32.totalorder %v1752_v18, %v1852_v10 }
  0xeb   :  { %2239 = vst [vmem:[#allocation3_spill] sm:$0xff] %v1757_v20  ;;  %v312_v20 = vadd.f32 %v1344_v36, %v1730_v48  ;;  %v1889_v48 = vadd.s32 96, %v1781_v32 }
  0xec   :  { %v1754_v19 = vpop.permute.xlu0 %455  ;;  %v1759_v21 = vpop.permute.xlu1 %464 }
  0xed   :  { %vm504_vm12 = vcmp.eq.s32.totalorder %v1754_v19, %v1852_v10  ;;  %v358_v19 = vadd.f32 %v1788_v35, %v326_v0 }
  0xef   :  { %v384_v31 = vadd.f32 %v1750_v16, %v358_v19 }
  0xf0   :  { %v1761_v22 = vpop.permute.xlu0 %461  ;;  %v1763_v23 = vpop.permute.xlu1 %470 }
  0xf4   :  { %v1765_v7 = vpop.permute.xlu0 %467  ;;  %v1767_v24 = vpop.permute.xlu1 %476 }
  0xf8   :  { %v1769_v25 = vpop.permute.xlu0 %473  ;;  %v1771_v26 = vpop.permute.xlu1 %482 }
  0xf9   :  { %2240 = vst [vmem:[#allocation4_spill] sm:$0xff] %v1771_v26 }
  0xfc   :  { %v1773_v27 = vpop.permute.xlu0 %479  ;;  %v1793_v4 = vpop.permute.xlu1 %488 }
  0xfd   :  { %2242 = vst [vmem:[#allocation5_spill] sm:$0xff] %v1793_v4  ;;  %v328_v4 = vmul.f32 0.5, %v312_v20  ;;  %v357_v20 = vadd.f32 %v1778_v30, %v325_v47  ;;  %v381_v30 = vadd.f32 %v1750_v16, %v355_v53 }
  0xff   :  { %v360_v46 = vadd.f32 %v1799_v38, %v328_v4  ;;  %v330_v4 = vmul.f32 0.5, %v314_v50  ;;  %v383_v61 = vadd.f32 %v1750_v16, %v357_v20  ;;  %v318_v50 = vadd.f32 %v1344_v36, %v1742_v9 }
 0x100   :  { %v1795_v63 = vpop.permute.xlu0 %485  ;;  %v1830_v42 = vpop.permute.xlu1 %494 }
 0x101   :  { %2243 = vst [vmem:[#allocation6_spill] sm:$0xff] %v1795_v63  ;;  %2247 = vst [vmem:[#allocation10_spill] sm:$0xff] %v1830_v42  ;;  %v386_v53 = vadd.f32 %v1750_v16, %v360_v46  ;;  %v334_v46 = vmul.f32 0.5, %v318_v50 }
 0x104   :  { %v1832_v3 = vpop.permute.xlu0 %491 }
 0x105   :  { %2248 = vst [vmem:[#allocation11_spill] sm:$0xff] %v1832_v3  ;;  %v553_v3 = vpop.permute.xlu1 %552 }
 0x106   :  { %vm599_vm7 = vcmp.eq.s32.totalorder %v553_v3, 1  ;;  %v1899_v3 = vadd.s32 112, %v1781_v32 }
 0x107   :  { %vm615_vm8 = vmand %vm503_vm6, %vm599_vm7  ;;  %vm638_vm7 = vcmp.ne.s32.totalorder %v1860_v13, %v1204_v8 }
 0x108   :  { %v1874_v42 = vpop.permute.xlu0 %497  ;;  %vm647_vm10 = vmand %vm615_vm8, %vm631_vm2  ;;  %vm506_vm8 = vcmp.eq.s32.totalorder %v1761_v22, %v1852_v10  ;;  %v317_v22 = vadd.f32 %v1344_v36, %v1736_v43  ;;  %v316_v43 = vadd.f32 %v1344_v36, %v1738_v44 }
 0x109   :  { %2249 = vst [vmem:[#allocation12_spill] sm:$0xff] %v1874_v42  ;;  %v1892_v42 = vadd.s32 104, %v1781_v32  ;;  %v826_v60 = vsel %vm647_vm10, 1.0, %v1119_v41  ;;  %v559_v26 = vpop.permute.xlu1 %558 }
 0x10a   :  { %695 = vst [vmem:[%s2186_s9] sm:$0xff] %v826_v60  ;;  %v711_v28 = vmul.f32 %v826_v60, %v380_v15  ;;  %vm601_vm14 = vcmp.eq.s32.totalorder %v559_v26, 1  ;;  %v382_v60 = vadd.f32 %v1750_v16, %v356_v29  ;;  %v331_v26 = vmul.f32 0.5, %v315_v14 }
 0x10b   :  { %vm617_vm6 = vmand %vm505_vm1, %vm601_vm14  ;;  %vm639_vm14 = vcmp.ne.s32.totalorder %v1865_v49, %v1204_v8  ;;  %vm508_vm1 = vcmp.eq.s32.totalorder %v1765_v7, %v1852_v10  ;;  %v362_v29 = vadd.f32 %v1808_v57, %v330_v4  ;;  %v333_v0 = vmul.f32 0.5, %v317_v22 }
 0x10c   :  { %v556_v63 = vpop.permute.xlu0 %555  ;;  %v1979_v47 = vadd.f32 %v1802_v54, %v331_v26  ;;  %v385_v7 = vadd.f32 %v1750_v16, %v1911_v33  ;;  %v332_v2 = vmul.f32 0.5, %v316_v43  ;;  %v319_v14 = vadd.f32 %v1344_v36, %v1740_v5 }
 0x10d   :  { %vm600_vm13 = vcmp.eq.s32.totalorder %v556_v63, 1  ;;  %v727_v63 = vmax.f32 %v711_v28, 0.0  ;;  %v565_v18 = vpop.permute.xlu1 %564  ;;  %v2018_v33 = vadd.f32 %v1811_v58, %v333_v0  ;;  %v388_v12 = vadd.f32 %v1750_v16, %v362_v29 }
 0x10e   :  { %vm616_vm15 = vmand %vm504_vm12, %vm600_vm13  ;;  %vm603_vm12 = vcmp.eq.s32.totalorder %v565_v18, 1  ;;  %v2251_v18 = vld [vmem:[#allocation6_spill] sm:$0xff] }
 0x10f   :  { %vm648_vm2 = vmand %vm616_vm15, %vm632_vm3  ;;  %743 = vst [vmem:[%s2185_s8] sm:$0xff] %v727_v63  ;;  %vm507_vm15 = vcmp.eq.s32.totalorder %v1759_v21, %v1852_v10 }
 0x110   :  { %v827_v34 = vsel %vm648_vm2, 1.0, %v1119_v41  ;;  %v562_v35 = vpop.permute.xlu0 %561  ;;  %vm649_vm3 = vmand %vm617_vm6, %vm633_vm4  ;;  %vm640_vm6 = vcmp.ne.s32.totalorder %v1868_v17, %v1204_v8 }
 0x111   :  { %696 = vst [vmem:[%s2186_s9 + $0x8] sm:$0xff] %v827_v34  ;;  %v712_v37 = vmul.f32 %v827_v34, %v381_v30  ;;  %vm602_vm10 = vcmp.eq.s32.totalorder %v562_v35, 1  ;;  %v828_v38 = vsel %vm649_vm3, 1.0, %v1119_v41  ;;  %vm619_vm2 = vmand %vm507_vm15, %vm603_vm12  ;;  %v571_v59 = vpop.permute.xlu1 %570  ;;  %vm641_vm12 = vcmp.ne.s32.totalorder %v1879_v51, %v1204_v8 }
 0x112   :  { %vm618_vm13 = vmand %vm506_vm8, %vm602_vm10  ;;  %697 = vst [vmem:[%s2186_s9 + $0x10] sm:$0xff] %v828_v38  ;;  %v713_v40 = vmul.f32 %v828_v38, %v382_v60  ;;  %vm605_vm3 = vcmp.eq.s32.totalorder %v571_v59, 1  ;;  %vm510_vm15 = vcmp.eq.s32.totalorder %v1769_v25, %v1852_v10  ;;  %v387_v25 = vadd.f32 %v1750_v16, %v1927_v45  ;;  %v2250_v60 = vld [vmem:[#allocation4_spill] sm:$0xff] }
 0x113   :  { %v728_v56 = vmax.f32 %v712_v37, 0.0  ;;  %vm650_vm4 = vmand %vm618_vm13, %vm634_vm5  ;;  %v335_v45 = vmul.f32 0.5, %v319_v14  ;;  %v389_v35 = vadd.f32 %v1750_v16, %v1979_v47  ;;  %v2256_v47 = vld [vmem:[#allocation11_spill] sm:$0xff] }
 0x114   :  { %v829_v21 = vsel %vm650_vm4, 1.0, %v1119_v41  ;;  %v568_v1 = vpop.permute.xlu0 %567  ;;  %v729_v55 = vmax.f32 %v713_v40, 0.0  ;;  %vm651_vm5 = vmand %vm619_vm2, %vm635_vm9  ;;  %vm509_vm9 = vcmp.eq.s32.totalorder %v1763_v23, %v1852_v10 }
 0x115   :  { %744 = vst [vmem:[%s2185_s8 + $0x8] sm:$0xff] %v728_v56  ;;  %698 = vst [vmem:[%s2186_s9 + $0x18] sm:$0xff] %v829_v21  ;;  %v714_v44 = vmul.f32 %v829_v21, %v383_v61  ;;  %vm604_vm8 = vcmp.eq.s32.totalorder %v568_v1, 1  ;;  %v830_v15 = vsel %vm651_vm5, 1.0, %v1119_v41  ;;  %v577_v28 = vpop.permute.xlu1 %576  ;;  %v2252_v56 = vld [vmem:[#allocation7_spill] sm:$0xff]  ;;  %v2253_v61 = vld [vmem:[#allocation8_spill] sm:$0xff] }
 0x116   :  { %vm620_vm10 = vmand %vm508_vm1, %vm604_vm8  ;;  %745 = vst [vmem:[%s2185_s8 + $0x10] sm:$0xff] %v729_v55  ;;  %v715_v57 = vmul.f32 %v830_v15, %v384_v31  ;;  %vm642_vm1 = vcmp.ne.s32.totalorder %v1884_v62, %v1204_v8  ;;  %vm607_vm5 = vcmp.eq.s32.totalorder %v577_v28, 1  ;;  %v367_v40 = vadd.f32 %v2252_v56, %v335_v45  ;;  %v2254_v1 = vld [vmem:[#allocation5_spill] sm:$0xff] }
 0x117   :  { %v730_v54 = vmax.f32 %v714_v44, 0.0  ;;  %699 = vst [vmem:[%s2186_s9 + $0x20] sm:$0xff] %v830_v15  ;;  %vm652_vm13 = vmand %vm620_vm10, %vm636_vm11  ;;  %v366_v43 = vadd.f32 %v2253_v61, %v334_v46  ;;  %v429_v31 = vadd.s32 120, %v1781_v32  ;;  %v391_v55 = vadd.f32 %v1750_v16, %v2018_v33  ;;  %v2255_v32 = vld [vmem:[#allocation9_spill] sm:$0xff] }
 0x118   :  { %v831_v23 = vsel %vm652_vm13, 1.0, %v1119_v41  ;;  %vm621_vm4 = vmand %vm509_vm9, %vm605_vm3  ;;  %v574_v52 = vpop.permute.xlu0 %573  ;;  %v731_v6 = vmax.f32 %v715_v57, 0.0  ;;  %vm511_vm3 = vcmp.eq.s32.totalorder %v1767_v24, %v1852_v10  ;;  %v320_v24 = vadd.f32 %v1344_v36, %v1744_v11 }
 0x119   :  { %746 = vst [vmem:[%s2185_s8 + $0x18] sm:$0xff] %v730_v54  ;;  %700 = vst [vmem:[%s2186_s9 + $0x28] sm:$0xff] %v831_v23  ;;  %v716_v20 = vmul.f32 %v831_v23, %v385_v7  ;;  %vm606_vm2 = vcmp.eq.s32.totalorder %v574_v52, 1  ;;  %vm512_vm9 = vcmp.eq.s32.totalorder %v1773_v27, %v1852_v10  ;;  %v364_v11 = vadd.f32 %v1814_v39, %v332_v2  ;;  %v2257_v2 = vld [vmem:[#allocation10_spill] sm:$0xff] }
 0x11a   :  { %vm653_vm11 = vmand %vm621_vm4, %vm637_vm0  ;;  %vm643_vm0 = vcmp.ne.s32.totalorder %v1889_v48, %v1204_v8  ;;  %747 = vst [vmem:[%s2185_s8 + $0x20] sm:$0xff] %v731_v6  ;;  %v336_v27 = vmul.f32 0.5, %v320_v24  ;;  %v392_v0 = vadd.f32 %v1750_v16, %v366_v43 }
 0x11b   :  { %v832_v19 = vsel %vm653_vm11, 1.0, %v1119_v41  ;;  %vm622_vm8 = vmand %vm510_vm15, %vm606_vm2  ;;  %v732_v5 = vmax.f32 %v716_v20, 0.0  ;;  %vm644_vm15 = vcmp.ne.s32.totalorder %v1892_v42, %v1204_v8  ;;  %v390_v26 = vadd.f32 %v1750_v16, %v364_v11  ;;  %v2258_v20 = vld [vmem:[#allocation12_spill] sm:$0xff] }
 0x11c   :  { %701 = vst [vmem:[%s2186_s9 + $0x30] sm:$0xff] %v832_v19  ;;  %v717_v9 = vmul.f32 %v832_v19, %v386_v53  ;;  %vm654_vm10 = vmand %vm622_vm8, %vm638_vm7  ;;  %v580_v63 = vpop.permute.xlu0 %579  ;;  %vm514_vm8 = vcmp.eq.s32.totalorder %v2251_v18, %v1852_v10  ;;  %v368_v44 = vadd.f32 %v2255_v32, %v336_v27  ;;  %v393_v53 = vadd.f32 %v1750_v16, %v367_v40  ;;  %v2259_v19 = vld [vmem:[#allocation3_spill] sm:$0xff] }
 0x11d   :  { %v833_v58 = vsel %vm654_vm10, 1.0, %v1119_v41  ;;  %vm623_vm13 = vmand %vm511_vm3, %vm607_vm5  ;;  %748 = vst [vmem:[%s2185_s8 + $0x28] sm:$0xff] %v732_v5  ;;  %vm608_vm4 = vcmp.eq.s32.totalorder %v580_v63, 1  ;;  %vm513_vm5 = vcmp.eq.s32.totalorder %v2250_v60, %v1852_v10 }
 0x11e   :  { %v733_v13 = vmax.f32 %v717_v9, 0.0  ;;  %702 = vst [vmem:[%s2186_s9 + $0x38] sm:$0xff] %v833_v58  ;;  %v718_v36 = vmul.f32 %v833_v58, %v387_v25  ;;  %vm655_vm7 = vmand %vm623_vm13, %vm639_vm14  ;;  %v394_v28 = vadd.f32 %v1750_v16, %v368_v44 }
 0x11f   :  { %v834_v34 = vsel %vm655_vm7, 1.0, %v1119_v41  ;;  %vm624_vm2 = vmand %vm512_vm9, %vm608_vm4  ;;  %vm515_vm7 = vcmp.eq.s32.totalorder %v2254_v1, %v1852_v10  ;;  %vm516_vm4 = vcmp.eq.s32.totalorder %v2256_v47, %v1852_v10 }
 0x120   :  { %749 = vst [vmem:[%s2185_s8 + $0x30] sm:$0xff] %v733_v13  ;;  %v734_v49 = vmax.f32 %v718_v36, 0.0  ;;  %703 = vst [vmem:[%s2186_s9 + $0x40] sm:$0xff] %v834_v34  ;;  %v719_v39 = vmul.f32 %v834_v34, %v388_v12 }
 0x121   :  { %vm656_vm14 = vmand %vm624_vm2, %vm640_vm6 }
 0x122   :  { %v835_v37 = vsel %vm656_vm14, 1.0, %v1119_v41  ;;  %750 = vst [vmem:[%s2185_s8 + $0x38] sm:$0xff] %v734_v49  ;;  %v735_v38 = vmax.f32 %v719_v39, 0.0 }
 0x123   :  { %704 = vst [vmem:[%s2186_s9 + $0x48] sm:$0xff] %v835_v37  ;;  %v720_v17 = vmul.f32 %v835_v37, %v389_v35 }
 0x124   :  { %751 = vst [vmem:[%s2185_s8 + $0x40] sm:$0xff] %v735_v38 }
 0x125   :  { %v736_v51 = vmax.f32 %v720_v17, 0.0 }
 0x127   :  { %752 = vst [vmem:[%s2185_s8 + $0x48] sm:$0xff] %v736_v51 }
 0x144   :  { %v583_v30 = vpop.permute.xlu1 %582  ;;  %v586_v4 = vpop.permute.xlu0 %585 }
 0x145   :  { %vm609_vm11 = vcmp.eq.s32.totalorder %v583_v30, 1  ;;  %vm610_vm10 = vcmp.eq.s32.totalorder %v586_v4, 1 }
 0x146   :  { %vm625_vm3 = vmand %vm513_vm5, %vm609_vm11 }
 0x147   :  { %vm657_vm6 = vmand %vm625_vm3, %vm641_vm12  ;;  %vm517_vm3 = vcmp.eq.s32.totalorder %v2257_v2, %v1852_v10 }
 0x148   :  { %v589_v22 = vpop.permute.xlu1 %588  ;;  %v836_v21 = vsel %vm657_vm6, 1.0, %v1119_v41  ;;  %vm626_vm13 = vmand %vm514_vm8, %vm610_vm10  ;;  %v592_v15 = vpop.permute.xlu0 %591  ;;  %vm645_vm8 = vcmp.ne.s32.totalorder %v1899_v3, %v1204_v8  ;;  %vm646_vm10 = vcmp.ne.s32.totalorder %v429_v31, %v1204_v8 }
 0x149   :  { %vm611_vm9 = vcmp.eq.s32.totalorder %v589_v22, 1  ;;  %705 = vst [vmem:[%s2186_s9 + $0x50] sm:$0xff] %v836_v21  ;;  %v721_v59 = vmul.f32 %v836_v21, %v390_v26  ;;  %vm658_vm12 = vmand %vm626_vm13, %vm642_vm1  ;;  %vm612_vm2 = vcmp.eq.s32.totalorder %v592_v15, 1 }
 0x14a   :  { %v837_v29 = vsel %vm658_vm12, 1.0, %v1119_v41  ;;  %vm627_vm11 = vmand %vm515_vm7, %vm611_vm9  ;;  %vm518_vm9 = vcmp.eq.s32.totalorder %v2258_v20, %v1852_v10 }
 0x14b   :  { %v737_v57 = vmax.f32 %v721_v59, 0.0  ;;  %706 = vst [vmem:[%s2186_s9 + $0x58] sm:$0xff] %v837_v29  ;;  %v722_v62 = vmul.f32 %v837_v29, %v391_v55  ;;  %vm659_vm1 = vmand %vm627_vm11, %vm643_vm0 }
 0x14c   :  { %v595_v54 = vpop.permute.xlu1 %594  ;;  %v838_v7 = vsel %vm659_vm1, 1.0, %v1119_v41  ;;  %vm628_vm14 = vmand %vm516_vm4, %vm612_vm2  ;;  %v598_v6 = vpop.permute.xlu0 %597 }
 0x14d   :  { %vm613_vm5 = vcmp.eq.s32.totalorder %v595_v54, 1  ;;  %753 = vst [vmem:[%s2185_s8 + $0x50] sm:$0xff] %v737_v57  ;;  %v738_v23 = vmax.f32 %v722_v62, 0.0  ;;  %707 = vst [vmem:[%s2186_s9 + $0x60] sm:$0xff] %v838_v7  ;;  %v723_v48 = vmul.f32 %v838_v7, %v392_v0  ;;  %vm614_vm13 = vcmp.eq.s32.totalorder %v598_v6, 1 }
 0x14e   :  { %vm660_vm0 = vmand %vm628_vm14, %vm644_vm15 }
 0x14f   :  { %v839_v52 = vsel %vm660_vm0, 1.0, %v1119_v41  ;;  %vm629_vm6 = vmand %vm517_vm3, %vm613_vm5  ;;  %754 = vst [vmem:[%s2185_s8 + $0x58] sm:$0xff] %v738_v23  ;;  %v739_v33 = vmax.f32 %v723_v48, 0.0 }
 0x150   :  { %708 = vst [vmem:[%s2186_s9 + $0x68] sm:$0xff] %v839_v52  ;;  %v724_v42 = vmul.f32 %v839_v52, %v393_v53  ;;  %vm661_vm15 = vmand %vm629_vm6, %vm645_vm8 }
 0x151   :  { %v840_v16 = vsel %vm661_vm15, 1.0, %v1119_v41  ;;  %vm630_vm7 = vmand %vm518_vm9, %vm614_vm13  ;;  %755 = vst [vmem:[%s2185_s8 + $0x60] sm:$0xff] %v739_v33 }
 0x152   :  { %v740_v10 = vmax.f32 %v724_v42, 0.0  ;;  %709 = vst [vmem:[%s2186_s9 + $0x70] sm:$0xff] %v840_v16  ;;  %v725_v14 = vmul.f32 %v840_v16, %v394_v28  ;;  %vm662_vm12 = vmand %vm630_vm7, %vm646_vm10 }
 0x153   :  { %v841_v3 = vsel %vm662_vm12, 1.0, %v1119_v41 }
 0x154   :  { %756 = vst [vmem:[%s2185_s8 + $0x68] sm:$0xff] %v740_v10  ;;  %v741_v50 = vmax.f32 %v725_v14, 0.0  ;;  %710 = vst [vmem:[%s2186_s9 + $0x78] sm:$0xff] %v841_v3  ;;  %v726_v5 = vmul.f32 %v841_v3, %v2259_v19 }
 0x156   :  { %757 = vst [vmem:[%s2185_s8 + $0x70] sm:$0xff] %v741_v50  ;;  %v742_v9 = vmax.f32 %v726_v5, 0.0 }
 0x158   :  { %758 = vst [vmem:[%s2185_s8 + $0x78] sm:$0xff] %v742_v9 }

</bundles_post_ra>
